<compile_context>
chip_gen: v6e
topology: v6e:2x2x1
jax: 0.10.0
libtpu: 0.0.40
codegen_flags: <defaults>
</compile_context>

<pallas_src>
import functools

import jax
import jax.numpy as jnp
from jax.experimental import pallas as pl
from jax.experimental.pallas import tpu as pltpu

NEG_SLOPE = 0.2
NEG_INF = -1e30


# ----------------------------- in-kernel helpers -----------------------------

def _leaky_relu(x):
    return jnp.where(x > 0, x, NEG_SLOPE * x)


def _elu(x):
    return jnp.where(x > 0, x, jnp.exp(x) - 1.0)


def _masked_softmax(e, adj):
    e = jnp.where(adj > 0, e, NEG_INF)
    m = jnp.max(e, axis=1, keepdims=True)
    p = jnp.exp(e - m) * adj
    s = jnp.sum(p, axis=1, keepdims=True)
    return p / s


def _gat_heads(z, adj, al, ar, num_heads, head_feats):
    """One GATConv aggregation. al/ar: (z_cols, >=num_heads) projection matrices."""
    el = jnp.dot(z, al, preferred_element_type=jnp.float32)   # (N, Hp)  a_l . z_j
    er = jnp.dot(z, ar, preferred_element_type=jnp.float32)   # (N, Hp)  a_r . z_i
    elT = el.T                                                # (Hp, N)
    outs = []
    for h in range(num_heads):   # static unroll — num_heads is known at trace time
        e = _leaky_relu(er[:, h:h + 1] + elT[h:h + 1, :])     # (N_dst, N_src)
        alpha = _masked_softmax(e, adj)                       # attn_drop = identity (eval)
        zh = z[:, h * head_feats:(h + 1) * head_feats]        # (N, F)
        outs.append(jnp.dot(alpha, zh, preferred_element_type=jnp.float32))
    return outs


# ------------------------------- fused kernel --------------------------------

def _gat_kernel(x_ref, adj_ref, w1_ref, al1_ref, ar1_ref, b1_ref,
                w2_ref, al2_ref, ar2_ref, b2_ref, o_ref, h1_scratch,
                *, num_heads: int, head_feats: int, out_feats: int):
    x = x_ref[...]
    adj = adj_ref[...]

    # ----- GAT layer 1: num_heads heads, head_feats per head, ELU activation -----
    # TODO(synk): feat_drop / attn_drop are training-time Dropout -> identity (eval mode).
    z1 = jnp.dot(x, w1_ref[...], preferred_element_type=jnp.float32)        # (N, H*F)
    outs = _gat_heads(z1, adj, al1_ref[...], ar1_ref[...], num_heads, head_feats)
    for h, oh in enumerate(outs):
        h1_scratch[:, h * head_feats:(h + 1) * head_feats] = oh
    h1 = _elu(h1_scratch[...] + b1_ref[...])                                 # bias + ELU, flatten(1)

    # ----- GAT layer 2: single head -> out_feats, no activation -----
    z2 = jnp.dot(h1, w2_ref[...], preferred_element_type=jnp.float32)        # (N, C)
    (logits,) = _gat_heads(z2, adj, al2_ref[...], ar2_ref[...], 1, out_feats)
    logits = logits + b2_ref[...]
    # mean over heads is the identity for a single head

    # ----- log_softmax over classes -----
    m = jnp.max(logits, axis=1, keepdims=True)
    shifted = logits - m
    lse = jnp.log(jnp.sum(jnp.exp(shifted), axis=1, keepdims=True))
    o_ref[...] = (shifted - lse).astype(o_ref.dtype)


def gat_forward(params, adj, x, *, num_heads, head_feats, out_feats):
    n = x.shape[0]
    (w1, al1, ar1, b1, w2, al2, ar2, b2) = params
    kernel = functools.partial(_gat_kernel, num_heads=num_heads,
                               head_feats=head_feats, out_feats=out_feats)
    return pl.pallas_call(
        kernel,
        out_shape=jax.ShapeDtypeStruct((n, out_feats), jnp.float32),
        scratch_shapes=[pltpu.VMEM((n, num_heads * head_feats), jnp.float32)],
    )(x, adj, w1, al1, ar1, b1, w2, al2, ar2, b2)


# -------------------------- host-side parameter prep --------------------------

def block_diag_attn(a):
    """a: (H, F) per-head attention vector -> (H*F, H) block-diagonal projection."""
    h, f = a.shape
    m = jnp.zeros((h * f, h), jnp.float32)
    for i in range(h):
        m = m.at[i * f:(i + 1) * f, i].set(a[i])
    return m


def pad_attn_vec(a, width):
    """a: (C,) single-head attention vector -> (C, width); real vector in column 0."""
    c = a.shape[0]
    return jnp.zeros((c, width), jnp.float32).at[:, 0].set(a)


# ------------------------------ pure-JAX reference -----------------------------

def ref_gat_layer(h, adj, w, a_l, a_r, b, num_heads, out_per_head, apply_elu):
    n = h.shape[0]
    z = h @ w
    zh = z.reshape(n, num_heads, out_per_head)
    el = (zh * a_l[None]).sum(-1)                      # (N, H)
    er = (zh * a_r[None]).sum(-1)                      # (N, H)
    e = el[None, :, :] + er[:, None, :]                # (N_dst, N_src, H)
    e = jnp.where(e > 0, e, NEG_SLOPE * e)
    e = jnp.where(adj[:, :, None] > 0, e, NEG_INF)
    m = e.max(axis=1, keepdims=True)
    p = jnp.exp(e - m) * adj[:, :, None]
    alpha = p / p.sum(axis=1, keepdims=True)
    rst = jnp.einsum('ijh,jhf->ihf', alpha, zh)        # (N, H, F)
    rst = rst + b.reshape(1, num_heads, out_per_head)
    if apply_elu:
        rst = jnp.where(rst > 0, rst, jnp.exp(rst) - 1.0)
    return rst


def ref_gat_forward(x, adj, raw_params, num_heads, head_feats, out_feats):
    (w1, a_l1, a_r1, b1, w2, a_l2, a_r2, b2) = raw_params
    n = x.shape[0]
    h1 = ref_gat_layer(x, adj, w1, a_l1, a_r1, b1, num_heads, head_feats, True)
    h1 = h1.reshape(n, num_heads * head_feats)
    h2 = ref_gat_layer(h1, adj, w2, a_l2, a_r2, b2, 1, out_feats, False)
    logits = h2.mean(axis=1)                           # mean over heads (1 head)
    m = logits.max(axis=1, keepdims=True)
    return logits - m - jnp.log(jnp.exp(logits - m).sum(axis=1, keepdims=True))


# ---------------------------------- main --------------------------------------

if __name__ == "__main__":
    N = 64            # number of nodes
    IN_FEATS = 32
    N_UNITS = 8       # per-head hidden features (layer 1)
    NUM_HEADS = 8
    OUT_FEATS = 16    # number of classes

    root = jax.random.PRNGKey(0)
    keys = jax.random.split(root, 10)

    features = jax.random.normal(keys[0], (N, IN_FEATS), dtype=jnp.float32)

    # Symmetric random graph with self-loops; binary mask adj[i, j] = edge j -> i.
    r = jax.random.uniform(keys[1], (N, N))
    adj = ((r + r.T) > 1.4).astype(jnp.float32)
    adj = adj * (1.0 - jnp.eye(N, dtype=jnp.float32)) + jnp.eye(N, dtype=jnp.float32)

    s = 0.2
    w1 = s * jax.random.normal(keys[2], (IN_FEATS, NUM_HEADS * N_UNITS), jnp.float32)
    a_l1 = s * jax.random.normal(keys[3], (NUM_HEADS, N_UNITS), jnp.float32)
    a_r1 = s * jax.random.normal(keys[4], (NUM_HEADS, N_UNITS), jnp.float32)
    b1 = s * jax.random.normal(keys[5], (NUM_HEADS * N_UNITS,), jnp.float32)
    w2 = s * jax.random.normal(keys[6], (NUM_HEADS * N_UNITS, OUT_FEATS), jnp.float32)
    a_l2 = s * jax.random.normal(keys[7], (1, OUT_FEATS), jnp.float32)
    a_r2 = s * jax.random.normal(keys[8], (1, OUT_FEATS), jnp.float32)
    b2 = s * jax.random.normal(keys[9], (OUT_FEATS,), jnp.float32)

    # Kernel-side layout: attention vectors as MXU-friendly projection matrices.
    AL1 = block_diag_attn(a_l1)          # (H*F, H)
    AR1 = block_diag_attn(a_r1)          # (H*F, H)
    AL2 = pad_attn_vec(a_l2[0], 8)       # (C, 8), column 0 is the real vector
    AR2 = pad_attn_vec(a_r2[0], 8)
    params = (w1, AL1, AR1, b1.reshape(1, -1), w2, AL2, AR2, b2.reshape(1, -1))

    out = gat_forward(params, adj, features,
                      num_heads=NUM_HEADS, head_feats=N_UNITS, out_feats=OUT_FEATS)
    out = jax.block_until_ready(out)

    raw_params = (w1, a_l1, a_r1, b1, w2, a_l2, a_r2, b2)
    ref = ref_gat_forward(features, adj, raw_params, NUM_HEADS, N_UNITS, OUT_FEATS)

    assert out.shape == (N, OUT_FEATS)
    assert jnp.allclose(out, ref, atol=1e-4, rtol=1e-4), "mismatch vs reference"

    print("KERNEL_OK")
</pallas_src>

<mosaic_0001>
module attributes {stable_mosaic.version = 11 : i64} {
  func.func @_gat_kernel(%arg0: memref<64x32xf32, #tpu.memory_space<vmem>>, %arg1: memref<64x64xf32, #tpu.memory_space<vmem>>, %arg2: memref<32x64xf32, #tpu.memory_space<vmem>>, %arg3: memref<64x8xf32, #tpu.memory_space<vmem>>, %arg4: memref<64x8xf32, #tpu.memory_space<vmem>>, %arg5: memref<1x64xf32, #tpu.memory_space<vmem>>, %arg6: memref<64x16xf32, #tpu.memory_space<vmem>>, %arg7: memref<16x8xf32, #tpu.memory_space<vmem>>, %arg8: memref<16x8xf32, #tpu.memory_space<vmem>>, %arg9: memref<1x16xf32, #tpu.memory_space<vmem>>, %arg10: memref<64x16xf32, #tpu.memory_space<vmem>>, %arg11: memref<64x64xf32, #tpu.memory_space<vmem>>) attributes {dimension_semantics = [], scalar_prefetch = 0 : i64, scratch_operands = 1 : i64, tpu.core_type = #tpu.core_type<tc>} {
    %c0 = arith.constant 0 : index
    %c0_0 = arith.constant 0 : index
    %0 = vector.load %arg0[%c0, %c0_0] : memref<64x32xf32, #tpu.memory_space<vmem>>, vector<64x32xf32>
    %c0_1 = arith.constant 0 : index
    %c0_2 = arith.constant 0 : index
    %1 = vector.load %arg1[%c0_1, %c0_2] : memref<64x64xf32, #tpu.memory_space<vmem>>, vector<64x64xf32>
    %c0_3 = arith.constant 0 : index
    %c0_4 = arith.constant 0 : index
    %2 = vector.load %arg2[%c0_3, %c0_4] : memref<32x64xf32, #tpu.memory_space<vmem>>, vector<32x64xf32>
    %cst = arith.constant dense<0.000000e+00> : vector<64x64xf32>
    %3 = tpu.matmul %0, %2, %cst {dimension_numbers = #tpu.dot_dimension_numbers<[1], [0], [0], [1], [0, 0, 1, 1], [], []>} : vector<64x32xf32>, vector<32x64xf32>, vector<64x64xf32> -> vector<64x64xf32>
    %c0_5 = arith.constant 0 : index
    %c0_6 = arith.constant 0 : index
    %4 = vector.load %arg3[%c0_5, %c0_6] : memref<64x8xf32, #tpu.memory_space<vmem>>, vector<64x8xf32>
    %c0_7 = arith.constant 0 : index
    %c0_8 = arith.constant 0 : index
    %5 = vector.load %arg4[%c0_7, %c0_8] : memref<64x8xf32, #tpu.memory_space<vmem>>, vector<64x8xf32>
    %cst_9 = arith.constant dense<0.000000e+00> : vector<64x8xf32>
    %6 = tpu.matmul %3, %4, %cst_9 {dimension_numbers = #tpu.dot_dimension_numbers<[1], [0], [0], [1], [0, 0, 1, 1], [], []>} : vector<64x64xf32>, vector<64x8xf32>, vector<64x8xf32> -> vector<64x8xf32>
    %cst_10 = arith.constant dense<0.000000e+00> : vector<64x8xf32>
    %7 = tpu.matmul %3, %5, %cst_10 {dimension_numbers = #tpu.dot_dimension_numbers<[1], [0], [0], [1], [0, 0, 1, 1], [], []>} : vector<64x64xf32>, vector<64x8xf32>, vector<64x8xf32> -> vector<64x8xf32>
    %8 = tpu.transpose %6, [1, 0] : vector<64x8xf32> -> vector<8x64xf32>
    %9 = vector.extract_strided_slice %7 {offsets = [0, 0], sizes = [64, 1], strides = [1, 1]} : vector<64x8xf32> to vector<64x1xf32>
    %10 = vector.extract_strided_slice %8 {offsets = [0, 0], sizes = [1, 64], strides = [1, 1]} : vector<8x64xf32> to vector<1x64xf32>
    %11 = vector.broadcast %9 : vector<64x1xf32> to vector<64x64xf32>
    %12 = vector.broadcast %10 : vector<1x64xf32> to vector<64x64xf32>
    %13 = arith.addf %11, %12 : vector<64x64xf32>
    %cst_11 = arith.constant 0.000000e+00 : f32
    %14 = vector.broadcast %cst_11 : f32 to vector<64x64xf32>
    %15 = arith.cmpf ogt, %13, %14 : vector<64x64xf32>
    %cst_12 = arith.constant 2.000000e-01 : f32
    %16 = vector.broadcast %cst_12 : f32 to vector<64x64xf32>
    %17 = arith.mulf %16, %13 : vector<64x64xf32>
    %18 = arith.select %15, %13, %17 : vector<64x64xi1>, vector<64x64xf32>
    %cst_13 = arith.constant 0.000000e+00 : f32
    %19 = vector.broadcast %cst_13 : f32 to vector<64x64xf32>
    %20 = arith.cmpf ogt, %1, %19 : vector<64x64xf32>
    %cst_14 = arith.constant -1.000000e+30 : f32
    %21 = vector.broadcast %cst_14 : f32 to vector<64x64xf32>
    %22 = arith.select %20, %18, %21 : vector<64x64xi1>, vector<64x64xf32>
    %cst_15 = arith.constant dense<0xFF800000> : vector<64xf32>
    %23 = vector.multi_reduction <maximumf>, %22, %cst_15 [1] : vector<64x64xf32> to vector<64xf32>
    %24 = vector.shape_cast %23 : vector<64xf32> to vector<64x1xf32>
    %25 = vector.broadcast %24 : vector<64x1xf32> to vector<64x64xf32>
    %26 = arith.subf %22, %25 : vector<64x64xf32>
    %27 = math.exp %26 : vector<64x64xf32>
    %28 = arith.mulf %27, %1 : vector<64x64xf32>
    %cst_16 = arith.constant dense<0.000000e+00> : vector<64xf32>
    %29 = vector.multi_reduction <add>, %28, %cst_16 [1] : vector<64x64xf32> to vector<64xf32>
    %30 = vector.shape_cast %29 : vector<64xf32> to vector<64x1xf32>
    %31 = vector.broadcast %30 : vector<64x1xf32> to vector<64x64xf32>
    %32 = arith.divf %28, %31 : vector<64x64xf32>
    %33 = vector.extract_strided_slice %3 {offsets = [0, 0], sizes = [64, 8], strides = [1, 1]} : vector<64x64xf32> to vector<64x8xf32>
    %cst_17 = arith.constant dense<0.000000e+00> : vector<64x8xf32>
    %34 = tpu.matmul %32, %33, %cst_17 {dimension_numbers = #tpu.dot_dimension_numbers<[1], [0], [0], [1], [0, 0, 1, 1], [], []>} : vector<64x64xf32>, vector<64x8xf32>, vector<64x8xf32> -> vector<64x8xf32>
    %35 = vector.extract_strided_slice %7 {offsets = [0, 1], sizes = [64, 1], strides = [1, 1]} : vector<64x8xf32> to vector<64x1xf32>
    %36 = vector.extract_strided_slice %8 {offsets = [1, 0], sizes = [1, 64], strides = [1, 1]} : vector<8x64xf32> to vector<1x64xf32>
    %37 = vector.broadcast %35 : vector<64x1xf32> to vector<64x64xf32>
    %38 = vector.broadcast %36 : vector<1x64xf32> to vector<64x64xf32>
    %39 = arith.addf %37, %38 : vector<64x64xf32>
    %cst_18 = arith.constant 0.000000e+00 : f32
    %40 = vector.broadcast %cst_18 : f32 to vector<64x64xf32>
    %41 = arith.cmpf ogt, %39, %40 : vector<64x64xf32>
    %cst_19 = arith.constant 2.000000e-01 : f32
    %42 = vector.broadcast %cst_19 : f32 to vector<64x64xf32>
    %43 = arith.mulf %42, %39 : vector<64x64xf32>
    %44 = arith.select %41, %39, %43 : vector<64x64xi1>, vector<64x64xf32>
    %cst_20 = arith.constant 0.000000e+00 : f32
    %45 = vector.broadcast %cst_20 : f32 to vector<64x64xf32>
    %46 = arith.cmpf ogt, %1, %45 : vector<64x64xf32>
    %cst_21 = arith.constant -1.000000e+30 : f32
    %47 = vector.broadcast %cst_21 : f32 to vector<64x64xf32>
    %48 = arith.select %46, %44, %47 : vector<64x64xi1>, vector<64x64xf32>
    %cst_22 = arith.constant dense<0xFF800000> : vector<64xf32>
    %49 = vector.multi_reduction <maximumf>, %48, %cst_22 [1] : vector<64x64xf32> to vector<64xf32>
    %50 = vector.shape_cast %49 : vector<64xf32> to vector<64x1xf32>
    %51 = vector.broadcast %50 : vector<64x1xf32> to vector<64x64xf32>
    %52 = arith.subf %48, %51 : vector<64x64xf32>
    %53 = math.exp %52 : vector<64x64xf32>
    %54 = arith.mulf %53, %1 : vector<64x64xf32>
    %cst_23 = arith.constant dense<0.000000e+00> : vector<64xf32>
    %55 = vector.multi_reduction <add>, %54, %cst_23 [1] : vector<64x64xf32> to vector<64xf32>
    %56 = vector.shape_cast %55 : vector<64xf32> to vector<64x1xf32>
    %57 = vector.broadcast %56 : vector<64x1xf32> to vector<64x64xf32>
    %58 = arith.divf %54, %57 : vector<64x64xf32>
    %59 = vector.extract_strided_slice %3 {offsets = [0, 8], sizes = [64, 8], strides = [1, 1]} : vector<64x64xf32> to vector<64x8xf32>
    %cst_24 = arith.constant dense<0.000000e+00> : vector<64x8xf32>
    %60 = tpu.matmul %58, %59, %cst_24 {dimension_numbers = #tpu.dot_dimension_numbers<[1], [0], [0], [1], [0, 0, 1, 1], [], []>} : vector<64x64xf32>, vector<64x8xf32>, vector<64x8xf32> -> vector<64x8xf32>
    %61 = vector.extract_strided_slice %7 {offsets = [0, 2], sizes = [64, 1], strides = [1, 1]} : vector<64x8xf32> to vector<64x1xf32>
    %62 = vector.extract_strided_slice %8 {offsets = [2, 0], sizes = [1, 64], strides = [1, 1]} : vector<8x64xf32> to vector<1x64xf32>
    %63 = vector.broadcast %61 : vector<64x1xf32> to vector<64x64xf32>
    %64 = vector.broadcast %62 : vector<1x64xf32> to vector<64x64xf32>
    %65 = arith.addf %63, %64 : vector<64x64xf32>
    %cst_25 = arith.constant 0.000000e+00 : f32
    %66 = vector.broadcast %cst_25 : f32 to vector<64x64xf32>
    %67 = arith.cmpf ogt, %65, %66 : vector<64x64xf32>
    %cst_26 = arith.constant 2.000000e-01 : f32
    %68 = vector.broadcast %cst_26 : f32 to vector<64x64xf32>
    %69 = arith.mulf %68, %65 : vector<64x64xf32>
    %70 = arith.select %67, %65, %69 : vector<64x64xi1>, vector<64x64xf32>
    %cst_27 = arith.constant 0.000000e+00 : f32
    %71 = vector.broadcast %cst_27 : f32 to vector<64x64xf32>
    %72 = arith.cmpf ogt, %1, %71 : vector<64x64xf32>
    %cst_28 = arith.constant -1.000000e+30 : f32
    %73 = vector.broadcast %cst_28 : f32 to vector<64x64xf32>
    %74 = arith.select %72, %70, %73 : vector<64x64xi1>, vector<64x64xf32>
    %cst_29 = arith.constant dense<0xFF800000> : vector<64xf32>
    %75 = vector.multi_reduction <maximumf>, %74, %cst_29 [1] : vector<64x64xf32> to vector<64xf32>
    %76 = vector.shape_cast %75 : vector<64xf32> to vector<64x1xf32>
    %77 = vector.broadcast %76 : vector<64x1xf32> to vector<64x64xf32>
    %78 = arith.subf %74, %77 : vector<64x64xf32>
    %79 = math.exp %78 : vector<64x64xf32>
    %80 = arith.mulf %79, %1 : vector<64x64xf32>
    %cst_30 = arith.constant dense<0.000000e+00> : vector<64xf32>
    %81 = vector.multi_reduction <add>, %80, %cst_30 [1] : vector<64x64xf32> to vector<64xf32>
    %82 = vector.shape_cast %81 : vector<64xf32> to vector<64x1xf32>
    %83 = vector.broadcast %82 : vector<64x1xf32> to vector<64x64xf32>
    %84 = arith.divf %80, %83 : vector<64x64xf32>
    %85 = vector.extract_strided_slice %3 {offsets = [0, 16], sizes = [64, 8], strides = [1, 1]} : vector<64x64xf32> to vector<64x8xf32>
    %cst_31 = arith.constant dense<0.000000e+00> : vector<64x8xf32>
    %86 = tpu.matmul %84, %85, %cst_31 {dimension_numbers = #tpu.dot_dimension_numbers<[1], [0], [0], [1], [0, 0, 1, 1], [], []>} : vector<64x64xf32>, vector<64x8xf32>, vector<64x8xf32> -> vector<64x8xf32>
    %87 = vector.extract_strided_slice %7 {offsets = [0, 3], sizes = [64, 1], strides = [1, 1]} : vector<64x8xf32> to vector<64x1xf32>
    %88 = vector.extract_strided_slice %8 {offsets = [3, 0], sizes = [1, 64], strides = [1, 1]} : vector<8x64xf32> to vector<1x64xf32>
    %89 = vector.broadcast %87 : vector<64x1xf32> to vector<64x64xf32>
    %90 = vector.broadcast %88 : vector<1x64xf32> to vector<64x64xf32>
    %91 = arith.addf %89, %90 : vector<64x64xf32>
    %cst_32 = arith.constant 0.000000e+00 : f32
    %92 = vector.broadcast %cst_32 : f32 to vector<64x64xf32>
    %93 = arith.cmpf ogt, %91, %92 : vector<64x64xf32>
    %cst_33 = arith.constant 2.000000e-01 : f32
    %94 = vector.broadcast %cst_33 : f32 to vector<64x64xf32>
    %95 = arith.mulf %94, %91 : vector<64x64xf32>
    %96 = arith.select %93, %91, %95 : vector<64x64xi1>, vector<64x64xf32>
    %cst_34 = arith.constant 0.000000e+00 : f32
    %97 = vector.broadcast %cst_34 : f32 to vector<64x64xf32>
    %98 = arith.cmpf ogt, %1, %97 : vector<64x64xf32>
    %cst_35 = arith.constant -1.000000e+30 : f32
    %99 = vector.broadcast %cst_35 : f32 to vector<64x64xf32>
    %100 = arith.select %98, %96, %99 : vector<64x64xi1>, vector<64x64xf32>
    %cst_36 = arith.constant dense<0xFF800000> : vector<64xf32>
    %101 = vector.multi_reduction <maximumf>, %100, %cst_36 [1] : vector<64x64xf32> to vector<64xf32>
    %102 = vector.shape_cast %101 : vector<64xf32> to vector<64x1xf32>
    %103 = vector.broadcast %102 : vector<64x1xf32> to vector<64x64xf32>
    %104 = arith.subf %100, %103 : vector<64x64xf32>
    %105 = math.exp %104 : vector<64x64xf32>
    %106 = arith.mulf %105, %1 : vector<64x64xf32>
    %cst_37 = arith.constant dense<0.000000e+00> : vector<64xf32>
    %107 = vector.multi_reduction <add>, %106, %cst_37 [1] : vector<64x64xf32> to vector<64xf32>
    %108 = vector.shape_cast %107 : vector<64xf32> to vector<64x1xf32>
    %109 = vector.broadcast %108 : vector<64x1xf32> to vector<64x64xf32>
    %110 = arith.divf %106, %109 : vector<64x64xf32>
    %111 = vector.extract_strided_slice %3 {offsets = [0, 24], sizes = [64, 8], strides = [1, 1]} : vector<64x64xf32> to vector<64x8xf32>
    %cst_38 = arith.constant dense<0.000000e+00> : vector<64x8xf32>
    %112 = tpu.matmul %110, %111, %cst_38 {dimension_numbers = #tpu.dot_dimension_numbers<[1], [0], [0], [1], [0, 0, 1, 1], [], []>} : vector<64x64xf32>, vector<64x8xf32>, vector<64x8xf32> -> vector<64x8xf32>
    %113 = vector.extract_strided_slice %7 {offsets = [0, 4], sizes = [64, 1], strides = [1, 1]} : vector<64x8xf32> to vector<64x1xf32>
    %114 = vector.extract_strided_slice %8 {offsets = [4, 0], sizes = [1, 64], strides = [1, 1]} : vector<8x64xf32> to vector<1x64xf32>
    %115 = vector.broadcast %113 : vector<64x1xf32> to vector<64x64xf32>
    %116 = vector.broadcast %114 : vector<1x64xf32> to vector<64x64xf32>
    %117 = arith.addf %115, %116 : vector<64x64xf32>
    %cst_39 = arith.constant 0.000000e+00 : f32
    %118 = vector.broadcast %cst_39 : f32 to vector<64x64xf32>
    %119 = arith.cmpf ogt, %117, %118 : vector<64x64xf32>
    %cst_40 = arith.constant 2.000000e-01 : f32
    %120 = vector.broadcast %cst_40 : f32 to vector<64x64xf32>
    %121 = arith.mulf %120, %117 : vector<64x64xf32>
    %122 = arith.select %119, %117, %121 : vector<64x64xi1>, vector<64x64xf32>
    %cst_41 = arith.constant 0.000000e+00 : f32
    %123 = vector.broadcast %cst_41 : f32 to vector<64x64xf32>
    %124 = arith.cmpf ogt, %1, %123 : vector<64x64xf32>
    %cst_42 = arith.constant -1.000000e+30 : f32
    %125 = vector.broadcast %cst_42 : f32 to vector<64x64xf32>
    %126 = arith.select %124, %122, %125 : vector<64x64xi1>, vector<64x64xf32>
    %cst_43 = arith.constant dense<0xFF800000> : vector<64xf32>
    %127 = vector.multi_reduction <maximumf>, %126, %cst_43 [1] : vector<64x64xf32> to vector<64xf32>
    %128 = vector.shape_cast %127 : vector<64xf32> to vector<64x1xf32>
    %129 = vector.broadcast %128 : vector<64x1xf32> to vector<64x64xf32>
    %130 = arith.subf %126, %129 : vector<64x64xf32>
    %131 = math.exp %130 : vector<64x64xf32>
    %132 = arith.mulf %131, %1 : vector<64x64xf32>
    %cst_44 = arith.constant dense<0.000000e+00> : vector<64xf32>
    %133 = vector.multi_reduction <add>, %132, %cst_44 [1] : vector<64x64xf32> to vector<64xf32>
    %134 = vector.shape_cast %133 : vector<64xf32> to vector<64x1xf32>
    %135 = vector.broadcast %134 : vector<64x1xf32> to vector<64x64xf32>
    %136 = arith.divf %132, %135 : vector<64x64xf32>
    %137 = vector.extract_strided_slice %3 {offsets = [0, 32], sizes = [64, 8], strides = [1, 1]} : vector<64x64xf32> to vector<64x8xf32>
    %cst_45 = arith.constant dense<0.000000e+00> : vector<64x8xf32>
    %138 = tpu.matmul %136, %137, %cst_45 {dimension_numbers = #tpu.dot_dimension_numbers<[1], [0], [0], [1], [0, 0, 1, 1], [], []>} : vector<64x64xf32>, vector<64x8xf32>, vector<64x8xf32> -> vector<64x8xf32>
    %139 = vector.extract_strided_slice %7 {offsets = [0, 5], sizes = [64, 1], strides = [1, 1]} : vector<64x8xf32> to vector<64x1xf32>
    %140 = vector.extract_strided_slice %8 {offsets = [5, 0], sizes = [1, 64], strides = [1, 1]} : vector<8x64xf32> to vector<1x64xf32>
    %141 = vector.broadcast %139 : vector<64x1xf32> to vector<64x64xf32>
    %142 = vector.broadcast %140 : vector<1x64xf32> to vector<64x64xf32>
    %143 = arith.addf %141, %142 : vector<64x64xf32>
    %cst_46 = arith.constant 0.000000e+00 : f32
    %144 = vector.broadcast %cst_46 : f32 to vector<64x64xf32>
    %145 = arith.cmpf ogt, %143, %144 : vector<64x64xf32>
    %cst_47 = arith.constant 2.000000e-01 : f32
    %146 = vector.broadcast %cst_47 : f32 to vector<64x64xf32>
    %147 = arith.mulf %146, %143 : vector<64x64xf32>
    %148 = arith.select %145, %143, %147 : vector<64x64xi1>, vector<64x64xf32>
    %cst_48 = arith.constant 0.000000e+00 : f32
    %149 = vector.broadcast %cst_48 : f32 to vector<64x64xf32>
    %150 = arith.cmpf ogt, %1, %149 : vector<64x64xf32>
    %cst_49 = arith.constant -1.000000e+30 : f32
    %151 = vector.broadcast %cst_49 : f32 to vector<64x64xf32>
    %152 = arith.select %150, %148, %151 : vector<64x64xi1>, vector<64x64xf32>
    %cst_50 = arith.constant dense<0xFF800000> : vector<64xf32>
    %153 = vector.multi_reduction <maximumf>, %152, %cst_50 [1] : vector<64x64xf32> to vector<64xf32>
    %154 = vector.shape_cast %153 : vector<64xf32> to vector<64x1xf32>
    %155 = vector.broadcast %154 : vector<64x1xf32> to vector<64x64xf32>
    %156 = arith.subf %152, %155 : vector<64x64xf32>
    %157 = math.exp %156 : vector<64x64xf32>
    %158 = arith.mulf %157, %1 : vector<64x64xf32>
    %cst_51 = arith.constant dense<0.000000e+00> : vector<64xf32>
    %159 = vector.multi_reduction <add>, %158, %cst_51 [1] : vector<64x64xf32> to vector<64xf32>
    %160 = vector.shape_cast %159 : vector<64xf32> to vector<64x1xf32>
    %161 = vector.broadcast %160 : vector<64x1xf32> to vector<64x64xf32>
    %162 = arith.divf %158, %161 : vector<64x64xf32>
    %163 = vector.extract_strided_slice %3 {offsets = [0, 40], sizes = [64, 8], strides = [1, 1]} : vector<64x64xf32> to vector<64x8xf32>
    %cst_52 = arith.constant dense<0.000000e+00> : vector<64x8xf32>
    %164 = tpu.matmul %162, %163, %cst_52 {dimension_numbers = #tpu.dot_dimension_numbers<[1], [0], [0], [1], [0, 0, 1, 1], [], []>} : vector<64x64xf32>, vector<64x8xf32>, vector<64x8xf32> -> vector<64x8xf32>
    %165 = vector.extract_strided_slice %7 {offsets = [0, 6], sizes = [64, 1], strides = [1, 1]} : vector<64x8xf32> to vector<64x1xf32>
    %166 = vector.extract_strided_slice %8 {offsets = [6, 0], sizes = [1, 64], strides = [1, 1]} : vector<8x64xf32> to vector<1x64xf32>
    %167 = vector.broadcast %165 : vector<64x1xf32> to vector<64x64xf32>
    %168 = vector.broadcast %166 : vector<1x64xf32> to vector<64x64xf32>
    %169 = arith.addf %167, %168 : vector<64x64xf32>
    %cst_53 = arith.constant 0.000000e+00 : f32
    %170 = vector.broadcast %cst_53 : f32 to vector<64x64xf32>
    %171 = arith.cmpf ogt, %169, %170 : vector<64x64xf32>
    %cst_54 = arith.constant 2.000000e-01 : f32
    %172 = vector.broadcast %cst_54 : f32 to vector<64x64xf32>
    %173 = arith.mulf %172, %169 : vector<64x64xf32>
    %174 = arith.select %171, %169, %173 : vector<64x64xi1>, vector<64x64xf32>
    %cst_55 = arith.constant 0.000000e+00 : f32
    %175 = vector.broadcast %cst_55 : f32 to vector<64x64xf32>
    %176 = arith.cmpf ogt, %1, %175 : vector<64x64xf32>
    %cst_56 = arith.constant -1.000000e+30 : f32
    %177 = vector.broadcast %cst_56 : f32 to vector<64x64xf32>
    %178 = arith.select %176, %174, %177 : vector<64x64xi1>, vector<64x64xf32>
    %cst_57 = arith.constant dense<0xFF800000> : vector<64xf32>
    %179 = vector.multi_reduction <maximumf>, %178, %cst_57 [1] : vector<64x64xf32> to vector<64xf32>
    %180 = vector.shape_cast %179 : vector<64xf32> to vector<64x1xf32>
    %181 = vector.broadcast %180 : vector<64x1xf32> to vector<64x64xf32>
    %182 = arith.subf %178, %181 : vector<64x64xf32>
    %183 = math.exp %182 : vector<64x64xf32>
    %184 = arith.mulf %183, %1 : vector<64x64xf32>
    %cst_58 = arith.constant dense<0.000000e+00> : vector<64xf32>
    %185 = vector.multi_reduction <add>, %184, %cst_58 [1] : vector<64x64xf32> to vector<64xf32>
    %186 = vector.shape_cast %185 : vector<64xf32> to vector<64x1xf32>
    %187 = vector.broadcast %186 : vector<64x1xf32> to vector<64x64xf32>
    %188 = arith.divf %184, %187 : vector<64x64xf32>
    %189 = vector.extract_strided_slice %3 {offsets = [0, 48], sizes = [64, 8], strides = [1, 1]} : vector<64x64xf32> to vector<64x8xf32>
    %cst_59 = arith.constant dense<0.000000e+00> : vector<64x8xf32>
    %190 = tpu.matmul %188, %189, %cst_59 {dimension_numbers = #tpu.dot_dimension_numbers<[1], [0], [0], [1], [0, 0, 1, 1], [], []>} : vector<64x64xf32>, vector<64x8xf32>, vector<64x8xf32> -> vector<64x8xf32>
    %191 = vector.extract_strided_slice %7 {offsets = [0, 7], sizes = [64, 1], strides = [1, 1]} : vector<64x8xf32> to vector<64x1xf32>
    %192 = vector.extract_strided_slice %8 {offsets = [7, 0], sizes = [1, 64], strides = [1, 1]} : vector<8x64xf32> to vector<1x64xf32>
    %193 = vector.broadcast %191 : vector<64x1xf32> to vector<64x64xf32>
    %194 = vector.broadcast %192 : vector<1x64xf32> to vector<64x64xf32>
    %195 = arith.addf %193, %194 : vector<64x64xf32>
    %cst_60 = arith.constant 0.000000e+00 : f32
    %196 = vector.broadcast %cst_60 : f32 to vector<64x64xf32>
    %197 = arith.cmpf ogt, %195, %196 : vector<64x64xf32>
    %cst_61 = arith.constant 2.000000e-01 : f32
    %198 = vector.broadcast %cst_61 : f32 to vector<64x64xf32>
    %199 = arith.mulf %198, %195 : vector<64x64xf32>
    %200 = arith.select %197, %195, %199 : vector<64x64xi1>, vector<64x64xf32>
    %cst_62 = arith.constant 0.000000e+00 : f32
    %201 = vector.broadcast %cst_62 : f32 to vector<64x64xf32>
    %202 = arith.cmpf ogt, %1, %201 : vector<64x64xf32>
    %cst_63 = arith.constant -1.000000e+30 : f32
    %203 = vector.broadcast %cst_63 : f32 to vector<64x64xf32>
    %204 = arith.select %202, %200, %203 : vector<64x64xi1>, vector<64x64xf32>
    %cst_64 = arith.constant dense<0xFF800000> : vector<64xf32>
    %205 = vector.multi_reduction <maximumf>, %204, %cst_64 [1] : vector<64x64xf32> to vector<64xf32>
    %206 = vector.shape_cast %205 : vector<64xf32> to vector<64x1xf32>
    %207 = vector.broadcast %206 : vector<64x1xf32> to vector<64x64xf32>
    %208 = arith.subf %204, %207 : vector<64x64xf32>
    %209 = math.exp %208 : vector<64x64xf32>
    %210 = arith.mulf %209, %1 : vector<64x64xf32>
    %cst_65 = arith.constant dense<0.000000e+00> : vector<64xf32>
    %211 = vector.multi_reduction <add>, %210, %cst_65 [1] : vector<64x64xf32> to vector<64xf32>
    %212 = vector.shape_cast %211 : vector<64xf32> to vector<64x1xf32>
    %213 = vector.broadcast %212 : vector<64x1xf32> to vector<64x64xf32>
    %214 = arith.divf %210, %213 : vector<64x64xf32>
    %215 = vector.extract_strided_slice %3 {offsets = [0, 56], sizes = [64, 8], strides = [1, 1]} : vector<64x64xf32> to vector<64x8xf32>
    %cst_66 = arith.constant dense<0.000000e+00> : vector<64x8xf32>
    %216 = tpu.matmul %214, %215, %cst_66 {dimension_numbers = #tpu.dot_dimension_numbers<[1], [0], [0], [1], [0, 0, 1, 1], [], []>} : vector<64x64xf32>, vector<64x8xf32>, vector<64x8xf32> -> vector<64x8xf32>
    %c0_67 = arith.constant 0 : index
    %c0_68 = arith.constant 0 : index
    %217 = vector.load %arg11[%c0_67, %c0_68] : memref<64x64xf32, #tpu.memory_space<vmem>>, vector<64x8xf32>
    tpu.vector_store %arg11[%c0_67, %c0_68], %34 {strides = array<i32>} : memref<64x64xf32, #tpu.memory_space<vmem>>, vector<64x8xf32>,
    %c0_69 = arith.constant 0 : index
    %c8 = arith.constant 8 : index
    %218 = vector.load %arg11[%c0_69, %c8] : memref<64x64xf32, #tpu.memory_space<vmem>>, vector<64x8xf32>
    tpu.vector_store %arg11[%c0_69, %c8], %60 {strides = array<i32>} : memref<64x64xf32, #tpu.memory_space<vmem>>, vector<64x8xf32>,
    %c0_70 = arith.constant 0 : index
    %c16 = arith.constant 16 : index
    %219 = vector.load %arg11[%c0_70, %c16] : memref<64x64xf32, #tpu.memory_space<vmem>>, vector<64x8xf32>
    tpu.vector_store %arg11[%c0_70, %c16], %86 {strides = array<i32>} : memref<64x64xf32, #tpu.memory_space<vmem>>, vector<64x8xf32>,
    %c0_71 = arith.constant 0 : index
    %c24 = arith.constant 24 : index
    %220 = vector.load %arg11[%c0_71, %c24] : memref<64x64xf32, #tpu.memory_space<vmem>>, vector<64x8xf32>
    tpu.vector_store %arg11[%c0_71, %c24], %112 {strides = array<i32>} : memref<64x64xf32, #tpu.memory_space<vmem>>, vector<64x8xf32>,
    %c0_72 = arith.constant 0 : index
    %c32 = arith.constant 32 : index
    %221 = vector.load %arg11[%c0_72, %c32] : memref<64x64xf32, #tpu.memory_space<vmem>>, vector<64x8xf32>
    tpu.vector_store %arg11[%c0_72, %c32], %138 {strides = array<i32>} : memref<64x64xf32, #tpu.memory_space<vmem>>, vector<64x8xf32>,
    %c0_73 = arith.constant 0 : index
    %c40 = arith.constant 40 : index
    %222 = vector.load %arg11[%c0_73, %c40] : memref<64x64xf32, #tpu.memory_space<vmem>>, vector<64x8xf32>
    tpu.vector_store %arg11[%c0_73, %c40], %164 {strides = array<i32>} : memref<64x64xf32, #tpu.memory_space<vmem>>, vector<64x8xf32>,
    %c0_74 = arith.constant 0 : index
    %c48 = arith.constant 48 : index
    %223 = vector.load %arg11[%c0_74, %c48] : memref<64x64xf32, #tpu.memory_space<vmem>>, vector<64x8xf32>
    tpu.vector_store %arg11[%c0_74, %c48], %190 {strides = array<i32>} : memref<64x64xf32, #tpu.memory_space<vmem>>, vector<64x8xf32>,
    %c0_75 = arith.constant 0 : index
    %c56 = arith.constant 56 : index
    %224 = vector.load %arg11[%c0_75, %c56] : memref<64x64xf32, #tpu.memory_space<vmem>>, vector<64x8xf32>
    tpu.vector_store %arg11[%c0_75, %c56], %216 {strides = array<i32>} : memref<64x64xf32, #tpu.memory_space<vmem>>, vector<64x8xf32>,
    %c0_76 = arith.constant 0 : index
    %c0_77 = arith.constant 0 : index
    %225 = vector.load %arg11[%c0_76, %c0_77] : memref<64x64xf32, #tpu.memory_space<vmem>>, vector<64x64xf32>
    %c0_78 = arith.constant 0 : index
    %c0_79 = arith.constant 0 : index
    %226 = vector.load %arg5[%c0_78, %c0_79] : memref<1x64xf32, #tpu.memory_space<vmem>>, vector<1x64xf32>
    %227 = vector.broadcast %226 : vector<1x64xf32> to vector<64x64xf32>
    %228 = arith.addf %225, %227 : vector<64x64xf32>
    %cst_80 = arith.constant 0.000000e+00 : f32
    %229 = vector.broadcast %cst_80 : f32 to vector<64x64xf32>
    %230 = arith.cmpf ogt, %228, %229 : vector<64x64xf32>
    %231 = math.exp %228 : vector<64x64xf32>
    %cst_81 = arith.constant 1.000000e+00 : f32
    %232 = vector.broadcast %cst_81 : f32 to vector<64x64xf32>
    %233 = arith.subf %231, %232 : vector<64x64xf32>
    %234 = arith.select %230, %228, %233 : vector<64x64xi1>, vector<64x64xf32>
    %c0_82 = arith.constant 0 : index
    %c0_83 = arith.constant 0 : index
    %235 = vector.load %arg6[%c0_82, %c0_83] : memref<64x16xf32, #tpu.memory_space<vmem>>, vector<64x16xf32>
    %cst_84 = arith.constant dense<0.000000e+00> : vector<64x16xf32>
    %236 = tpu.matmul %234, %235, %cst_84 {dimension_numbers = #tpu.dot_dimension_numbers<[1], [0], [0], [1], [0, 0, 1, 1], [], []>} : vector<64x64xf32>, vector<64x16xf32>, vector<64x16xf32> -> vector<64x16xf32>
    %c0_85 = arith.constant 0 : index
    %c0_86 = arith.constant 0 : index
    %237 = vector.load %arg7[%c0_85, %c0_86] : memref<16x8xf32, #tpu.memory_space<vmem>>, vector<16x8xf32>
    %c0_87 = arith.constant 0 : index
    %c0_88 = arith.constant 0 : index
    %238 = vector.load %arg8[%c0_87, %c0_88] : memref<16x8xf32, #tpu.memory_space<vmem>>, vector<16x8xf32>
    %cst_89 = arith.constant dense<0.000000e+00> : vector<64x8xf32>
    %239 = tpu.matmul %236, %237, %cst_89 {dimension_numbers = #tpu.dot_dimension_numbers<[1], [0], [0], [1], [0, 0, 1, 1], [], []>} : vector<64x16xf32>, vector<16x8xf32>, vector<64x8xf32> -> vector<64x8xf32>
    %cst_90 = arith.constant dense<0.000000e+00> : vector<64x8xf32>
    %240 = tpu.matmul %236, %238, %cst_90 {dimension_numbers = #tpu.dot_dimension_numbers<[1], [0], [0], [1], [0, 0, 1, 1], [], []>} : vector<64x16xf32>, vector<16x8xf32>, vector<64x8xf32> -> vector<64x8xf32>
    %241 = tpu.transpose %239, [1, 0] : vector<64x8xf32> -> vector<8x64xf32>
    %242 = vector.extract_strided_slice %240 {offsets = [0, 0], sizes = [64, 1], strides = [1, 1]} : vector<64x8xf32> to vector<64x1xf32>
    %243 = vector.extract_strided_slice %241 {offsets = [0, 0], sizes = [1, 64], strides = [1, 1]} : vector<8x64xf32> to vector<1x64xf32>
    %244 = vector.broadcast %242 : vector<64x1xf32> to vector<64x64xf32>
    %245 = vector.broadcast %243 : vector<1x64xf32> to vector<64x64xf32>
    %246 = arith.addf %244, %245 : vector<64x64xf32>
    %cst_91 = arith.constant 0.000000e+00 : f32
    %247 = vector.broadcast %cst_91 : f32 to vector<64x64xf32>
    %248 = arith.cmpf ogt, %246, %247 : vector<64x64xf32>
    %cst_92 = arith.constant 2.000000e-01 : f32
    %249 = vector.broadcast %cst_92 : f32 to vector<64x64xf32>
    %250 = arith.mulf %249, %246 : vector<64x64xf32>
    %251 = arith.select %248, %246, %250 : vector<64x64xi1>, vector<64x64xf32>
    %cst_93 = arith.constant 0.000000e+00 : f32
    %252 = vector.broadcast %cst_93 : f32 to vector<64x64xf32>
    %253 = arith.cmpf ogt, %1, %252 : vector<64x64xf32>
    %cst_94 = arith.constant -1.000000e+30 : f32
    %254 = vector.broadcast %cst_94 : f32 to vector<64x64xf32>
    %255 = arith.select %253, %251, %254 : vector<64x64xi1>, vector<64x64xf32>
    %cst_95 = arith.constant dense<0xFF800000> : vector<64xf32>
    %256 = vector.multi_reduction <maximumf>, %255, %cst_95 [1] : vector<64x64xf32> to vector<64xf32>
    %257 = vector.shape_cast %256 : vector<64xf32> to vector<64x1xf32>
    %258 = vector.broadcast %257 : vector<64x1xf32> to vector<64x64xf32>
    %259 = arith.subf %255, %258 : vector<64x64xf32>
    %260 = math.exp %259 : vector<64x64xf32>
    %261 = arith.mulf %260, %1 : vector<64x64xf32>
    %cst_96 = arith.constant dense<0.000000e+00> : vector<64xf32>
    %262 = vector.multi_reduction <add>, %261, %cst_96 [1] : vector<64x64xf32> to vector<64xf32>
    %263 = vector.shape_cast %262 : vector<64xf32> to vector<64x1xf32>
    %264 = vector.broadcast %263 : vector<64x1xf32> to vector<64x64xf32>
    %265 = arith.divf %261, %264 : vector<64x64xf32>
    %cst_97 = arith.constant dense<0.000000e+00> : vector<64x16xf32>
    %266 = tpu.matmul %265, %236, %cst_97 {dimension_numbers = #tpu.dot_dimension_numbers<[1], [0], [0], [1], [0, 0, 1, 1], [], []>} : vector<64x64xf32>, vector<64x16xf32>, vector<64x16xf32> -> vector<64x16xf32>
    %c0_98 = arith.constant 0 : index
    %c0_99 = arith.constant 0 : index
    %267 = vector.load %arg9[%c0_98, %c0_99] : memref<1x16xf32, #tpu.memory_space<vmem>>, vector<1x16xf32>
    %268 = vector.broadcast %267 : vector<1x16xf32> to vector<64x16xf32>
    %269 = arith.addf %266, %268 : vector<64x16xf32>
    %cst_100 = arith.constant dense<0xFF800000> : vector<64xf32>
    %270 = vector.multi_reduction <maximumf>, %269, %cst_100 [1] : vector<64x16xf32> to vector<64xf32>
    %271 = vector.shape_cast %270 : vector<64xf32> to vector<64x1xf32>
    %272 = vector.broadcast %271 : vector<64x1xf32> to vector<64x16xf32>
    %273 = arith.subf %269, %272 : vector<64x16xf32>
    %274 = math.exp %273 : vector<64x16xf32>
    %cst_101 = arith.constant dense<0.000000e+00> : vector<64xf32>
    %275 = vector.multi_reduction <add>, %274, %cst_101 [1] : vector<64x16xf32> to vector<64xf32>
    %276 = vector.shape_cast %275 : vector<64xf32> to vector<64x1xf32>
    %277 = math.log %276 : vector<64x1xf32>
    %278 = vector.broadcast %277 : vector<64x1xf32> to vector<64x16xf32>
    %279 = arith.subf %273, %278 : vector<64x16xf32>
    %c0_102 = arith.constant 0 : index
    %c0_103 = arith.constant 0 : index
    %280 = vector.load %arg10[%c0_102, %c0_103] : memref<64x16xf32, #tpu.memory_space<vmem>>, vector<64x16xf32>
    tpu.vector_store %arg10[%c0_102, %c0_103], %279 {strides = array<i32>} : memref<64x16xf32, #tpu.memory_space<vmem>>, vector<64x16xf32>,
    return
  }
}

</mosaic_0001>

<bundles_post_ra>
// kernel: tpu_custom_call.1
= control target key start
LH: loop header
LB: loop body
LE: loop exit
PB: predicated region body
PF: predicated region fallthrough
CT: control target
= control target key end

     0   :  { %vm55_vm0 = vcmask 261120   ;;  %vm201_vm1 = vcmask 523264   ;;  %s5450_s26 = smov 120   ;;  %v5453_v36 = vmov 1   ;;  %v7867_v37 = vmov 0   ;;  %s5461_s13 = smov 96   ;;  %s7856_s2 = inlined_call_operand.vmem [shape: f32[32,64], index: 2, kind: input, shape index: {}]   ;;  %s7857_s0 = inlined_call_operand.vmem [shape: f32[64,32], index: 0, kind: input, shape index: {}]   ;;  %s7858_s3 = inlined_call_operand.vmem [shape: f32[64,8], index: 3, kind: input, shape index: {}]   ;;  %s7859_s4 = inlined_call_operand.vmem [shape: f32[64,8], index: 4, kind: input, shape index: {}]   ;;  %s7860_s1 = inlined_call_operand.vmem [shape: f32[64,64], index: 1, kind: input, shape index: {}]   ;;  %s7861_s6 = inlined_call_operand.vmem [shape: f32[64,16], index: 6, kind: input, shape index: {}]   ;;  %s7862_s5 = inlined_call_operand.vmem [shape: f32[1,64], index: 5, kind: input, shape index: {}]   ;;  %s7863_s7 = inlined_call_operand.vmem [shape: f32[16,8], index: 7, kind: input, shape index: {}]   ;;  %s7864_s8 = inlined_call_operand.vmem [shape: f32[16,8], index: 8, kind: input, shape index: {}]   ;;  %s7865_s9 = inlined_call_operand.vmem [shape: f32[1,16], index: 9, kind: input, shape index: {}]   ;;  %s7866_s10 = inlined_call_operand.vmem [shape: f32[64,16], index: 10, kind: output, shape index: {}]  }
   0x1   :  { %v54_v0 = vld [vmem:[%s7856_s2 + $0x18] sm:$0xff]  ;;  %v53_v1 = vld [vmem:[%s7856_s2 + $0x10] sm:$0xff]  ;;  %v35_v2 = vld [vmem:[%s7857_s0] sm:$0xff]  ;;  %5033 = vset.pattern.permute.xlu1 %v5453_v36  ;;  %5032 = vset.pattern.permute.xlu0 %v7867_v37  ;;  %v5455_v53 = vmov 3   ;;  %v5456_v54 = vmov 2   ;;  %v7869_v57 = vmov 4  }
   0x2   :  { %4605 = vmatprep.subr.mxu0 %v54_v0  ;;  %v52_v3 = vld [vmem:[%s7856_s2 + $0x8] sm:$0xff]  ;;  %4613 = vmatprep.mubr.msk.f32.mxu0 %vm55_vm0, %v35_v2  ;;  %v51_v4 = vld [vmem:[%s7856_s2] sm:$0xff]  ;;  %v192_v5 = vld [vmem:[%s7858_s3 + $0x38] sm:$0xff]  ;;  %v7868_v59 = vmov 5   ;;  %v5459_v60 = vmov 6   ;;  %v5460_v61 = vmov 7  }
   0x3   :  { %4606 = vmatpush3.msra.mxu0 %v54_v0  ;;  %v191_v6 = vld [vmem:[%s7858_s3 + $0x30] sm:$0xff]  ;;  %4625 = vmatprep.subr.mxu1 %v192_v5  ;;  %v36_v7 = vld [vmem:[%s7857_s0 + $0x8] sm:$0xff]  ;;  %v200_v8 = vld [vmem:[%s7859_s4 + $0x38] sm:$0xff]  ;;  %s5462_s14 = smov 88   ;;  %s5463_s18 = smov 80  }
   0x4   :  { %4607 = vmatprep.subr.mxu0 %v53_v1  ;;  %4626 = vmatpush3.msra.mxu1 %v192_v5  ;;  %v37_v9 = vld [vmem:[%s7857_s0 + $0x10] sm:$0xff]  ;;  %v190_v11 = vld [vmem:[%s7858_s3 + $0x28] sm:$0xff]  ;;  %v38_v12 = vld [vmem:[%s7857_s0 + $0x18] sm:$0xff]  ;;  %s5464_s19 = smov 72   ;;  %s5465_s20 = smov 8  }
   0x5   :  { %4608 = vmatpush3.msra.mxu0 %v53_v1  ;;  %4627 = vmatprep.subr.mxu1 %v191_v6  ;;  %v199_v10 = vld [vmem:[%s7859_s4 + $0x30] sm:$0xff]  ;;  %v198_v13 = vld [vmem:[%s7859_s4 + $0x28] sm:$0xff]  ;;  %v39_v14 = vld [vmem:[%s7857_s0 + $0x20] sm:$0xff]  ;;  %s5466_s21 = smov 16   ;;  %s5467_s22 = smov 24  }
   0x6   :  { %4609 = vmatprep.subr.mxu0 %v52_v3  ;;  %4628 = vmatpush3.msra.mxu1 %v191_v6  ;;  %v189_v15 = vld [vmem:[%s7858_s3 + $0x20] sm:$0xff]  ;;  %v40_v17 = vld [vmem:[%s7857_s0 + $0x28] sm:$0xff]  ;;  %v188_v18 = vld [vmem:[%s7858_s3 + $0x18] sm:$0xff]  ;;  %s5469_s23 = smov 32   ;;  %s5470_s24 = smov 48  }
   0x7   :  { %4610 = vmatpush3.msra.mxu0 %v52_v3  ;;  %4629 = vmatprep.subr.mxu1 %v190_v11  ;;  %v197_v16 = vld [vmem:[%s7859_s4 + $0x20] sm:$0xff]  ;;  %v41_v19 = vld [vmem:[%s7857_s0 + $0x30] sm:$0xff]  ;;  %v196_v20 = vld [vmem:[%s7859_s4 + $0x18] sm:$0xff]  ;;  %s5471_s25 = smov 56  }
   0x8   :  { %4611 = vmatprep.subr.mxu0 %v51_v4  ;;  %4630 = vmatpush3.msra.mxu1 %v190_v11  ;;  %v187_v21 = vld [vmem:[%s7858_s3 + $0x10] sm:$0xff]  ;;  %v42_v23 = vld [vmem:[%s7857_s0 + $0x38] sm:$0xff]  ;;  %v186_v24 = vld [vmem:[%s7858_s3 + $0x8] sm:$0xff]  ;;  %s5468_s0 = smov 40  }
   0x9   :  { %4612 = vmatpush3.msra.mxu0 %v51_v4  ;;  %4631 = vmatprep.subr.mxu1 %v189_v15  ;;  %v195_v22 = vld [vmem:[%s7859_s4 + $0x10] sm:$0xff]  ;;  %v194_v25 = vld [vmem:[%s7859_s4 + $0x8] sm:$0xff]  ;;  %v185_v26 = vld [vmem:[%s7858_s3] sm:$0xff]  ;;  %s5451_s3 = smov 112  }
   0xa   :  { %4614 = vmatmul.mubr.msk.f32.vlgmr.msra.gmra.mxu0 %vm55_vm0, %v36_v7  ;;  %4653 = vmatprep.subr.mxu0 %v200_v8  ;;  %v193_v27 = vld [vmem:[%s7859_s4] sm:$0xff]  ;;  %s5452_s4 = smov 104  }
   0xb   :  { %4616 = vmatprep.mubr.msk.f32.mxu0 %vm55_vm0, %v37_v9  ;;  %4654 = vmatpush3.msra.mxu0 %v200_v8 }
   0xc   :  { %4655 = vmatprep.subr.mxu0 %v199_v10  ;;  %4632 = vmatpush3.msra.mxu1 %v189_v15 }
   0xd   :  { %4656 = vmatpush3.msra.mxu0 %v199_v10  ;;  %4633 = vmatprep.subr.mxu1 %v188_v18 }
   0xe   :  { %4617 = vmatmul.mubr.msk.f32.gmra.mxu0 %vm55_vm0, %v38_v12  ;;  %4657 = vmatprep.subr.mxu0 %v198_v13 }
   0xf   :  { %4619 = vmatprep.mubr.msk.f32.mxu0 %vm55_vm0, %v39_v14  ;;  %4658 = vmatpush3.msra.mxu0 %v198_v13 }
  0x10   :  { %4659 = vmatprep.subr.mxu0 %v197_v16  ;;  %4634 = vmatpush3.msra.mxu1 %v188_v18 }
  0x11   :  { %4660 = vmatpush3.msra.mxu0 %v197_v16  ;;  %4635 = vmatprep.subr.mxu1 %v187_v21 }
  0x12   :  { %4620 = vmatmul.mubr.msk.f32.gmra.mxu0 %vm55_vm0, %v40_v17  ;;  %4661 = vmatprep.subr.mxu0 %v196_v20 }
  0x13   :  { %4622 = vmatprep.mubr.msk.f32.mxu0 %vm55_vm0, %v41_v19  ;;  %4662 = vmatpush3.msra.mxu0 %v196_v20 }
  0x14   :  { %4663 = vmatprep.subr.mxu0 %v195_v22  ;;  %4636 = vmatpush3.msra.mxu1 %v187_v21 }
  0x15   :  { %4664 = vmatpush3.msra.mxu0 %v195_v22  ;;  %4637 = vmatprep.subr.mxu1 %v186_v24 }
  0x16   :  { %4623 = vmatmul.mubr.msk.f32.gmra.mxu0 %vm55_vm0, %v42_v23  ;;  %4665 = vmatprep.subr.mxu0 %v194_v25 }
  0x17   :  { %4638 = vmatpush3.msra.mxu1 %v186_v24  ;;  %4666 = vmatpush3.msra.mxu0 %v194_v25 }
  0x18   :  { %4639 = vmatprep.subr.mxu1 %v185_v26  ;;  %4667 = vmatprep.subr.mxu0 %v193_v27 }
  0x19   :  { %4640 = vmatpush3.msra.mxu1 %v185_v26  ;;  %4668 = vmatpush3.msra.mxu0 %v193_v27 }
  0xca   :  { %v5619_v28 = vpop.f32.mrf.mxu0 }
  0xcb   :  { %7958 = vst [vmem:[#allocation3_spill] sm:$0xff] %v5619_v28  ;;  %959 = vrot.lane.b32.xlu1 %v5619_v28, %s5450_s26 }
  0xcc   :  { %v5623_v29 = vpop.f32.mrf.mxu0 }
  0xcd   :  { %7959 = vst [vmem:[#allocation4_spill] sm:$0xff] %v5623_v29  ;;  %957 = vrot.lane.b32.xlu0 %v5623_v29, %s5450_s26  ;;  %4641 = vmatprep.mubr.msk.f32.mxu1 %vm201_vm1, %v5623_v29 }
  0xce   :  { %4669 = vmatprep.mubr.msk.f32.mxu0 %vm201_vm1, %v5623_v29  ;;  %v5631_v30 = vpop.f32.mrf.mxu0  ;;  %4642 = vmatmul.mubr.msk.f32.vlgmr.msra.gmra.mxu1 %vm201_vm1, %v5619_v28 }
  0xcf   :  { %7960 = vst [vmem:[#allocation5_spill] sm:$0xff] %v5631_v30  ;;  %4670 = vmatmul.mubr.msk.f32.vlgmr.msra.gmra.mxu0 %vm201_vm1, %v5619_v28  ;;  %963 = vrot.lane.b32.xlu1 %v5631_v30, %s5450_s26 }
  0xd0   :  { %v5639_v31 = vpop.f32.mrf.mxu0 }
  0xd1   :  { %7961 = vst [vmem:[#allocation6_spill] sm:$0xff] %v5639_v31  ;;  %961 = vrot.lane.b32.xlu0 %v5639_v31, %s5450_s26  ;;  %4672 = vmatprep.mubr.msk.f32.mxu0 %vm201_vm1, %v5639_v31 }
  0xd2   :  { %v5645_v32 = vpop.f32.mrf.mxu0  ;;  %4644 = vmatprep.mubr.msk.f32.mxu1 %vm201_vm1, %v5639_v31 }
  0xd3   :  { %7962 = vst [vmem:[#allocation7_spill] sm:$0xff] %v5645_v32  ;;  %967 = vrot.lane.b32.xlu1 %v5645_v32, %s5450_s26  ;;  %4673 = vmatmul.mubr.msk.f32.gmra.mxu0 %vm201_vm1, %v5631_v30 }
  0xd4   :  { %v5653_v33 = vpop.f32.mrf.mxu0  ;;  %4645 = vmatmul.mubr.msk.f32.gmra.mxu1 %vm201_vm1, %v5631_v30 }
  0xd5   :  { %7963 = vst [vmem:[#allocation8_spill] sm:$0xff] %v5653_v33  ;;  %1292 = vrot.lane.b32.xlu0 %v5645_v32, %s5451_s3  ;;  %4675 = vmatprep.mubr.msk.f32.mxu0 %vm201_vm1, %v5653_v33 }
  0xd6   :  { %v5661_v34 = vpop.f32.mrf.mxu0  ;;  %4647 = vmatprep.mubr.msk.f32.mxu1 %vm201_vm1, %v5653_v33 }
  0xd7   :  { %7964 = vst [vmem:[#allocation9_spill] sm:$0xff] %v5661_v34  ;;  %1617 = vrot.lane.b32.xlu1 %v5645_v32, %s5452_s4  ;;  %4681 = vmatprep.subr.mxu1 %v5661_v34 }
  0xd8   :  { %v5668_v35 = vpop.f32.mrf.mxu0  ;;  %4682 = vmatpush3.msra.mxu1 %v5661_v34  ;;  %4676 = vmatmul.mubr.msk.f32.gmra.mxu0 %vm201_vm1, %v5645_v32 }
  0xd9   :  { %7965 = vst [vmem:[#allocation10_spill] sm:$0xff] %v5668_v35  ;;  %965 = vrot.lane.b32.xlu0 %v5653_v33, %s5450_s26  ;;  %4683 = vmatprep.subr.mxu1 %v5668_v35 }
  0xda   :  { %4684 = vmatpush3.msra.mxu1 %v5668_v35  ;;  %4678 = vmatprep.mubr.msk.f32.mxu0 %vm201_vm1, %v5668_v35 }
  0xdb   :  { %1615 = vrot.lane.b32.xlu1 %v5653_v33, %s5452_s4  ;;  %4685 = vmatprep.subr.mxu1 %v5645_v32 }
  0xdc   :  { %4686 = vmatpush3.msra.mxu1 %v5645_v32  ;;  %4679 = vmatmul.mubr.msk.f32.gmra.mxu0 %vm201_vm1, %v5661_v34 }
  0xdd   :  { %1290 = vrot.lane.b32.xlu0 %v5653_v33, %s5451_s3  ;;  %4687 = vmatprep.subr.mxu1 %v5653_v33 }
  0xde   :  { %4688 = vmatpush3.msra.mxu1 %v5653_v33  ;;  %v7975_v33 = vmov 4  }
  0xdf   :  { %1296 = vrot.lane.b32.xlu1 %v5661_v34, %s5451_s3  ;;  %4689 = vmatprep.subr.mxu1 %v5631_v30 }
  0xe0   :  { %4690 = vmatpush3.msra.mxu1 %v5631_v30 }
  0xe1   :  { %971 = vrot.lane.b32.xlu0 %v5661_v34, %s5450_s26  ;;  %4691 = vmatprep.subr.mxu1 %v5639_v31 }
  0xe2   :  { %4692 = vmatpush3.msra.mxu1 %v5639_v31 }
  0xe3   :  { %969 = vrot.lane.b32.xlu1 %v5668_v35, %s5450_s26  ;;  %4693 = vmatprep.subr.mxu1 %v5619_v28 }
  0xe4   :  { %4694 = vmatpush3.msra.mxu1 %v5619_v28  ;;  %v7978_v28 = vmov 5  }
  0xe5   :  { %4695 = vmatprep.subr.mxu1 %v5623_v29  ;;  %4648 = vmatmul.mubr.msk.f32.gmra.mxu1 %vm201_vm1, %v5645_v32  ;;  %v5947_v32 = vld [vmem:[%s7860_s1 + $0x8] sm:$0xff] }
  0xe6   :  { %4696 = vmatpush3.msra.mxu1 %v5623_v29  ;;  %4650 = vmatprep.mubr.msk.f32.mxu1 %vm201_vm1, %v5668_v35  ;;  %7976 = vst [vmem:[#allocation20_spill] sm:$0xff] %v5947_v32  ;;  %vm545_vm2 = vcmp.gt.f32.partialorder %v5947_v32, 0.0 }
  0xe7   :  { %1294 = vrot.lane.b32.xlu1 %v5668_v35, %s5451_s3  ;;  %1621 = vrot.lane.b32.xlu0 %v5661_v34, %s5452_s4 }
  0xe9   :  { %4651 = vmatmul.mubr.msk.f32.gmra.mxu1 %vm201_vm1, %v5661_v34 }
  0xeb   :  { %1619 = vrot.lane.b32.xlu1 %v5668_v35, %s5452_s4 }
 0x13d   :  { %v960_v38 = vpop.permute.xlu1 %959 }
 0x13f   :  { %v958_v39 = vpop.permute.xlu0 %957 }
 0x141   :  { %v964_v40 = vpop.permute.xlu1 %963 }
 0x143   :  { %v962_v41 = vpop.permute.xlu0 %961 }
 0x145   :  { %v968_v42 = vpop.permute.xlu1 %967 }
 0x147   :  { %v5717_v43 = vpop.permute.xlu0 %1292 }
 0x148   :  { %7966 = vst [vmem:[#allocation11_spill] sm:$0xff] %v5717_v43 }
 0x149   :  { %v5719_v44 = vpop.permute.xlu1 %1617 }
 0x14a   :  { %7967 = vst [vmem:[#allocation12_spill] sm:$0xff] %v5719_v44 }
 0x14b   :  { %v966_v45 = vpop.permute.xlu0 %965 }
 0x14d   :  { %v5721_v46 = vpop.permute.xlu1 %1615 }
 0x14e   :  { %7968 = vst [vmem:[#allocation13_spill] sm:$0xff] %v5721_v46 }
 0x14f   :  { %v5723_v47 = vpop.permute.xlu0 %1290 }
 0x150   :  { %7969 = vst [vmem:[#allocation14_spill] sm:$0xff] %v5723_v47 }
 0x151   :  { %v5725_v48 = vpop.permute.xlu1 %1296 }
 0x152   :  { %7970 = vst [vmem:[#allocation15_spill] sm:$0xff] %v5725_v48  ;;  %4737 = vmatprep.subr.mxu1 %v5725_v48 }
 0x153   :  { %v972_v49 = vpop.permute.xlu0 %971 }
 0x154   :  { %4709 = vmatprep.subr.mxu0 %v972_v49 }
 0x155   :  { %4710 = vmatpush3.msra.mxu0 %v972_v49  ;;  %v970_v50 = vpop.permute.xlu1 %969 }
 0x156   :  { %4711 = vmatprep.subr.mxu0 %v970_v50 }
 0x157   :  { %4712 = vmatpush3.msra.mxu0 %v970_v50 }
 0x158   :  { %4713 = vmatprep.subr.mxu0 %v968_v42 }
 0x159   :  { %4714 = vmatpush3.msra.mxu0 %v968_v42  ;;  %v5728_v51 = vpop.permute.xlu0 %1621  ;;  %v5802_v6 = vpop.permute.xlu1 %1294 }
 0x15a   :  { %4715 = vmatprep.subr.mxu0 %v966_v45  ;;  %7971 = vst [vmem:[#allocation16_spill] sm:$0xff] %v5728_v51  ;;  %7972 = vst [vmem:[#allocation17_spill] sm:$0xff] %v5802_v6 }
 0x15b   :  { %4716 = vmatpush3.msra.mxu0 %v966_v45 }
 0x15c   :  { %4717 = vmatprep.subr.mxu0 %v964_v40 }
 0x15d   :  { %4718 = vmatpush3.msra.mxu0 %v964_v40  ;;  %v5806_v8 = vpop.permute.xlu1 %1619 }
 0x15e   :  { %4719 = vmatprep.subr.mxu0 %v962_v41  ;;  %7973 = vst [vmem:[#allocation18_spill] sm:$0xff] %v5806_v8 }
 0x15f   :  { %4720 = vmatpush3.msra.mxu0 %v962_v41 }
 0x160   :  { %4721 = vmatprep.subr.mxu0 %v960_v38 }
 0x161   :  { %4722 = vmatpush3.msra.mxu0 %v960_v38 }
 0x162   :  { %4723 = vmatprep.subr.mxu0 %v958_v39 }
 0x163   :  { %4724 = vmatpush3.msra.mxu0 %v958_v39 }
 0x164   :  { %4765 = vmatprep.subr.mxu0 %v5728_v51 }
 0x18e   :  { %v4643_v2 = vpop.f32.mrf.mxu1 }
 0x18f   :  { %v4671_v52 = vpop.f32.mrf.mxu0 }
 0x190   :  { %790 = vperm.xlu1 %5033, %v4671_v52   ;;  %475 = vperm.xlu0 %5032, %v4671_v52   ;;  %v292_v3 = vpop.f32.mrf.mxu1 }
 0x191   :  { %v397_v55 = vpop.f32.mrf.mxu0 }
 0x193   :  { %v5733_v56 = vpop.f32.mrf.mxu0 }
 0x194   :  { %5035 = vset.pattern.permute.xlu1 %v5455_v53  ;;  %5034 = vset.pattern.permute.xlu0 %v5456_v54  ;;  %v4646_v4 = vpop.f32.mrf.mxu1 }
 0x195   :  { %1440 = vperm.xlu1 %5035, %v4671_v52   ;;  %1115 = vperm.xlu0 %5034, %v4671_v52   ;;  %v5737_v58 = vpop.f32.mrf.mxu0 }
 0x196   :  { %v302_v5 = vpop.f32.mrf.mxu1 }
 0x198   :  { %v5753_v62 = vpop.f32.mrf.mxu0 }
 0x199   :  { %5036 = vset.pattern.permute.xlu1 %v7869_v57  ;;  %5040 = vset.pattern.permute.xlu0 %v7867_v37 }
 0x19a   :  { %1765 = vperm.xlu1 %5036, %v4671_v52   ;;  %470 = vperm.xlu0 %5040, %v397_v55   ;;  %v5762_v63 = vpop.f32.mrf.mxu0 }
 0x19c   :  { %v5766_v0 = vpop.f32.mrf.mxu0 }
 0x19e   :  { %5037 = vset.pattern.permute.xlu1 %v7868_v59  ;;  %480 = vperm.xlu0 %5040, %v5737_v58   ;;  %v5771_v1 = vpop.f32.mrf.mxu0 }
 0x19f   :  { %2090 = vperm.xlu1 %5037, %v4671_v52  }
 0x1a2   :  { %5056 = vset.pattern.permute.xlu0 %v5453_v36 }
 0x1a3   :  { %5038 = vset.pattern.permute.xlu1 %v5459_v60  ;;  %794 = vperm.xlu0 %5056, %v5737_v58  }
 0x1a4   :  { %2415 = vperm.xlu1 %5038, %v4671_v52  }
 0x1a5   :  { %v4649_v7 = vpop.f32.mrf.mxu1 }
 0x1a7   :  { %5057 = vset.pattern.permute.xlu0 %v5456_v54  ;;  %v312_v9 = vpop.f32.mrf.mxu1 }
 0x1a8   :  { %5039 = vset.pattern.permute.xlu1 %v5460_v61  ;;  %1119 = vperm.xlu0 %5057, %v5737_v58  }
 0x1a9   :  { %2740 = vperm.xlu1 %5039, %v4671_v52   ;;  %v4652_v10 = vpop.f32.mrf.mxu1 }
 0x1ab   :  { %v322_v12 = vpop.f32.mrf.mxu1 }
 0x1ac   :  { %5058 = vset.pattern.permute.xlu0 %v5455_v53 }
 0x1ad   :  { %5041 = vset.pattern.permute.xlu1 %v5453_v36  ;;  %1444 = vperm.xlu0 %5058, %v5737_v58  }
 0x1ae   :  { %786 = vperm.xlu1 %5041, %v397_v55  }
 0x1b1   :  { %5062 = vset.pattern.permute.xlu0 %v5460_v61 }
 0x1b2   :  { %5042 = vset.pattern.permute.xlu1 %v5456_v54  ;;  %2744 = vperm.xlu0 %5062, %v5737_v58  }
 0x1b3   :  { %1111 = vperm.xlu1 %5042, %v397_v55  }
 0x1b6   :  { %5063 = vset.pattern.permute.xlu0 %v7867_v37 }
 0x1b7   :  { %5043 = vset.pattern.permute.xlu1 %v5455_v53  ;;  %495 = vperm.xlu0 %5063, %v5753_v62  }
 0x1b8   :  { %1436 = vperm.xlu1 %5043, %v397_v55  }
 0x1bb   :  { %5065 = vset.pattern.permute.xlu0 %v5456_v54 }
 0x1bc   :  { %5044 = vset.pattern.permute.xlu1 %v7869_v57  ;;  %1131 = vperm.xlu0 %5065, %v5753_v62  }
 0x1bd   :  { %1761 = vperm.xlu1 %5044, %v397_v55  }
 0x1c0   :  { %5068 = vset.pattern.permute.xlu0 %v7868_v59 }
 0x1c1   :  { %5045 = vset.pattern.permute.xlu1 %v7868_v59  ;;  %2106 = vperm.xlu0 %5068, %v5753_v62  }
 0x1c2   :  { %2086 = vperm.xlu1 %5045, %v397_v55  }
 0x1c5   :  { %5069 = vset.pattern.permute.xlu0 %v5459_v60 }
 0x1c6   :  { %5046 = vset.pattern.permute.xlu1 %v5459_v60  ;;  %2431 = vperm.xlu0 %5069, %v5753_v62  }
 0x1c7   :  { %2411 = vperm.xlu1 %5046, %v397_v55  }
 0x1ca   :  { %5087 = vset.pattern.permute.xlu0 %v7867_v37 }
 0x1cb   :  { %5047 = vset.pattern.permute.xlu1 %v5460_v61  ;;  %500 = vperm.xlu0 %5087, %v5771_v1  }
 0x1cc   :  { %2736 = vperm.xlu1 %5047, %v397_v55  }
 0x1cf   :  { %5088 = vset.pattern.permute.xlu0 %v5453_v36 }
 0x1d0   :  { %5048 = vset.pattern.permute.xlu1 %v7867_v37  ;;  %810 = vperm.xlu0 %5088, %v5771_v1  }
 0x1d1   :  { %485 = vperm.xlu1 %5048, %v5733_v56  }
 0x1d4   :  { %5093 = vset.pattern.permute.xlu0 %v5459_v60 }
 0x1d5   :  { %5049 = vset.pattern.permute.xlu1 %v5453_v36  ;;  %2435 = vperm.xlu0 %5093, %v5771_v1  }
 0x1d6   :  { %798 = vperm.xlu1 %5049, %v5733_v56  }
 0x1d9   :  { %5094 = vset.pattern.permute.xlu0 %v5460_v61 }
 0x1da   :  { %5050 = vset.pattern.permute.xlu1 %v5456_v54  ;;  %2760 = vperm.xlu0 %5094, %v5771_v1  }
 0x1db   :  { %1123 = vperm.xlu1 %5050, %v5733_v56  }
 0x1df   :  { %5051 = vset.pattern.permute.xlu1 %v5455_v53 }
 0x1e0   :  { %1448 = vperm.xlu1 %5051, %v5733_v56  }
 0x1e4   :  { %5052 = vset.pattern.permute.xlu1 %v7869_v57 }
 0x1e5   :  { %1773 = vperm.xlu1 %5052, %v5733_v56  }
 0x1e9   :  { %5053 = vset.pattern.permute.xlu1 %v7868_v59 }
 0x1ea   :  { %2098 = vperm.xlu1 %5053, %v5733_v56  }
 0x1ee   :  { %5054 = vset.pattern.permute.xlu1 %v5459_v60 }
 0x1ef   :  { %2423 = vperm.xlu1 %5054, %v5733_v56  }
 0x1f3   :  { %5055 = vset.pattern.permute.xlu1 %v5460_v61 }
 0x1f4   :  { %2748 = vperm.xlu1 %5055, %v5733_v56  }
 0x1f8   :  { %5059 = vset.pattern.permute.xlu1 %v7869_v57  ;;  %436 = vxpose.xlu0.b32.start [1/8] (short) (narrow) %v292_v3, 8 }
 0x1f9   :  { %1769 = vperm.xlu1 %5059, %v5737_v58  }
 0x1fc   :  { %437 = vxpose.xlu0.b32.cont [2/8] (short) (narrow) %v4643_v2, 8 }
 0x1fd   :  { %5060 = vset.pattern.permute.xlu1 %v7868_v59 }
 0x1fe   :  { %2094 = vperm.xlu1 %5060, %v5737_v58  }
 0x200   :  { %438 = vxpose.xlu0.b32.cont [3/8] (short) (narrow) %v302_v5, 8 }
 0x202   :  { %5061 = vset.pattern.permute.xlu1 %v5459_v60 }
 0x203   :  { %2419 = vperm.xlu1 %5061, %v5737_v58  }
 0x204   :  { %439 = vxpose.xlu0.b32.cont [4/8] (short) (narrow) %v4646_v4, 8  ;;  %v508_v4 = vlaneseq }
 0x207   :  { %5064 = vset.pattern.permute.xlu1 %v5453_v36 }
 0x208   :  { %806 = vperm.xlu1 %5064, %v5753_v62   ;;  %440 = vxpose.xlu0.b32.cont [5/8] (short) (narrow) %v312_v9, 8 }
 0x20b   :  { %v5810_v11 = vpop.permute.xlu1 %790  ;;  %v5825_v16 = vpop.permute.xlu0 %475 }
 0x20c   :  { %5066 = vset.pattern.permute.xlu1 %v5455_v53  ;;  %441 = vxpose.xlu0.b32.cont [6/8] (short) (narrow) %v4649_v7, 8 }
 0x20d   :  { %1456 = vperm.xlu1 %5066, %v5753_v62  }
 0x210   :  { %v5814_v13 = vpop.permute.xlu1 %1440  ;;  %442 = vxpose.xlu0.b32.cont [7/8] (short) (narrow) %v322_v12, 8  ;;  %v5832_v18 = vpop.permute.xlu0 %1115 }
 0x211   :  { %5067 = vset.pattern.permute.xlu1 %v7869_v57 }
 0x212   :  { %1781 = vperm.xlu1 %5067, %v5753_v62  }
 0x214   :  { %443 = vxpose.xlu0.b32.end [8/8] (short) (narrow) %v4652_v10, 8 }
 0x215   :  { %v5818_v14 = vpop.permute.xlu1 %1765  ;;  %v5838_v20 = vpop.permute.xlu0 %470 }
 0x216   :  { %5070 = vset.pattern.permute.xlu1 %v5460_v61 }
 0x217   :  { %2756 = vperm.xlu1 %5070, %v5753_v62  }
 0x219   :  { %v5844_v22 = vpop.permute.xlu0 %480 }
 0x21a   :  { %v5822_v15 = vpop.permute.xlu1 %2090 }
 0x21b   :  { %5071 = vset.pattern.permute.xlu1 %v7867_v37 }
 0x21c   :  { %490 = vperm.xlu1 %5071, %v5762_v63  }
 0x21e   :  { %v5850_v24 = vpop.permute.xlu0 %794 }
 0x21f   :  { %v5828_v17 = vpop.permute.xlu1 %2415 }
 0x220   :  { %5072 = vset.pattern.permute.xlu1 %v5453_v36 }
 0x221   :  { %802 = vperm.xlu1 %5072, %v5762_v63  }
 0x223   :  { %v5856_v26 = vpop.permute.xlu0 %1119 }
 0x224   :  { %v5834_v19 = vpop.permute.xlu1 %2740 }
 0x225   :  { %5073 = vset.pattern.permute.xlu1 %v5456_v54 }
 0x226   :  { %1127 = vperm.xlu1 %5073, %v5762_v63  }
 0x228   :  { %v5865_v39 = vpop.permute.xlu0 %1444 }
 0x229   :  { %v5840_v21 = vpop.permute.xlu1 %786 }
 0x22a   :  { %5074 = vset.pattern.permute.xlu1 %v5455_v53 }
 0x22b   :  { %1452 = vperm.xlu1 %5074, %v5762_v63  }
 0x22d   :  { %v5872_v41 = vpop.permute.xlu0 %2744 }
 0x22e   :  { %v5846_v23 = vpop.permute.xlu1 %1111 }
 0x22f   :  { %5075 = vset.pattern.permute.xlu1 %v7869_v57 }
 0x230   :  { %1777 = vperm.xlu1 %5075, %v5762_v63  }
 0x232   :  { %v5877_v45 = vpop.permute.xlu0 %495 }
 0x233   :  { %v5852_v25 = vpop.permute.xlu1 %1436 }
 0x234   :  { %5076 = vset.pattern.permute.xlu1 %v7868_v59 }
 0x235   :  { %2102 = vperm.xlu1 %5076, %v5762_v63  }
 0x237   :  { %v5884_v50 = vpop.permute.xlu0 %1131 }
 0x238   :  { %v5858_v27 = vpop.permute.xlu1 %1761 }
 0x239   :  { %5077 = vset.pattern.permute.xlu1 %v5459_v60 }
 0x23a   :  { %2427 = vperm.xlu1 %5077, %v5762_v63  }
 0x23c   :  { %v5891_v55 = vpop.permute.xlu0 %2106 }
 0x23d   :  { %v5862_v38 = vpop.permute.xlu1 %2086  ;;  %5095 = vset.pattern.permute.xlu0 %v7867_v37 }
 0x23e   :  { %5078 = vset.pattern.permute.xlu1 %v5460_v61 }
 0x23f   :  { %2752 = vperm.xlu1 %5078, %v5762_v63  }
 0x242   :  { %v5869_v40 = vpop.permute.xlu1 %2411 }
 0x243   :  { %5079 = vset.pattern.permute.xlu1 %v7867_v37 }
 0x244   :  { %505 = vperm.xlu1 %5079, %v5766_v0  }
 0x247   :  { %v5875_v42 = vpop.permute.xlu1 %2736 }
 0x248   :  { %5080 = vset.pattern.permute.xlu1 %v5453_v36  ;;  %v5897_v36 = vpop.permute.xlu0 %2431 }
 0x249   :  { %814 = vperm.xlu1 %5080, %v5766_v0  }
 0x24c   :  { %v5881_v49 = vpop.permute.xlu1 %485  ;;  %v5903_v62 = vpop.permute.xlu0 %500 }
 0x24d   :  { %5081 = vset.pattern.permute.xlu1 %v5456_v54 }
 0x24e   :  { %1139 = vperm.xlu1 %5081, %v5766_v0  }
 0x250   :  { %v5909_v2 = vpop.permute.xlu0 %810 }
 0x251   :  { %v5887_v52 = vpop.permute.xlu1 %798 }
 0x252   :  { %5082 = vset.pattern.permute.xlu1 %v5455_v53 }
 0x253   :  { %1464 = vperm.xlu1 %5082, %v5766_v0  }
 0x254   :  { %v5915_v5 = vpop.permute.xlu0 %2435 }
 0x256   :  { %v5893_v56 = vpop.permute.xlu1 %1123 }
 0x257   :  { %5083 = vset.pattern.permute.xlu1 %v7869_v57 }
 0x258   :  { %1789 = vperm.xlu1 %5083, %v5766_v0   ;;  %v5925_v10 = vpop.permute.xlu0 %2760 }
 0x25b   :  { %v5899_v58 = vpop.permute.xlu1 %1448 }
 0x25c   :  { %5084 = vset.pattern.permute.xlu1 %v7868_v59 }
 0x25d   :  { %2114 = vperm.xlu1 %5084, %v5766_v0  }
 0x260   :  { %v5905_v63 = vpop.permute.xlu1 %1773 }
 0x261   :  { %5085 = vset.pattern.permute.xlu1 %v5459_v60  ;;  %v5921_v60 = vshrl.u32 %v508_v4, 7 }
 0x262   :  { %2439 = vperm.xlu1 %5085, %v5766_v0  }
 0x263   :  { %7974 = vst [vmem:[#allocation19_spill] sm:$0xff] %v5921_v60  ;;  %v1144_v12 = vsub.s32 2, %v5921_v60  ;;  %v1794_v35 = vsub.s32 4, %v5921_v60  ;;  %v2769_v6 = vsub.s32 7, %v5921_v60 }
 0x265   :  { %v5911_v3 = vpop.permute.xlu1 %2098 }
 0x266   :  { %5086 = vset.pattern.permute.xlu1 %v5460_v61  ;;  %v7878_v61 = vsub.s32 0, %v5921_v60 }
 0x267   :  { %2764 = vperm.xlu1 %5086, %v5766_v0   ;;  %v819_v0 = vsub.s32 1, %v5921_v60 }
 0x26a   :  { %v5917_v7 = vpop.permute.xlu1 %2423 }
 0x26b   :  { %5089 = vset.pattern.permute.xlu1 %v5456_v54  ;;  %v1469_v54 = vsub.s32 3, %v5921_v60 }
 0x26c   :  { %1135 = vperm.xlu1 %5089, %v5771_v1  }
 0x26f   :  { %v5923_v9 = vpop.permute.xlu1 %2748 }
 0x270   :  { %5090 = vset.pattern.permute.xlu1 %v5455_v53 }
 0x271   :  { %1460 = vperm.xlu1 %5090, %v5771_v1  }
 0x274   :  { %v5933_v37 = vpop.permute.xlu1 %1769  ;;  %v452_v4 = vpop.trf.xlu0 }
 0x275   :  { %v5937_v59 = vrot.slane %v452_v4, %v7878_v61  ;;  %v5939_v57 = vrot.slane %v452_v4, %v819_v0  ;;  %v5941_v53 = vrot.slane %v452_v4, %v1144_v12  ;;  %5091 = vset.pattern.permute.xlu1 %v7975_v33  ;;  %v5951_v34 = vrot.slane %v452_v4, %v1469_v54  ;;  %v5958_v0 = vld [vmem:[%s7860_s1] sm:$0xff] }
 0x276   :  { %1785 = vperm.xlu1 %5091, %v5771_v1   ;;  %7977 = vst [vmem:[#allocation21_spill] sm:$0xff] %v5958_v0  ;;  %v5968_v44 = vrot.slane %v452_v4, %v1794_v35  ;;  %vm544_vm5 = vcmp.gt.f32.partialorder %v5958_v0, 0.0 }
 0x277   :  { %v513_v61 = vadd.f32 %v5937_v59, %v5825_v16  ;;  %v821_v33 = vadd.f32 %v5939_v57, %v5840_v21  ;;  %v1146_v12 = vadd.f32 %v5941_v53, %v5846_v23  ;;  %v2119_v16 = vsub.s32 5, %v5921_v60 }
 0x278   :  { %v1471_v47 = vadd.f32 %v5951_v34, %v5852_v25  ;;  %v1147_v31 = vadd.f32 %v5941_v53, %v5832_v18  ;;  %v1148_v30 = vadd.f32 %v5941_v53, %v5856_v26  ;;  %v1799_v0 = vadd.f32 %v5968_v44, %v5905_v63 }
 0x279   :  { %v5965_v29 = vpop.permute.xlu1 %2094  ;;  %vm521_vm3 = vcmp.gt.f32.partialorder %v513_v61, 0.0  ;;  %v529_v54 = vmul.f32 0.2, %v513_v61  ;;  %vm829_vm4 = vcmp.gt.f32.partialorder %v821_v33, 0.0  ;;  %v837_v46 = vmul.f32 0.2, %v821_v33 }
 0x27a   :  { %5092 = vset.pattern.permute.xlu1 %v7978_v28  ;;  %v1162_v8 = vmul.f32 0.2, %v1146_v12  ;;  %vm1154_vm6 = vcmp.gt.f32.partialorder %v1146_v12, 0.0  ;;  %v2444_v28 = vsub.s32 6, %v5921_v60  ;;  %vm1479_vm7 = vcmp.gt.f32.partialorder %v1471_v47, 0.0 }
 0x27b   :  { %2110 = vperm.xlu1 %5092, %v5771_v1   ;;  %v537_v21 = vsel %vm521_vm3, %v513_v61, %v529_v54  ;;  %v845_v23 = vsel %vm829_vm4, %v821_v33, %v837_v46  ;;  %v5988_v1 = vrot.slane %v452_v4, %v2119_v16  ;;  %v1487_v61 = vmul.f32 0.2, %v1471_v47 }
 0x27c   :  { %v5977_v51 = vsel %vm545_vm2, %v537_v21, -1e+30  ;;  %v5986_v46 = vsel %vm544_vm5, %v845_v23, -1e+30  ;;  %v1170_v25 = vsel %vm1154_vm6, %v1146_v12, %v1162_v8  ;;  %v1796_v33 = vadd.f32 %v5968_v44, %v5858_v27 }
 0x27d   :  { %v563_v35 = vsel %vm201_vm1, %v5977_v51, -inf  ;;  %7979 = vst [vmem:[#allocation22_spill] sm:$0xff] %v5986_v46  ;;  %v7980_v54 = vmov 0   ;;  %v861_v21 = vsel %vm201_vm1, %v5986_v46, -inf  ;;  %v5998_v23 = vsel %vm544_vm5, %v1170_v25, -1e+30 }
 0x27e   :  { %v5982_v43 = vpop.permute.xlu1 %2419  ;;  %564 = vmax.xlane.f32.xlu0 %v563_v35  ;;  %v6000_v16 = vrot.slane %v452_v4, %v2444_v28  ;;  %v1495_v12 = vsel %vm1479_vm7, %v1471_v47, %v1487_v61  ;;  %v1812_v35 = vmul.f32 0.2, %v1796_v33  ;;  %v2121_v27 = vadd.f32 %v5988_v1, %v5862_v38 }
 0x27f   :  { %5096 = vset.pattern.permute.xlu1 %v7980_v54  ;;  %vm1804_vm8 = vcmp.gt.f32.partialorder %v1796_v33, 0.0  ;;  %v1186_v54 = vsel %vm201_vm1, %v5998_v23, -inf  ;;  %v6012_v25 = vrot.slane %v452_v4, %v2769_v6  ;;  %v1163_v18 = vmul.f32 0.2, %v1147_v31 }
 0x280   :  { %v1820_v28 = vsel %vm1804_vm8, %v1796_v33, %v1812_v35  ;;  %v2137_v60 = vmul.f32 0.2, %v2121_v27  ;;  %v2446_v47 = vadd.f32 %v6000_v16, %v5869_v40  ;;  %vm2129_vm9 = vcmp.gt.f32.partialorder %v2121_v27, 0.0 }
 0x281   :  { %v2771_v6 = vadd.f32 %v6012_v25, %v5875_v42  ;;  %v822_v42 = vadd.f32 %v5939_v57, %v5810_v11  ;;  %vm1155_vm0 = vcmp.gt.f32.partialorder %v1147_v31, 0.0  ;;  %vm1156_vm3 = vcmp.gt.f32.partialorder %v1148_v30, 0.0 }
 0x282   :  { %862 = vmax.xlane.f32.xlu0 %v861_v21  ;;  %v6010_v21 = vsel %vm544_vm5, %v1495_v12, -1e+30  ;;  %v2145_v12 = vsel %vm2129_vm9, %v2121_v27, %v2137_v60  ;;  %v2462_v48 = vmul.f32 0.2, %v2446_v47  ;;  %vm2454_vm10 = vcmp.gt.f32.partialorder %v2446_v47, 0.0 }
 0x283   :  { %v6002_v8 = vpop.permute.xlu1 %806  ;;  %7981 = vst [vmem:[#allocation23_spill] sm:$0xff] %v6010_v21  ;;  %v1511_v38 = vsel %vm201_vm1, %v6010_v21, -inf  ;;  %v6032_v33 = vsel %vm544_vm5, %v2145_v12, -1e+30  ;;  %v514_v60 = vadd.f32 %v5937_v59, %v5844_v22  ;;  %vm2779_vm11 = vcmp.gt.f32.partialorder %v2771_v6, 0.0  ;;  %v6051_v22 = vld [vmem:[%s7860_s1 + $0x10] sm:$0xff] }
 0x284   :  { %v2470_v35 = vsel %vm2454_vm10, %v2446_v47, %v2462_v48  ;;  %v2161_v27 = vsel %vm201_vm1, %v6032_v33, -inf  ;;  %v823_v47 = vadd.f32 %v5939_v57, %v5850_v24  ;;  %7983 = vst [vmem:[#allocation25_spill] sm:$0xff] %v6051_v22  ;;  %v838_v11 = vmul.f32 0.2, %v822_v42 }
 0x285   :  { %v530_v48 = vmul.f32 0.2, %v514_v60  ;;  %vm522_vm12 = vcmp.gt.f32.partialorder %v514_v60, 0.0  ;;  %vm830_vm13 = vcmp.gt.f32.partialorder %v822_v42, 0.0  ;;  %vm546_vm14 = vcmp.gt.f32.partialorder %v6051_v22, 0.0 }
 0x286   :  { %1187 = vmax.xlane.f32.xlu0 %v1186_v54  ;;  %v6022_v54 = vsel %vm544_vm5, %v1820_v28, -1e+30  ;;  %v846_v21 = vsel %vm830_vm13, %v822_v42, %v838_v11  ;;  %vm831_vm15 = vcmp.gt.f32.partialorder %v823_v47, 0.0  ;;  %v1164_v42 = vmul.f32 0.2, %v1148_v30 }
 0x287   :  { %v1836_v40 = vsel %vm201_vm1, %v6022_v54, -inf }
 0x288   :  { %v6016_v61 = vpop.permute.xlu1 %1456 }
 0x28a   :  { %1512 = vmax.xlane.f32.xlu0 %v1511_v38  ;;  %v2787_v38 = vmul.f32 0.2, %v2771_v6 }
 0x28c   :  { %v2795_v12 = vsel %vm2779_vm11, %v2771_v6, %v2787_v38  ;;  %v839_v38 = vmul.f32 0.2, %v823_v47 }
 0x28d   :  { %v6026_v4 = vpop.permute.xlu1 %1781  ;;  %v6059_v6 = vsel %vm544_vm5, %v2795_v12, -1e+30  ;;  %v6076_v12 = vsel %vm545_vm2, %v846_v21, -1e+30 }
 0x28e   :  { %1837 = vmax.xlane.f32.xlu0 %v1836_v40  ;;  %v6044_v40 = vsel %vm544_vm5, %v2470_v35, -1e+30  ;;  %7984 = vst [vmem:[#allocation26_spill] sm:$0xff] %v6059_v6  ;;  %v538_v35 = vsel %vm522_vm12, %v514_v60, %v530_v48  ;;  %v847_v26 = vsel %vm831_vm15, %v823_v47, %v839_v38  ;;  %v1473_v48 = vadd.f32 %v5951_v34, %v5865_v39 }
 0x28f   :  { %7982 = vst [vmem:[#allocation24_spill] sm:$0xff] %v6044_v40  ;;  %v6072_v60 = vsel %vm546_vm14, %v538_v35, -1e+30  ;;  %v864_v21 = vsel %vm201_vm1, %v6076_v12, -inf  ;;  %v6090_v47 = vsel %vm546_vm14, %v847_v26, -1e+30  ;;  %v1172_v39 = vsel %vm1156_vm3, %v1148_v30, %v1164_v42 }
 0x290   :  { %7985 = vst [vmem:[#allocation27_spill] sm:$0xff] %v6072_v60  ;;  %v566_v35 = vsel %vm201_vm1, %v6072_v60, -inf  ;;  %7986 = vst [vmem:[#allocation28_spill] sm:$0xff] %v6090_v47  ;;  %v1489_v38 = vmul.f32 0.2, %v1473_v48  ;;  %vm1481_vm6 = vcmp.gt.f32.partialorder %v1473_v48, 0.0  ;;  %v2122_v60 = vadd.f32 %v5988_v1, %v5822_v15 }
 0x291   :  { %v867_v26 = vsel %vm201_vm1, %v6090_v47, -inf  ;;  %v6108_v42 = vsel %vm546_vm14, %v1172_v39, -1e+30 }
 0x292   :  { %v6040_v28 = vpop.permute.xlu1 %2756  ;;  %2162 = vmax.xlane.f32.xlu0 %v2161_v27  ;;  %v2486_v27 = vsel %vm201_vm1, %v6044_v40, -inf  ;;  %v1472_v40 = vadd.f32 %v5951_v34, %v5814_v13  ;;  %v1171_v13 = vsel %vm1155_vm0, %v1147_v31, %v1163_v18  ;;  %v1192_v39 = vsel %vm201_vm1, %v6108_v42, -inf }
 0x293   :  { %v6094_v31 = vsel %vm545_vm2, %v1171_v13, -1e+30  ;;  %vm2130_vm9 = vcmp.gt.f32.partialorder %v2122_v60, 0.0 }
 0x294   :  { %vm1480_vm4 = vcmp.gt.f32.partialorder %v1472_v40, 0.0  ;;  %v1189_v30 = vsel %vm201_vm1, %v6094_v31, -inf }
 0x296   :  { %2487 = vmax.xlane.f32.xlu0 %v2486_v27  ;;  %v2811_v27 = vsel %vm201_vm1, %v6059_v6, -inf  ;;  %v1488_v6 = vmul.f32 0.2, %v1472_v40 }
 0x297   :  { %v6061_v24 = vpop.permute.xlu1 %490 }
 0x298   :  { %v1496_v18 = vsel %vm1480_vm4, %v1472_v40, %v1488_v6  ;;  %v1497_v40 = vsel %vm1481_vm6, %v1473_v48, %v1489_v38  ;;  %v2448_v38 = vadd.f32 %v6000_v16, %v5982_v43 }
 0x299   :  { %v6114_v15 = vsel %vm545_vm2, %v1496_v18, -1e+30  ;;  %v6126_v48 = vsel %vm546_vm14, %v1497_v40, -1e+30 }
 0x29a   :  { %2812 = vmax.xlane.f32.xlu0 %v2811_v27  ;;  %v1797_v27 = vadd.f32 %v5968_v44, %v5818_v14  ;;  %v1798_v14 = vadd.f32 %v5968_v44, %v5933_v37  ;;  %v2123_v37 = vadd.f32 %v5988_v1, %v5965_v29  ;;  %v1514_v29 = vsel %vm201_vm1, %v6114_v15, -inf  ;;  %7987 = vst [vmem:[#allocation29_spill] sm:$0xff] %v6126_v48 }
 0x29b   :  { %v1517_v40 = vsel %vm201_vm1, %v6126_v48, -inf  ;;  %vm2456_vm12 = vcmp.gt.f32.partialorder %v2448_v38, 0.0  ;;  %v512_v48 = vadd.f32 %v5937_v59, %v5838_v20 }
 0x29c   :  { %v6080_v11 = vpop.permute.xlu1 %802  ;;  %vm1805_vm7 = vcmp.gt.f32.partialorder %v1797_v27, 0.0  ;;  %v1814_v6 = vmul.f32 0.2, %v1798_v14  ;;  %vm1806_vm8 = vcmp.gt.f32.partialorder %v1798_v14, 0.0  ;;  %vm2131_vm10 = vcmp.gt.f32.partialorder %v2123_v37, 0.0 }
 0x29d   :  { %vm520_vm0 = vcmp.gt.f32.partialorder %v512_v48, 0.0 }
 0x29e   :  { %567 = vmax.xlane.f32.xlu0 %v566_v35  ;;  %v1813_v35 = vmul.f32 0.2, %v1797_v27  ;;  %v1822_v18 = vsel %vm1806_vm8, %v1798_v14, %v1814_v6  ;;  %v2773_v6 = vadd.f32 %v6012_v25, %v5872_v41  ;;  %v516_v41 = vadd.f32 %v5937_v59, %v6061_v24 }
 0x29f   :  { %865 = vmax.xlane.f32.xlu1 %v864_v21  ;;  %v2138_v21 = vmul.f32 0.2, %v2122_v60 }
 0x2a0   :  { %v1821_v13 = vsel %vm1805_vm7, %v1797_v27, %v1813_v35  ;;  %v2139_v27 = vmul.f32 0.2, %v2123_v37  ;;  %vm2781_vm15 = vcmp.gt.f32.partialorder %v2773_v6, 0.0  ;;  %vm524_vm3 = vcmp.gt.f32.partialorder %v516_v41, 0.0 }
 0x2a1   :  { %v6100_v46 = vpop.permute.xlu1 %1127  ;;  %v2146_v35 = vsel %vm2130_vm9, %v2122_v60, %v2138_v21 }
 0x2a2   :  { %868 = vmax.xlane.f32.xlu0 %v867_v26  ;;  %v2447_v26 = vadd.f32 %v6000_v16, %v5828_v17  ;;  %v6132_v17 = vsel %vm545_vm2, %v1821_v13, -1e+30  ;;  %v2464_v13 = vmul.f32 0.2, %v2448_v38  ;;  %v6148_v60 = vsel %vm545_vm2, %v2146_v35, -1e+30 }
 0x2a3   :  { %1190 = vmax.xlane.f32.xlu1 %v1189_v30  ;;  %v1839_v43 = vsel %vm201_vm1, %v6132_v17, -inf }
 0x2a4   :  { %v2463_v30 = vmul.f32 0.2, %v2447_v26  ;;  %vm2455_vm11 = vcmp.gt.f32.partialorder %v2447_v26, 0.0  ;;  %v2472_v20 = vsel %vm2456_vm12, %v2448_v38, %v2464_v13  ;;  %v532_v13 = vmul.f32 0.2, %v516_v41 }
 0x2a5   :  { %v6178_v38 = vsel %vm546_vm14, %v2472_v20, -1e+30 }
 0x2a6   :  { %v6120_v47 = vpop.permute.xlu1 %1452  ;;  %1193 = vmax.xlane.f32.xlu0 %v1192_v39  ;;  %v2772_v39 = vadd.f32 %v6012_v25, %v5834_v19  ;;  %v2147_v19 = vsel %vm2131_vm10, %v2123_v37, %v2139_v27  ;;  %v2471_v21 = vsel %vm2455_vm11, %v2447_v26, %v2463_v30  ;;  %v2789_v27 = vmul.f32 0.2, %v2773_v6  ;;  %7991 = vst [vmem:[#allocation33_spill] sm:$0xff] %v6178_v38 }
 0x2a7   :  { %1515 = vmax.xlane.f32.xlu1 %v1514_v29  ;;  %v6142_v29 = vsel %vm546_vm14, %v1822_v18, -1e+30  ;;  %v6160_v37 = vsel %vm546_vm14, %v2147_v19, -1e+30  ;;  %v6166_v26 = vsel %vm545_vm2, %v2471_v21, -1e+30 }
 0x2a8   :  { %7988 = vst [vmem:[#allocation30_spill] sm:$0xff] %v6142_v29  ;;  %v1842_v18 = vsel %vm201_vm1, %v6142_v29, -inf  ;;  %vm2780_vm13 = vcmp.gt.f32.partialorder %v2772_v39, 0.0  ;;  %7989 = vst [vmem:[#allocation31_spill] sm:$0xff] %v6160_v37  ;;  %v515_v29 = vadd.f32 %v5937_v59, %v5881_v49  ;;  %v2167_v19 = vsel %vm201_vm1, %v6160_v37, -inf }
 0x2a9   :  { %7990 = vst [vmem:[#allocation32_spill] sm:$0xff] %v6166_v26  ;;  %v2489_v24 = vsel %vm201_vm1, %v6166_v26, -inf  ;;  %v2797_v21 = vsel %vm2781_vm15, %v2773_v6, %v2789_v27  ;;  %v2492_v6 = vsel %vm201_vm1, %v6178_v38, -inf }
 0x2aa   :  { %1518 = vmax.xlane.f32.xlu0 %v1517_v40  ;;  %v2788_v40 = vmul.f32 0.2, %v2772_v39  ;;  %vm523_vm4 = vcmp.gt.f32.partialorder %v515_v29, 0.0 }
 0x2ab   :  { %v6144_v14 = vpop.permute.xlu1 %1777  ;;  %1840 = vmax.xlane.f32.xlu1 %v1839_v43  ;;  %v2164_v43 = vsel %vm201_vm1, %v6148_v60, -inf }
 0x2ac   :  { %v2796_v30 = vsel %vm2780_vm13, %v2772_v39, %v2788_v40  ;;  %v825_v39 = vadd.f32 %v5939_v57, %v6080_v11  ;;  %v6189_v40 = vld [vmem:[%s7860_s1 + $0x20] sm:$0xff]  ;;  %v824_v11 = vadd.f32 %v5939_v57, %v5887_v52  ;;  %v1150_v52 = vadd.f32 %v5941_v53, %v6100_v46 }
 0x2ad   :  { %v6184_v49 = vsel %vm545_vm2, %v2796_v30, -1e+30  ;;  %7993 = vst [vmem:[#allocation35_spill] sm:$0xff] %v6189_v40  ;;  %v6206_v30 = vsel %vm546_vm14, %v2797_v21, -1e+30  ;;  %vm548_vm6 = vcmp.gt.f32.partialorder %v6189_v40, 0.0  ;;  %v1149_v21 = vadd.f32 %v5941_v53, %v5893_v56 }
 0x2ae   :  { %1843 = vmax.xlane.f32.xlu0 %v1842_v18  ;;  %v528_v18 = vmul.f32 0.2, %v512_v48  ;;  %7992 = vst [vmem:[#allocation34_spill] sm:$0xff] %v6184_v49  ;;  %v2814_v27 = vsel %vm201_vm1, %v6184_v49, -inf  ;;  %7995 = vst [vmem:[#allocation37_spill] sm:$0xff] %v6206_v30  ;;  %vm833_vm8 = vcmp.gt.f32.partialorder %v825_v39, 0.0 }
 0x2af   :  { %2165 = vmax.xlane.f32.xlu1 %v2164_v43  ;;  %v6194_v43 = vld [vmem:[%s7860_s1 + $0x18] sm:$0xff]  ;;  %v840_v49 = vmul.f32 0.2, %v824_v11  ;;  %v2817_v22 = vsel %vm201_vm1, %v6206_v30, -inf  ;;  %vm832_vm9 = vcmp.gt.f32.partialorder %v824_v11, 0.0  ;;  %vm1158_vm10 = vcmp.gt.f32.partialorder %v1150_v52, 0.0 }
 0x2b0   :  { %v6168_v35 = vpop.permute.xlu1 %2102  ;;  %7994 = vst [vmem:[#allocation36_spill] sm:$0xff] %v6194_v43  ;;  %v536_v20 = vsel %vm520_vm0, %v512_v48, %v528_v18  ;;  %vm547_vm7 = vcmp.gt.f32.partialorder %v6194_v43, 0.0  ;;  %v841_v48 = vmul.f32 0.2, %v825_v39  ;;  %vm1157_vm11 = vcmp.gt.f32.partialorder %v1149_v21, 0.0 }
 0x2b1   :  { %v6214_v18 = vsel %vm544_vm5, %v536_v20, -1e+30  ;;  %v2124_v30 = vadd.f32 %v5988_v1, %v5911_v3  ;;  %vm1807_vm0 = vcmp.gt.f32.partialorder %v1799_v0, 0.0 }
 0x2b2   :  { %2168 = vmax.xlane.f32.xlu0 %v2167_v19  ;;  %v531_v19 = vmul.f32 0.2, %v515_v29  ;;  %v560_v46 = vsel %vm201_vm1, %v6214_v18, -inf }
 0x2b3   :  { %2490 = vmax.xlane.f32.xlu1 %v2489_v24 }
 0x2b4   :  { %v539_v26 = vsel %vm523_vm4, %v515_v29, %v531_v19  ;;  %v1166_v29 = vmul.f32 0.2, %v1150_v52  ;;  %v848_v19 = vsel %vm832_vm9, %v824_v11, %v840_v49  ;;  %vm2132_vm4 = vcmp.gt.f32.partialorder %v2124_v30, 0.0 }
 0x2b5   :  { %v6198_v24 = vpop.permute.xlu1 %2427  ;;  %v6232_v56 = vsel %vm547_vm7, %v539_v26, -1e+30 }
 0x2b6   :  { %2493 = vmax.xlane.f32.xlu0 %v2492_v6  ;;  %v540_v6 = vsel %vm524_vm3, %v516_v41, %v532_v13  ;;  %v1475_v41 = vadd.f32 %v5951_v34, %v6120_v47  ;;  %v849_v13 = vsel %vm833_vm8, %v825_v39, %v841_v48  ;;  %v569_v47 = vsel %vm201_vm1, %v6232_v56, -inf }
 0x2b7   :  { %2815 = vmax.xlane.f32.xlu1 %v2814_v27  ;;  %v6226_v20 = vsel %vm548_vm6, %v540_v6, -1e+30  ;;  %v1474_v27 = vadd.f32 %v5951_v34, %v5899_v58  ;;  %v1800_v39 = vadd.f32 %v5968_v44, %v6144_v14  ;;  %v6250_v58 = vsel %vm547_vm7, %v848_v19, -1e+30 }
 0x2b8   :  { %v572_v6 = vsel %vm201_vm1, %v6226_v20, -inf  ;;  %v1491_v26 = vmul.f32 0.2, %v1475_v41  ;;  %v1174_v11 = vsel %vm1158_vm10, %v1150_v52, %v1166_v29  ;;  %vm1483_vm12 = vcmp.gt.f32.partialorder %v1475_v41, 0.0 }
 0x2b9   :  { %vm1482_vm13 = vcmp.gt.f32.partialorder %v1474_v27, 0.0  ;;  %v870_v14 = vsel %vm201_vm1, %v6250_v58, -inf  ;;  %v1816_v19 = vmul.f32 0.2, %v1800_v39  ;;  %v2125_v52 = vadd.f32 %v5988_v1, %v6168_v35 }
 0x2ba   :  { %v6220_v38 = vpop.permute.xlu1 %2752  ;;  %2818 = vmax.xlane.f32.xlu0 %v2817_v22  ;;  %v1165_v22 = vmul.f32 0.2, %v1149_v21  ;;  %vm1808_vm15 = vcmp.gt.f32.partialorder %v1800_v39, 0.0 }
 0x2bb   :  { %561 = vmax.xlane.f32.xlu1 %v560_v46  ;;  %v6242_v46 = vsel %vm548_vm6, %v849_v13, -1e+30  ;;  %vm2133_vm3 = vcmp.gt.f32.partialorder %v2125_v52, 0.0 }
 0x2bc   :  { %7996 = vst [vmem:[#allocation38_spill] sm:$0xff] %v6242_v46  ;;  %v1173_v48 = vsel %vm1157_vm11, %v1149_v21, %v1165_v22  ;;  %v873_v13 = vsel %vm201_vm1, %v6242_v46, -inf  ;;  %v1499_v21 = vsel %vm1483_vm12, %v1475_v41, %v1491_v26  ;;  %v2141_v41 = vmul.f32 0.2, %v2125_v52 }
 0x2bd   :  { %v6266_v63 = vsel %vm547_vm7, %v1173_v48, -1e+30  ;;  %v6278_v48 = vsel %vm548_vm6, %v1499_v21, -1e+30  ;;  %v1824_v26 = vsel %vm1808_vm15, %v1800_v39, %v1816_v19  ;;  %v2775_v39 = vadd.f32 %v6012_v25, %v6220_v38 }
 0x2be   :  { %573 = vmax.xlane.f32.xlu0 %v572_v6  ;;  %v1490_v6 = vmul.f32 0.2, %v1474_v27  ;;  %v1195_v35 = vsel %vm201_vm1, %v6266_v63, -inf  ;;  %v1523_v21 = vsel %vm201_vm1, %v6278_v48, -inf  ;;  %v2149_v19 = vsel %vm2133_vm3, %v2125_v52, %v2141_v41 }
 0x2bf   :  { %v6246_v49 = vpop.permute.xlu1 %505  ;;  %570 = vmax.xlane.f32.xlu1 %v569_v47  ;;  %v6260_v47 = vsel %vm548_vm6, %v1174_v11, -1e+30  ;;  %v518_v41 = vadd.f32 %v5937_v59, %v5903_v62  ;;  %vm2783_vm10 = vcmp.gt.f32.partialorder %v2775_v39, 0.0 }
 0x2c0   :  { %v1498_v22 = vsel %vm1482_vm13, %v1474_v27, %v1490_v6  ;;  %v1198_v11 = vsel %vm201_vm1, %v6260_v47, -inf  ;;  %v2450_v27 = vadd.f32 %v6000_v16, %v6198_v24 }
 0x2c1   :  { %v6284_v3 = vsel %vm547_vm7, %v1498_v22, -1e+30  ;;  %v6296_v22 = vsel %vm548_vm6, %v1824_v26, -1e+30  ;;  %vm526_vm12 = vcmp.gt.f32.partialorder %v518_v41, 0.0 }
 0x2c2   :  { %874 = vmax.xlane.f32.xlu0 %v873_v13  ;;  %v1815_v13 = vmul.f32 0.2, %v1799_v0  ;;  %v1520_v24 = vsel %vm201_vm1, %v6284_v3, -inf  ;;  %vm2458_vm8 = vcmp.gt.f32.partialorder %v2450_v27, 0.0  ;;  %v1848_v26 = vsel %vm201_vm1, %v6296_v22, -inf }
 0x2c3   :  { %871 = vmax.xlane.f32.xlu1 %v870_v14  ;;  %v2140_v14 = vmul.f32 0.2, %v2124_v30 }
 0x2c4   :  { %v6268_v29 = vpop.permute.xlu1 %814  ;;  %v1823_v6 = vsel %vm1807_vm0, %v1799_v0, %v1815_v13  ;;  %v2466_v0 = vmul.f32 0.2, %v2450_v27 }
 0x2c5   :  { %v2148_v13 = vsel %vm2132_vm4, %v2124_v30, %v2140_v14  ;;  %v2791_v30 = vmul.f32 0.2, %v2775_v39 }
 0x2c6   :  { %1199 = vmax.xlane.f32.xlu0 %v1198_v11  ;;  %v2449_v11 = vadd.f32 %v6000_v16, %v5917_v7  ;;  %v6302_v7 = vsel %vm547_vm7, %v1823_v6, -1e+30  ;;  %v6314_v6 = vsel %vm548_vm6, %v2149_v19, -1e+30  ;;  %v6318_v52 = vsel %vm547_vm7, %v2148_v13, -1e+30 }
 0x2c7   :  { %1196 = vmax.xlane.f32.xlu1 %v1195_v35  ;;  %7997 = vst [vmem:[#allocation39_spill] sm:$0xff] %v6302_v7  ;;  %v1845_v38 = vsel %vm201_vm1, %v6302_v7, -inf  ;;  %7998 = vst [vmem:[#allocation40_spill] sm:$0xff] %v6314_v6  ;;  %v2173_v19 = vsel %vm201_vm1, %v6314_v6, -inf  ;;  %v534_v13 = vmul.f32 0.2, %v518_v41 }
 0x2c8   :  { %v2465_v35 = vmul.f32 0.2, %v2449_v11  ;;  %vm2457_vm9 = vcmp.gt.f32.partialorder %v2449_v11, 0.0  ;;  %7999 = vst [vmem:[#allocation41_spill] sm:$0xff] %v6318_v52 }
 0x2c9   :  { %v6288_v37 = vpop.permute.xlu1 %1139 }
 0x2ca   :  { %1524 = vmax.xlane.f32.xlu0 %v1523_v21  ;;  %v2774_v21 = vadd.f32 %v6012_v25, %v5923_v9  ;;  %v2474_v9 = vsel %vm2458_vm8, %v2450_v27, %v2466_v0  ;;  %v2473_v14 = vsel %vm2457_vm9, %v2449_v11, %v2465_v35  ;;  %v6341_v11 = vld [vmem:[%s7860_s1 + $0x30] sm:$0xff]  ;;  %v827_v35 = vadd.f32 %v5939_v57, %v5909_v2 }
 0x2cb   :  { %1521 = vmax.xlane.f32.xlu1 %v1520_v24  ;;  %v6330_v27 = vsel %vm548_vm6, %v2474_v9, -1e+30  ;;  %v6336_v62 = vsel %vm547_vm7, %v2473_v14, -1e+30  ;;  %8002 = vst [vmem:[#allocation44_spill] sm:$0xff] %v6341_v11  ;;  %v826_v9 = vadd.f32 %v5939_v57, %v6002_v8  ;;  %v6350_v14 = vld [vmem:[%s7860_s1 + $0x28] sm:$0xff] }
 0x2cc   :  { %v2790_v24 = vmul.f32 0.2, %v2774_v21  ;;  %vm2782_vm11 = vcmp.gt.f32.partialorder %v2774_v21, 0.0  ;;  %8000 = vst [vmem:[#allocation42_spill] sm:$0xff] %v6330_v27  ;;  %8001 = vst [vmem:[#allocation43_spill] sm:$0xff] %v6336_v62  ;;  %vm7957_vm15 = vcmp.gt.f32.partialorder %v6341_v11, 0.0 }
 0x2cd   :  { %8003 = vst [vmem:[#allocation45_spill] sm:$0xff] %v6350_v14  ;;  %vm7956_vm0 = vcmp.gt.f32.partialorder %v6350_v14, 0.0  ;;  %vm835_vm3 = vcmp.gt.f32.partialorder %v827_v35, 0.0  ;;  %vm834_vm4 = vcmp.gt.f32.partialorder %v826_v9, 0.0 }
 0x2ce   :  { %v6308_v46 = vpop.permute.xlu1 %1464  ;;  %1849 = vmax.xlane.f32.xlu0 %v1848_v26  ;;  %v517_v26 = vadd.f32 %v5937_v59, %v5877_v45  ;;  %v2799_v45 = vsel %vm2783_vm10, %v2775_v39, %v2791_v30  ;;  %v2498_v30 = vsel %vm201_vm1, %v6330_v27, -inf  ;;  %v842_v27 = vmul.f32 0.2, %v826_v9 }
 0x2cf   :  { %1846 = vmax.xlane.f32.xlu1 %v1845_v38  ;;  %v2170_v38 = vsel %vm201_vm1, %v6318_v52, -inf  ;;  %v6358_v2 = vsel %vm548_vm6, %v2799_v45, -1e+30  ;;  %v1151_v45 = vadd.f32 %v5941_v53, %v5884_v50  ;;  %v1476_v50 = vadd.f32 %v5951_v34, %v6016_v61 }
 0x2d0   :  { %v533_v39 = vmul.f32 0.2, %v517_v26  ;;  %vm525_vm13 = vcmp.gt.f32.partialorder %v517_v26, 0.0  ;;  %8004 = vst [vmem:[#allocation46_spill] sm:$0xff] %v6358_v2  ;;  %v2823_v40 = vsel %vm201_vm1, %v6358_v2, -inf }
 0x2d1   :  { %vm1159_vm8 = vcmp.gt.f32.partialorder %v1151_v45, 0.0  ;;  %vm1484_vm9 = vcmp.gt.f32.partialorder %v1476_v50, 0.0 }
 0x2d2   :  { %2174 = vmax.xlane.f32.xlu0 %v2173_v19  ;;  %v2798_v19 = vsel %vm2782_vm11, %v2774_v21, %v2790_v24  ;;  %v542_v21 = vsel %vm526_vm12, %v518_v41, %v534_v13  ;;  %v843_v24 = vmul.f32 0.2, %v827_v35  ;;  %v541_v52 = vsel %vm525_vm13, %v517_v26, %v533_v39 }
 0x2d3   :  { %v6332_v0 = vpop.permute.xlu1 %1789  ;;  %2171 = vmax.xlane.f32.xlu1 %v2170_v38  ;;  %v2495_v38 = vsel %vm201_vm1, %v6336_v62, -inf  ;;  %v6363_v8 = vsel %vm547_vm7, %v2798_v19, -1e+30  ;;  %v6376_v41 = vsel %vm7957_vm15, %v542_v21, -1e+30  ;;  %v850_v39 = vsel %vm834_vm4, %v826_v9, %v842_v27 }
 0x2d4   :  { %8005 = vst [vmem:[#allocation47_spill] sm:$0xff] %v6363_v8  ;;  %v2820_v19 = vsel %vm201_vm1, %v6363_v8, -inf  ;;  %v6380_v26 = vsel %vm7956_vm0, %v541_v52, -1e+30  ;;  %v851_v13 = vsel %vm835_vm3, %v827_v35, %v843_v24  ;;  %v6396_v61 = vsel %vm7956_vm0, %v850_v39, -1e+30 }
 0x2d5   :  { %v575_v21 = vsel %vm201_vm1, %v6380_v26, -inf  ;;  %v6392_v52 = vsel %vm7957_vm15, %v851_v13, -1e+30  ;;  %v1492_v27 = vmul.f32 0.2, %v1476_v50  ;;  %v1801_v35 = vadd.f32 %v5968_v44, %v6026_v4 }
 0x2d6   :  { %2499 = vmax.xlane.f32.xlu0 %v2498_v30  ;;  %v879_v24 = vsel %vm201_vm1, %v6392_v52, -inf  ;;  %v876_v13 = vsel %vm201_vm1, %v6396_v61, -inf  ;;  %v2126_v4 = vadd.f32 %v5988_v1, %v5891_v55  ;;  %v2776_v55 = vadd.f32 %v6012_v25, %v6040_v28 }
 0x2d7   :  { %2496 = vmax.xlane.f32.xlu1 %v2495_v38  ;;  %v1167_v38 = vmul.f32 0.2, %v1151_v45  ;;  %vm1809_vm10 = vcmp.gt.f32.partialorder %v1801_v35, 0.0 }
 0x2d8   :  { %v6366_v30 = vpop.permute.xlu1 %2114  ;;  %vm2134_vm11 = vcmp.gt.f32.partialorder %v2126_v4, 0.0  ;;  %v2792_v28 = vmul.f32 0.2, %v2776_v55  ;;  %vm2784_vm4 = vcmp.gt.f32.partialorder %v2776_v55, 0.0 }
 0x2d9   :  { %v1175_v9 = vsel %vm1159_vm8, %v1151_v45, %v1167_v38 }
 0x2da   :  { %2824 = vmax.xlane.f32.xlu0 %v2823_v40  ;;  %v578_v40 = vsel %vm201_vm1, %v6376_v41, -inf  ;;  %v6408_v39 = vsel %vm7956_vm0, %v1175_v9, -1e+30  ;;  %v2142_v9 = vmul.f32 0.2, %v2126_v4 }
 0x2db   :  { %2821 = vmax.xlane.f32.xlu1 %v2820_v19  ;;  %v1201_v45 = vsel %vm201_vm1, %v6408_v39, -inf }
 0x2dd   :  { %v6384_v2 = vpop.permute.xlu1 %2439 }
 0x2de   :  { %579 = vmax.xlane.f32.xlu0 %v578_v40  ;;  %v1817_v40 = vmul.f32 0.2, %v1801_v35 }
 0x2df   :  { %576 = vmax.xlane.f32.xlu1 %v575_v21  ;;  %v1500_v21 = vsel %vm1484_vm9, %v1476_v50, %v1492_v27  ;;  %v2451_v50 = vadd.f32 %v6000_v16, %v5897_v36 }
 0x2e0   :  { %v1825_v8 = vsel %vm1809_vm10, %v1801_v35, %v1817_v40  ;;  %v2150_v40 = vsel %vm2134_vm11, %v2126_v4, %v2142_v9 }
 0x2e1   :  { %vm2459_vm13 = vcmp.gt.f32.partialorder %v2451_v50, 0.0  ;;  %v6442_v4 = vsel %vm7956_vm0, %v2150_v40, -1e+30 }
 0x2e2   :  { %v6402_v19 = vpop.permute.xlu1 %2764  ;;  %880 = vmax.xlane.f32.xlu0 %v879_v24  ;;  %v6416_v24 = vsel %vm7956_vm0, %v1500_v21, -1e+30  ;;  %v6427_v21 = vsel %vm7956_vm0, %v1825_v8, -1e+30  ;;  %v519_v8 = vadd.f32 %v5937_v59, %v6246_v49  ;;  %v6454_v49 = vld [vmem:[%s7860_s1 + $0x38] sm:$0xff] }
 0x2e3   :  { %877 = vmax.xlane.f32.xlu1 %v876_v13  ;;  %v1526_v62 = vsel %vm201_vm1, %v6416_v24, -inf  ;;  %8006 = vst [vmem:[#allocation48_spill] sm:$0xff] %v6427_v21  ;;  %8007 = vst [vmem:[#allocation49_spill] sm:$0xff] %v6454_v49  ;;  %vm551_vm10 = vcmp.gt.f32.partialorder %v6454_v49, 0.0 }
 0x2e4   :  { %vm527_vm9 = vcmp.gt.f32.partialorder %v519_v8, 0.0 }
 0x2e7   :  { %v1136_v38 = vpop.permute.xlu1 %1135  ;;  %1202 = vmax.xlane.f32.xlu1 %v1201_v45 }
 0x2e8   :  { %v1152_v13 = vadd.f32 %v5941_v53, %v1136_v38  ;;  %v2467_v38 = vmul.f32 0.2, %v2451_v50 }
 0x2ea   :  { %v1168_v27 = vmul.f32 0.2, %v1152_v13  ;;  %vm1160_vm12 = vcmp.gt.f32.partialorder %v1152_v13, 0.0  ;;  %v2475_v9 = vsel %vm2459_vm13, %v2451_v50, %v2467_v38  ;;  %v535_v50 = vmul.f32 0.2, %v519_v8 }
 0x2eb   :  { %1527 = vmax.xlane.f32.xlu1 %v1526_v62  ;;  %v1851_v62 = vsel %vm201_vm1, %v6427_v21, -inf  ;;  %v2176_v21 = vsel %vm201_vm1, %v6442_v4, -inf  ;;  %v6462_v38 = vsel %vm7956_vm0, %v2475_v9, -1e+30 }
 0x2ec   :  { %v1461_v45 = vpop.permute.xlu1 %1460  ;;  %v1176_v35 = vsel %vm1160_vm12, %v1152_v13, %v1168_v27  ;;  %8008 = vst [vmem:[#allocation50_spill] sm:$0xff] %v6462_v38 }
 0x2ed   :  { %v1477_v36 = vadd.f32 %v5951_v34, %v1461_v45  ;;  %v6432_v6 = vsel %vm7957_vm15, %v1176_v35, -1e+30 }
 0x2ee   :  { %v1204_v7 = vsel %vm201_vm1, %v6432_v6, -inf }
 0x2ef   :  { %v1493_v13 = vmul.f32 0.2, %v1477_v36  ;;  %1205 = vmax.xlane.f32.xlu0 %v1204_v7  ;;  %1852 = vmax.xlane.f32.xlu1 %v1851_v62  ;;  %vm1485_vm3 = vcmp.gt.f32.partialorder %v1477_v36, 0.0  ;;  %v2452_v7 = vadd.f32 %v6000_v16, %v5915_v5  ;;  %v828_v62 = vadd.f32 %v5939_v57, %v6268_v29 }
 0x2f0   :  { %v543_v29 = vsel %vm527_vm9, %v519_v8, %v535_v50 }
 0x2f1   :  { %v1786_v27 = vpop.permute.xlu1 %1785  ;;  %v1501_v45 = vsel %vm1485_vm3, %v1477_v36, %v1493_v13  ;;  %v2800_v36 = vsel %vm2784_vm4, %v2776_v55, %v2792_v28  ;;  %v2468_v9 = vmul.f32 0.2, %v2452_v7  ;;  %v2777_v28 = vadd.f32 %v6012_v25, %v5925_v10 }
 0x2f2   :  { %v1802_v35 = vadd.f32 %v5968_v44, %v1786_v27  ;;  %v6449_v59 = vsel %vm7957_vm15, %v1501_v45, -1e+30  ;;  %v6471_v45 = vsel %vm7956_vm0, %v2800_v36, -1e+30  ;;  %vm2460_vm11 = vcmp.gt.f32.partialorder %v2452_v7, 0.0 }
 0x2f3   :  { %2177 = vmax.xlane.f32.xlu1 %v2176_v21  ;;  %v1529_v40 = vsel %vm201_vm1, %v6449_v59, -inf  ;;  %v2501_v21 = vsel %vm201_vm1, %v6462_v38, -inf  ;;  %8009 = vst [vmem:[#allocation51_spill] sm:$0xff] %v6471_v45  ;;  %vm836_vm13 = vcmp.gt.f32.partialorder %v828_v62, 0.0  ;;  %v6488_v8 = vsel %vm551_vm10, %v543_v29, -1e+30 }
 0x2f4   :  { %v1818_v13 = vmul.f32 0.2, %v1802_v35  ;;  %1530 = vmax.xlane.f32.xlu0 %v1529_v40  ;;  %vm1810_vm8 = vcmp.gt.f32.partialorder %v1802_v35, 0.0  ;;  %v844_v40 = vmul.f32 0.2, %v828_v62  ;;  %v2476_v50 = vsel %vm2460_vm11, %v2452_v7, %v2468_v9 }
 0x2f5   :  { %vm2785_vm3 = vcmp.gt.f32.partialorder %v2777_v28, 0.0  ;;  %v6502_v7 = vsel %vm7957_vm15, %v2476_v50, -1e+30 }
 0x2f6   :  { %v2111_v5 = vpop.permute.xlu1 %2110  ;;  %v1826_v27 = vsel %vm1810_vm8, %v1802_v35, %v1818_v13  ;;  %v1153_v35 = vadd.f32 %v5941_v53, %v6288_v37  ;;  %v2793_v53 = vmul.f32 0.2, %v2777_v28  ;;  %8010 = vst [vmem:[#allocation52_spill] sm:$0xff] %v6502_v7 }
 0x2f7   :  { %v2127_v55 = vadd.f32 %v5988_v1, %v2111_v5  ;;  %2502 = vmax.xlane.f32.xlu1 %v2501_v21  ;;  %v6476_v57 = vsel %vm7957_vm15, %v1826_v27, -1e+30  ;;  %v2826_v5 = vsel %vm201_vm1, %v6471_v45, -inf  ;;  %v1478_v21 = vadd.f32 %v5951_v34, %v6308_v46 }
 0x2f8   :  { %v1854_v36 = vsel %vm201_vm1, %v6476_v57, -inf  ;;  %v1169_v37 = vmul.f32 0.2, %v1153_v35  ;;  %vm1161_vm4 = vcmp.gt.f32.partialorder %v1153_v35, 0.0  ;;  %v2801_v46 = vsel %vm2785_vm3, %v2777_v28, %v2793_v53 }
 0x2f9   :  { %v2143_v13 = vmul.f32 0.2, %v2127_v55  ;;  %1855 = vmax.xlane.f32.xlu0 %v1854_v36  ;;  %vm2135_vm12 = vcmp.gt.f32.partialorder %v2127_v55, 0.0  ;;  %v852_v36 = vsel %vm836_vm13, %v828_v62, %v844_v40  ;;  %v1494_v9 = vmul.f32 0.2, %v1478_v21 }
 0x2fa   :  { %v6506_v34 = vsel %vm551_vm10, %v852_v36, -1e+30  ;;  %v1803_v62 = vadd.f32 %v5968_v44, %v6332_v0  ;;  %v1177_v29 = vsel %vm1161_vm4, %v1153_v35, %v1169_v37  ;;  %vm1486_vm8 = vcmp.gt.f32.partialorder %v1478_v21, 0.0 }
 0x2fb   :  { %2827 = vmax.xlane.f32.xlu1 %v2826_v5  ;;  %v2151_v10 = vsel %vm2135_vm12, %v2127_v55, %v2143_v13  ;;  %v581_v55 = vsel %vm201_vm1, %v6488_v8, -inf  ;;  %v882_v40 = vsel %vm201_vm1, %v6506_v34, -inf  ;;  %v6516_v13 = vsel %vm7957_vm15, %v2801_v46, -1e+30 }
 0x2fc   :  { %v6494_v27 = vsel %vm7957_vm15, %v2151_v10, -1e+30  ;;  %8011 = vst [vmem:[#allocation53_spill] sm:$0xff] %v6516_v13  ;;  %v6520_v28 = vsel %vm551_vm10, %v1177_v29, -1e+30  ;;  %v2128_v44 = vadd.f32 %v5988_v1, %v6366_v30  ;;  %v1502_v0 = vsel %vm1486_vm8, %v1478_v21, %v1494_v9 }
 0x2fd   :  { %v2179_v45 = vsel %vm201_vm1, %v6494_v27, -inf  ;;  %v1819_v5 = vmul.f32 0.2, %v1803_v62  ;;  %v2829_v35 = vsel %vm201_vm1, %v6516_v13, -inf  ;;  %vm1811_vm9 = vcmp.gt.f32.partialorder %v1803_v62, 0.0 }
 0x2fe   :  { %2180 = vmax.xlane.f32.xlu0 %v2179_v45  ;;  %v2504_v45 = vsel %vm201_vm1, %v6502_v7, -inf  ;;  %v1207_v10 = vsel %vm201_vm1, %v6520_v28, -inf  ;;  %v6530_v53 = vsel %vm551_vm10, %v1502_v0, -1e+30  ;;  %v2144_v37 = vmul.f32 0.2, %v2128_v44 }
 0x2ff   :  { %582 = vmax.xlane.f32.xlu1 %v581_v55  ;;  %v2453_v36 = vadd.f32 %v6000_v16, %v6384_v2  ;;  %v1827_v30 = vsel %vm1811_vm9, %v1803_v62, %v1819_v5  ;;  %vm2136_vm11 = vcmp.gt.f32.partialorder %v2128_v44, 0.0  ;;  %v1532_v55 = vsel %vm201_vm1, %v6530_v53, -inf }
 0x300   :  { %v6541_v9 = vsel %vm551_vm10, %v1827_v30, -1e+30  ;;  %v2152_v16 = vsel %vm2136_vm11, %v2128_v44, %v2144_v37  ;;  %vm3060_vm3 = vcmask 64512   ;;  %vm3101_vm4 = vcmask 130112  }
 0x301   :  { %v2469_v29 = vmul.f32 0.2, %v2453_v36  ;;  %vm2461_vm12 = vcmp.gt.f32.partialorder %v2453_v36, 0.0  ;;  %v6549_v62 = vsel %vm551_vm10, %v2152_v16, -1e+30  ;;  %vm3142_vm8 = vcmask 195712  }
 0x302   :  { %2505 = vmax.xlane.f32.xlu0 %v2504_v45  ;;  %v2778_v45 = vadd.f32 %v6012_v25, %v6402_v19  ;;  %v2182_v0 = vsel %vm201_vm1, %v6549_v62, -inf  ;;  %vm3183_vm9 = vcmask 261312   ;;  %vm3224_vm11 = vcmask 326912  }
 0x303   :  { %883 = vmax.xlane.f32.xlu1 %v882_v40  ;;  %v2477_v5 = vsel %vm2461_vm12, %v2453_v36, %v2469_v29  ;;  %vm3265_vm12 = vcmask 392512  }
 0x304   :  { %v2794_v40 = vmul.f32 0.2, %v2778_v45  ;;  %vm2786_vm13 = vcmp.gt.f32.partialorder %v2778_v45, 0.0  ;;  %v6557_v25 = vsel %vm551_vm10, %v2477_v5, -1e+30 }
 0x305   :  { %8012 = vst [vmem:[#allocation54_spill] sm:$0xff] %v6557_v25  ;;  %v2507_v44 = vsel %vm201_vm1, %v6557_v25, -inf }
 0x306   :  { %2830 = vmax.xlane.f32.xlu0 %v2829_v35  ;;  %v2802_v19 = vsel %vm2786_vm13, %v2778_v45, %v2794_v40  ;;  %vm3306_vm13 = vcmask 458112  }
 0x307   :  { %v565_v50 = vpop.xlane.xlu0 %564  ;;  %1208 = vmax.xlane.f32.xlu1 %v1207_v10 }
 0x308   :  { %v585_v1 = vsub.f32 %v5977_v51, %v565_v50  ;;  %v1857_v51 = vsel %vm201_vm1, %v6541_v9, -inf  ;;  %v6563_v50 = vsel %vm551_vm10, %v2802_v19, -1e+30 }
 0x309   :  { %8013 = vst [vmem:[#allocation55_spill] sm:$0xff] %v6563_v50  ;;  %v2832_v36 = vsel %vm201_vm1, %v6563_v50, -inf }
 0x30a   :  { %v594_v21 = vmul.f32 1.442695, %v585_v1 }
 0x30b   :  { %v6537_v46 = vpop.xlane.xlu0 %862  ;;  %1533 = vmax.xlane.f32.xlu1 %v1532_v55 }
 0x30c   :  { %5097 = vpow2.f32 %v594_v21 }
 0x30f   :  { %v1188_v2 = vpop.xlane.xlu0 %1187  ;;  %1858 = vmax.xlane.f32.xlu1 %v1857_v51 }
 0x310   :  { %v1210_v45 = vsub.f32 %v5998_v23, %v1188_v2 }
 0x312   :  { %v1218_v51 = vmul.f32 1.442695, %v1210_v45 }
 0x313   :  { %v6553_v35 = vpop.xlane.xlu0 %1512  ;;  %2183 = vmax.xlane.f32.xlu1 %v2182_v0 }
 0x314   :  { %5099 = vpow2.f32 %v1218_v51 }
 0x317   :  { %v1838_v10 = vpop.xlane.xlu0 %1837  ;;  %2508 = vmax.xlane.f32.xlu1 %v2507_v44 }
 0x318   :  { %v1860_v40 = vsub.f32 %v6022_v54, %v1838_v10 }
 0x319   :  { %v5098_v37 = vpop.eup %5097 }
 0x31a   :  { %v6568_v1 = vmul.f32 %v5098_v37, %v5947_v32  ;;  %v1868_v37 = vmul.f32 1.442695, %v1860_v40 }
 0x31b   :  { %v2163_v30 = vpop.xlane.xlu0 %2162  ;;  %2833 = vmax.xlane.f32.xlu1 %v2832_v36 }
 0x31c   :  { %v619_v21 = vsel %vm201_vm1, %v6568_v1, 0.0  ;;  %v2185_v36 = vsub.f32 %v6032_v33, %v2163_v30 }
 0x31e   :  { %v2193_v45 = vmul.f32 1.442695, %v2185_v36 }
 0x31f   :  { %v6572_v55 = vpop.xlane.xlu0 %2487  ;;  %620 = vadd.xlane.f32.xlu1 %v619_v21 }
 0x323   :  { %v6574_v29 = vpop.xlane.xlu0 %2812 }
 0x327   :  { %v6577_v16 = vpop.xlane.xlu0 %567 }
 0x328   :  { %v866_v5 = vpop.xlane.xlu1 %865 }
 0x329   :  { %v886_v0 = vsub.f32 %v6076_v12, %v866_v5 }
 0x32b   :  { %v895_v19 = vmul.f32 1.442695, %v886_v0  ;;  %v6581_v44 = vpop.xlane.xlu0 %868 }
 0x32c   :  { %v1191_v21 = vpop.xlane.xlu1 %1190 }
 0x32d   :  { %5101 = vpow2.f32 %v895_v19  ;;  %v1211_v32 = vsub.f32 %v6094_v31, %v1191_v21  ;;  %v5100_v31 = vpop.eup %5099 }
 0x32e   :  { %5103 = vpow2.f32 %v1868_v37 }
 0x32f   :  { %v1220_v23 = vmul.f32 1.442695, %v1211_v32  ;;  %v6585_v2 = vpop.xlane.xlu0 %1193 }
 0x330   :  { %v1516_v54 = vpop.xlane.xlu1 %1515 }
 0x331   :  { %5105 = vpow2.f32 %v1220_v23  ;;  %v1536_v12 = vsub.f32 %v6114_v15, %v1516_v54  ;;  %v5433_v15 = vld [vmem:[%s7860_s1 + $0x8] sm:$0xff] }
 0x332   :  { %5107 = vpow2.f32 %v2193_v45 }
 0x333   :  { %v1545_v10 = vmul.f32 1.442695, %v1536_v12  ;;  %v6588_v5 = vpop.xlane.xlu0 %1518 }
 0x334   :  { %v1841_v51 = vpop.xlane.xlu1 %1840 }
 0x335   :  { %5109 = vpow2.f32 %v1545_v10  ;;  %v1861_v33 = vsub.f32 %v6132_v17, %v1841_v51 }
 0x337   :  { %v1870_v30 = vmul.f32 1.442695, %v1861_v33  ;;  %v6591_v40 = vpop.xlane.xlu0 %1843  ;;  %v8015_v33 = vld [vmem:[#allocation22_spill] sm:$0xff] }
 0x338   :  { %v2166_v32 = vpop.xlane.xlu1 %2165 }
 0x339   :  { %5111 = vpow2.f32 %v1870_v30  ;;  %v2186_v0 = vsub.f32 %v6148_v60, %v2166_v32  ;;  %v6608_v60 = vld [vmem:[%s7860_s1] sm:$0xff]  ;;  %v885_v30 = vsub.f32 %v8015_v33, %v6537_v46 }
 0x33a   :  { %v5102_v19 = vpop.eup %5101  ;;  %v6611_v54 = vmul.f32 %v6608_v60, %v5100_v31  ;;  %v8018_v46 = vld [vmem:[#allocation23_spill] sm:$0xff] }
 0x33b   :  { %v2195_v37 = vmul.f32 1.442695, %v2186_v0  ;;  %v6594_v36 = vpop.xlane.xlu0 %2168  ;;  %v6599_v21 = vmul.f32 %v5433_v15, %v5102_v19  ;;  %v5104_v17 = vpop.eup %5103  ;;  %v893_v50 = vmul.f32 1.442695, %v885_v30  ;;  %v1535_v33 = vsub.f32 %v8018_v46, %v6553_v35 }
 0x33c   :  { %v6601_v23 = vpop.xlane.xlu1 %2490  ;;  %v6626_v31 = vmul.f32 %v6608_v60, %v5104_v17 }
 0x33d   :  { %5113 = vpow2.f32 %v2195_v37  ;;  %v920_v45 = vsel %vm201_vm1, %v6599_v21, 0.0  ;;  %v1242_v37 = vsel %vm201_vm1, %v6611_v54, 0.0  ;;  %v1543_v35 = vmul.f32 1.442695, %v1535_v33 }
 0x33e   :  { %v5106_v12 = vpop.eup %5105  ;;  %921 = vadd.xlane.f32.xlu1 %v920_v45  ;;  %8017 = vst [vmem:[#allocation57_spill] sm:$0xff] %v6626_v31  ;;  %v1892_v17 = vsel %vm201_vm1, %v6626_v31, 0.0  ;;  %5115 = vpow2.f32 %v893_v50 }
 0x33f   :  { %v6613_v10 = vpop.xlane.xlu0 %2493  ;;  %v6615_v51 = vmul.f32 %v5433_v15, %v5106_v12  ;;  %v5108_v0 = vpop.eup %5107 }
 0x340   :  { %v6619_v32 = vpop.xlane.xlu1 %2815 }
 0x341   :  { %8014 = vst [vmem:[#allocation56_spill] sm:$0xff] %v6615_v51  ;;  %8016 = vst [vmem:[#allocation22_spill] sm:$0xff] %v6619_v32  ;;  %v1245_v19 = vsel %vm201_vm1, %v6615_v51, 0.0 }
 0x342   :  { %v5110_v45 = vpop.eup %5109  ;;  %1246 = vadd.xlane.f32.xlu0 %v1245_v19  ;;  %1243 = vadd.xlane.f32.xlu1 %v1242_v37  ;;  %v6640_v19 = vmul.f32 %v6608_v60, %v5108_v0 }
 0x343   :  { %v6628_v12 = vmul.f32 %v5433_v15, %v5110_v45  ;;  %v6632_v25 = vpop.xlane.xlu0 %2818 }
 0x344   :  { %v562_v13 = vpop.xlane.xlu1 %561  ;;  %8019 = vst [vmem:[#allocation23_spill] sm:$0xff] %v6632_v25  ;;  %8020 = vst [vmem:[#allocation58_spill] sm:$0xff] %v6640_v19  ;;  %v2217_v0 = vsel %vm201_vm1, %v6640_v19, 0.0 }
 0x345   :  { %v584_v38 = vsub.f32 %v6214_v18, %v562_v13  ;;  %v1570_v7 = vsel %vm201_vm1, %v6628_v12, 0.0  ;;  %v1212_v18 = vsub.f32 %v6108_v42, %v6585_v2  ;;  %v8023_v2 = vld [vmem:[#allocation29_spill] sm:$0xff] }
 0x346   :  { %v5112_v37 = vpop.eup %5111  ;;  %1571 = vadd.xlane.f32.xlu0 %v1570_v7  ;;  %1893 = vadd.xlane.f32.xlu1 %v1892_v17  ;;  %v1537_v17 = vsub.f32 %v8023_v2, %v6588_v5  ;;  %v8025_v2 = vld [vmem:[#allocation28_spill] sm:$0xff] }
 0x347   :  { %v592_v30 = vmul.f32 1.442695, %v584_v38  ;;  %v6642_v45 = vmul.f32 %v5433_v15, %v5112_v37  ;;  %v6651_v38 = vpop.xlane.xlu0 %573  ;;  %v1222_v42 = vmul.f32 1.442695, %v1212_v18 }
 0x348   :  { %v571_v13 = vpop.xlane.xlu1 %570 }
 0x349   :  { %8021 = vst [vmem:[#allocation59_spill] sm:$0xff] %v6642_v45  ;;  %5117 = vpow2.f32 %v592_v30  ;;  %v587_v46 = vsub.f32 %v6232_v56, %v571_v13  ;;  %v1895_v31 = vsel %vm201_vm1, %v6642_v45, 0.0  ;;  %v8024_v13 = vld [vmem:[#allocation27_spill] sm:$0xff] }
 0x34a   :  { %v5114_v7 = vpop.eup %5113  ;;  %1896 = vadd.xlane.f32.xlu0 %v1895_v31  ;;  %2218 = vadd.xlane.f32.xlu1 %v2217_v0  ;;  %5119 = vpow2.f32 %v1543_v35  ;;  %v586_v0 = vsub.f32 %v8024_v13, %v6577_v16 }
 0x34b   :  { %v598_v50 = vmul.f32 1.442695, %v587_v46  ;;  %v6653_v33 = vmul.f32 %v5433_v15, %v5114_v7  ;;  %v1547_v15 = vmul.f32 1.442695, %v1537_v17  ;;  %v6662_v35 = vpop.xlane.xlu0 %874 }
 0x34c   :  { %v872_v56 = vpop.xlane.xlu1 %871  ;;  %v596_v7 = vmul.f32 1.442695, %v586_v0 }
 0x34d   :  { %8022 = vst [vmem:[#allocation60_spill] sm:$0xff] %v6653_v33  ;;  %5121 = vpow2.f32 %v598_v50  ;;  %v888_v37 = vsub.f32 %v6250_v58, %v872_v56  ;;  %v2220_v30 = vsel %vm201_vm1, %v6653_v33, 0.0  ;;  %v5116_v50 = vpop.eup %5115  ;;  %v887_v56 = vsub.f32 %v8025_v2, %v6581_v44 }
 0x34e   :  { %2221 = vadd.xlane.f32.xlu0 %v2220_v30  ;;  %5123 = vpow2.f32 %v1222_v42  ;;  %v6676_v44 = vmul.f32 %v6608_v60, %v5116_v50 }
 0x34f   :  { %v899_v31 = vmul.f32 1.442695, %v888_v37  ;;  %v1200_v42 = vpop.xlane.xlu0 %1199  ;;  %v897_v13 = vmul.f32 1.442695, %v887_v56 }
 0x350   :  { %v1197_v46 = vpop.xlane.xlu1 %1196 }
 0x351   :  { %5125 = vpow2.f32 %v899_v31  ;;  %v1213_v5 = vsub.f32 %v6266_v63, %v1197_v46 }
 0x352   :  { %5127 = vpow2.f32 %v1547_v15 }
 0x353   :  { %v1224_v18 = vmul.f32 1.442695, %v1213_v5 }
 0x354   :  { %v1522_v58 = vpop.xlane.xlu1 %1521 }
 0x355   :  { %5129 = vpow2.f32 %v1224_v18  ;;  %v1538_v37 = vsub.f32 %v6284_v3, %v1522_v58  ;;  %v1525_v18 = vpop.xlane.xlu0 %1524 }
 0x356   :  { %v5118_v16 = vpop.eup %5117  ;;  %5131 = vpow2.f32 %v596_v7  ;;  %v917_v7 = vsel %vm201_vm1, %v6676_v44, 0.0 }
 0x357   :  { %v1549_v17 = vmul.f32 1.442695, %v1538_v37  ;;  %v6669_v30 = vmul.f32 %v6608_v60, %v5118_v16  ;;  %v5120_v63 = vpop.eup %5119 }
 0x358   :  { %v6671_v31 = vpop.xlane.xlu1 %1846  ;;  %v6688_v2 = vmul.f32 %v6608_v60, %v5120_v63  ;;  %v6702_v63 = vld [vmem:[%s7860_s1 + $0x10] sm:$0xff] }
 0x359   :  { %5133 = vpow2.f32 %v1549_v17  ;;  %v616_v0 = vsel %vm201_vm1, %v6669_v30, 0.0 }
 0x35a   :  { %v5122_v15 = vpop.eup %5121  ;;  %617 = vadd.xlane.f32.xlu0 %v616_v0  ;;  %5135 = vpow2.f32 %v897_v13  ;;  %v1567_v17 = vsel %vm201_vm1, %v6688_v2, 0.0 }
 0x35b   :  { %v6679_v3 = vmul.f32 %v5122_v15, %v6194_v43  ;;  %v5124_v5 = vpop.eup %5123 }
 0x35c   :  { %v6681_v46 = vpop.xlane.xlu1 %2171  ;;  %v6705_v0 = vmul.f32 %v6702_v63, %v5124_v5 }
 0x35d   :  { %v625_v58 = vsel %vm201_vm1, %v6679_v3, 0.0 }
 0x35e   :  { %v5126_v50 = vpop.eup %5125  ;;  %918 = vadd.xlane.f32.xlu0 %v917_v7  ;;  %626 = vadd.xlane.f32.xlu1 %v625_v58  ;;  %8027 = vst [vmem:[#allocation27_spill] sm:$0xff] %v6705_v0  ;;  %v6707_v7 = vpop.xlane.xlu0 %1849  ;;  %v1248_v33 = vsel %vm201_vm1, %v6705_v0, 0.0 }
 0x35f   :  { %v6691_v56 = vmul.f32 %v5126_v50, %v6194_v43  ;;  %v5128_v16 = vpop.eup %5127 }
 0x360   :  { %v6693_v37 = vpop.xlane.xlu1 %2496  ;;  %v6719_v5 = vmul.f32 %v6702_v63, %v5128_v16 }
 0x361   :  { %8026 = vst [vmem:[#allocation29_spill] sm:$0xff] %v6693_v37  ;;  %v926_v13 = vsel %vm201_vm1, %v6691_v56, 0.0 }
 0x362   :  { %v5130_v15 = vpop.eup %5129  ;;  %1568 = vadd.xlane.f32.xlu0 %v1567_v17  ;;  %927 = vadd.xlane.f32.xlu1 %v926_v13  ;;  %v1214_v13 = vsub.f32 %v6260_v47, %v1200_v42  ;;  %v1573_v0 = vsel %vm201_vm1, %v6719_v5, 0.0  ;;  %v1539_v47 = vsub.f32 %v6278_v48, %v1525_v18 }
 0x363   :  { %v6710_v58 = vmul.f32 %v5130_v15, %v6194_v43  ;;  %v5132_v45 = vpop.eup %5131 }
 0x364   :  { %v6712_v50 = vpop.xlane.xlu1 %2821 }
 0x365   :  { %8028 = vst [vmem:[#allocation28_spill] sm:$0xff] %v6710_v58  ;;  %8029 = vst [vmem:[#allocation61_spill] sm:$0xff] %v6712_v50  ;;  %v1251_v37 = vsel %vm201_vm1, %v6710_v58, 0.0  ;;  %v6725_v50 = vpop.xlane.xlu0 %2174  ;;  %v6733_v58 = vmul.f32 %v6702_v63, %v5132_v45 }
 0x366   :  { %v5134_v51 = vpop.eup %5133  ;;  %1249 = vadd.xlane.f32.xlu1 %v1248_v33  ;;  %1252 = vadd.xlane.f32.xlu0 %v1251_v37  ;;  %v1226_v37 = vmul.f32 1.442695, %v1214_v13 }
 0x367   :  { %v6722_v17 = vmul.f32 %v5134_v51, %v6194_v43  ;;  %v5136_v33 = vpop.eup %5135 }
 0x368   :  { %v577_v15 = vpop.xlane.xlu1 %576  ;;  %v6740_v43 = vmul.f32 %v6702_v63, %v5136_v33 }
 0x369   :  { %v589_v19 = vsub.f32 %v6380_v26, %v577_v15  ;;  %v1576_v16 = vsel %vm201_vm1, %v6722_v17, 0.0  ;;  %v622_v15 = vsel %vm201_vm1, %v6733_v58, 0.0  ;;  %v6742_v45 = vpop.xlane.xlu0 %2499 }
 0x36a   :  { %1574 = vadd.xlane.f32.xlu1 %v1573_v0  ;;  %1577 = vadd.xlane.f32.xlu0 %v1576_v16  ;;  %8030 = vst [vmem:[#allocation62_spill] sm:$0xff] %v6742_v45  ;;  %v1551_v0 = vmul.f32 1.442695, %v1539_v47 }
 0x36b   :  { %v602_v51 = vmul.f32 1.442695, %v589_v19  ;;  %v588_v19 = vsub.f32 %v6226_v20, %v6651_v38 }
 0x36c   :  { %v878_v42 = vpop.xlane.xlu1 %877 }
 0x36d   :  { %5137 = vpow2.f32 %v602_v51  ;;  %v890_v26 = vsub.f32 %v6396_v61, %v878_v42  ;;  %v923_v61 = vsel %vm201_vm1, %v6740_v43, 0.0  ;;  %v600_v16 = vmul.f32 1.442695, %v588_v19  ;;  %v8031_v51 = vld [vmem:[#allocation38_spill] sm:$0xff] }
 0x36e   :  { %623 = vadd.xlane.f32.xlu0 %v622_v15  ;;  %5139 = vpow2.f32 %v1226_v37  ;;  %v889_v42 = vsub.f32 %v8031_v51, %v6662_v35 }
 0x36f   :  { %v903_v32 = vmul.f32 1.442695, %v890_v26  ;;  %v6751_v26 = vpop.xlane.xlu0 %2824 }
 0x370   :  { %v1203_v48 = vpop.xlane.xlu1 %1202  ;;  %8032 = vst [vmem:[#allocation38_spill] sm:$0xff] %v6751_v26 }
 0x371   :  { %5141 = vpow2.f32 %v903_v32  ;;  %v1215_v18 = vsub.f32 %v6408_v39, %v1203_v48  ;;  %v901_v39 = vmul.f32 1.442695, %v889_v42 }
 0x372   :  { %924 = vadd.xlane.f32.xlu0 %v923_v61  ;;  %5143 = vpow2.f32 %v1551_v0 }
 0x373   :  { %v1228_v13 = vmul.f32 1.442695, %v1215_v18  ;;  %v580_v47 = vpop.xlane.xlu0 %579 }
 0x374   :  { %v1528_v33 = vpop.xlane.xlu1 %1527  ;;  %v590_v25 = vsub.f32 %v6376_v41, %v580_v47 }
 0x375   :  { %5145 = vpow2.f32 %v1228_v13  ;;  %v1540_v20 = vsub.f32 %v6416_v24, %v1528_v33  ;;  %v6773_v33 = vld [vmem:[%s7860_s1 + $0x20] sm:$0xff] }
 0x376   :  { %5147 = vpow2.f32 %v600_v16  ;;  %8034 = vst [vmem:[#allocation64_spill] sm:$0xff] %v6773_v33 }
 0x377   :  { %v1553_v38 = vmul.f32 1.442695, %v1540_v20  ;;  %v881_v13 = vpop.xlane.xlu0 %880 }
 0x378   :  { %v6754_v32 = vpop.xlane.xlu1 %1852 }
 0x379   :  { %5149 = vpow2.f32 %v1553_v38 }
 0x37a   :  { %v5138_v37 = vpop.eup %5137  ;;  %5151 = vpow2.f32 %v901_v39 }
 0x37b   :  { %v6757_v15 = vmul.f32 %v5138_v37, %v6350_v14  ;;  %v5140_v0 = vpop.eup %5139  ;;  %v1206_v37 = vpop.xlane.xlu0 %1205 }
 0x37c   :  { %v6759_v19 = vpop.xlane.xlu1 %2177  ;;  %v6776_v51 = vmul.f32 %v6773_v33, %v5140_v0 }
 0x37d   :  { %v631_v35 = vsel %vm201_vm1, %v6757_v15, 0.0 }
 0x37e   :  { %v5142_v48 = vpop.eup %5141  ;;  %632 = vadd.xlane.f32.xlu1 %v631_v35  ;;  %8035 = vst [vmem:[#allocation65_spill] sm:$0xff] %v6776_v51  ;;  %v1254_v35 = vsel %vm201_vm1, %v6776_v51, 0.0 }
 0x37f   :  { %v6764_v24 = vmul.f32 %v5142_v48, %v6350_v14  ;;  %v5144_v61 = vpop.eup %5143 }
 0x380   :  { %v6766_v18 = vpop.xlane.xlu1 %2502 }
 0x381   :  { %8033 = vst [vmem:[#allocation63_spill] sm:$0xff] %v6766_v18  ;;  %v932_v16 = vsel %vm201_vm1, %v6764_v24, 0.0  ;;  %v6788_v18 = vmul.f32 %v6773_v33, %v5144_v61 }
 0x382   :  { %v5146_v42 = vpop.eup %5145  ;;  %933 = vadd.xlane.f32.xlu1 %v932_v16 }
 0x383   :  { %v6779_v20 = vmul.f32 %v5146_v42, %v6350_v14  ;;  %v5148_v39 = vpop.eup %5147  ;;  %v1216_v42 = vsub.f32 %v6432_v6, %v1206_v37  ;;  %v1579_v51 = vsel %vm201_vm1, %v6788_v18, 0.0 }
 0x384   :  { %v6781_v38 = vpop.xlane.xlu1 %2827  ;;  %v6800_v61 = vmul.f32 %v6773_v33, %v5148_v39  ;;  %v8039_v39 = vld [vmem:[#allocation31_spill] sm:$0xff] }
 0x385   :  { %8036 = vst [vmem:[#allocation66_spill] sm:$0xff] %v6779_v20  ;;  %8037 = vst [vmem:[#allocation67_spill] sm:$0xff] %v6781_v38  ;;  %v1257_v48 = vsel %vm201_vm1, %v6779_v20, 0.0  ;;  %v1230_v6 = vmul.f32 1.442695, %v1216_v42 }
 0x386   :  { %v5150_v0 = vpop.eup %5149  ;;  %1255 = vadd.xlane.f32.xlu1 %v1254_v35  ;;  %1258 = vadd.xlane.f32.xlu0 %v1257_v48  ;;  %v8038_v48 = vld [vmem:[#allocation30_spill] sm:$0xff] }
 0x387   :  { %v6791_v16 = vmul.f32 %v5150_v0, %v6350_v14  ;;  %v5152_v45 = vpop.eup %5151  ;;  %v1862_v0 = vsub.f32 %v8038_v48, %v6591_v40  ;;  %v604_v48 = vmul.f32 1.442695, %v590_v25 }
 0x388   :  { %v583_v38 = vpop.xlane.xlu1 %582  ;;  %v6808_v14 = vmul.f32 %v6773_v33, %v5152_v45 }
 0x389   :  { %v591_v26 = vsub.f32 %v6488_v8, %v583_v38  ;;  %v1582_v20 = vsel %vm201_vm1, %v6791_v16, 0.0  ;;  %v628_v38 = vsel %vm201_vm1, %v6800_v61, 0.0 }
 0x38a   :  { %1580 = vadd.xlane.f32.xlu1 %v1579_v51  ;;  %1583 = vadd.xlane.f32.xlu0 %v1582_v20  ;;  %v2187_v51 = vsub.f32 %v8039_v39, %v6594_v36  ;;  %v891_v36 = vsub.f32 %v6392_v52, %v881_v13 }
 0x38b   :  { %v606_v35 = vmul.f32 1.442695, %v591_v26  ;;  %v1872_v26 = vmul.f32 1.442695, %v1862_v0 }
 0x38c   :  { %v884_v37 = vpop.xlane.xlu1 %883  ;;  %v905_v47 = vmul.f32 1.442695, %v891_v36 }
 0x38d   :  { %5153 = vpow2.f32 %v606_v35  ;;  %v892_v8 = vsub.f32 %v6506_v34, %v884_v37  ;;  %v929_v34 = vsel %vm201_vm1, %v6808_v14, 0.0  ;;  %v2197_v35 = vmul.f32 1.442695, %v2187_v51 }
 0x38e   :  { %629 = vadd.xlane.f32.xlu0 %v628_v38  ;;  %5155 = vpow2.f32 %v1230_v6 }
 0x38f   :  { %v907_v20 = vmul.f32 1.442695, %v892_v8 }
 0x390   :  { %v1209_v40 = vpop.xlane.xlu1 %1208 }
 0x391   :  { %5157 = vpow2.f32 %v907_v20  ;;  %v1217_v42 = vsub.f32 %v6520_v28, %v1209_v40 }
 0x392   :  { %930 = vadd.xlane.f32.xlu0 %v929_v34  ;;  %5159 = vpow2.f32 %v1872_v26 }
 0x393   :  { %v1232_v45 = vmul.f32 1.442695, %v1217_v42 }
 0x394   :  { %v1534_v37 = vpop.xlane.xlu1 %1533 }
 0x395   :  { %5161 = vpow2.f32 %v1232_v45  ;;  %v1542_v0 = vsub.f32 %v6530_v53, %v1534_v37 }
 0x396   :  { %5163 = vpow2.f32 %v2197_v35 }
 0x397   :  { %v1557_v41 = vmul.f32 1.442695, %v1542_v0  ;;  %5165 = vpow2.f32 %v604_v48 }
 0x399   :  { %5167 = vpow2.f32 %v1557_v41 }
 0x39a   :  { %v5154_v28 = vpop.eup %5153  ;;  %5169 = vpow2.f32 %v905_v47 }
 0x39b   :  { %v6819_v6 = vmul.f32 %v5154_v28, %v6454_v49  ;;  %v5156_v8 = vpop.eup %5155 }
 0x39c   :  { %v6829_v39 = vmul.f32 %v5156_v8, %v6341_v11 }
 0x39d   :  { %v637_v25 = vsel %vm201_vm1, %v6819_v6, 0.0 }
 0x39e   :  { %v5158_v38 = vpop.eup %5157  ;;  %638 = vadd.xlane.f32.xlu1 %v637_v25  ;;  %8040 = vst [vmem:[#allocation30_spill] sm:$0xff] %v6829_v39  ;;  %v1260_v42 = vsel %vm201_vm1, %v6829_v39, 0.0 }
 0x39f   :  { %v6824_v52 = vmul.f32 %v5158_v38, %v6454_v49  ;;  %v5160_v53 = vpop.eup %5159  ;;  %v1531_v38 = vpop.xlane.xlu0 %1530 }
 0x3a0   :  { %v6839_v35 = vmul.f32 %v6702_v63, %v5160_v53 }
 0x3a1   :  { %v938_v13 = vsel %vm201_vm1, %v6824_v52, 0.0 }
 0x3a2   :  { %v5162_v51 = vpop.eup %5161  ;;  %939 = vadd.xlane.f32.xlu1 %v938_v13  ;;  %8042 = vst [vmem:[#allocation68_spill] sm:$0xff] %v6839_v35  ;;  %v1898_v37 = vsel %vm201_vm1, %v6839_v35, 0.0  ;;  %v8050_v35 = vld [vmem:[#allocation40_spill] sm:$0xff] }
 0x3a3   :  { %v6832_v20 = vmul.f32 %v5162_v51, %v6454_v49  ;;  %v5164_v26 = vpop.eup %5163  ;;  %v6863_v13 = vpop.xlane.xlu0 %1855 }
 0x3a4   :  { %v5166_v40 = vpop.eup %5165  ;;  %v6849_v0 = vmul.f32 %v6702_v63, %v5164_v26  ;;  %v8044_v26 = vld [vmem:[#allocation5_spill] sm:$0xff] }
 0x3a5   :  { %8041 = vst [vmem:[#allocation31_spill] sm:$0xff] %v6832_v20  ;;  %v1263_v34 = vsel %vm201_vm1, %v6832_v20, 0.0  ;;  %v6852_v41 = vmul.f32 %v5166_v40, %v6341_v11  ;;  %v6869_v40 = vpop.xlane.xlu1 %1858 }
 0x3a6   :  { %v5168_v45 = vpop.eup %5167  ;;  %1261 = vadd.xlane.f32.xlu1 %v1260_v42  ;;  %1264 = vadd.xlane.f32.xlu0 %v1263_v34  ;;  %8043 = vst [vmem:[#allocation69_spill] sm:$0xff] %v6849_v0  ;;  %v2223_v28 = vsel %vm201_vm1, %v6849_v0, 0.0  ;;  %v8046_v34 = vld [vmem:[#allocation6_spill] sm:$0xff]  ;;  %v2189_v0 = vsub.f32 %v8050_v35, %v6725_v50 }
 0x3a7   :  { %v6842_v48 = vmul.f32 %v5168_v45, %v6454_v49  ;;  %v5170_v47 = vpop.eup %5169  ;;  %v634_v8 = vsel %vm201_vm1, %v6852_v41, 0.0  ;;  %v6865_v51 = vpop.xlane.xlu0 %2180 }
 0x3a8   :  { %v6859_v25 = vmul.f32 %v5170_v47, %v6341_v11  ;;  %v1541_v47 = vsub.f32 %v6449_v59, %v1531_v38  ;;  %v2201_v39 = vmul.f32 1.442695, %v2189_v0 }
 0x3a9   :  { %v1588_v36 = vsel %vm201_vm1, %v6842_v48, 0.0  ;;  %v6875_v45 = vpop.xlane.xlu1 %2183 }
 0x3aa   :  { %1899 = vadd.xlane.f32.xlu1 %v1898_v37  ;;  %1589 = vadd.xlane.f32.xlu0 %v1588_v36  ;;  %v935_v53 = vsel %vm201_vm1, %v6859_v25, 0.0  ;;  %v1864_v37 = vsub.f32 %v6296_v22, %v6707_v7  ;;  %v8051_v22 = vld [vmem:[#allocation41_spill] sm:$0xff] }
 0x3ab   :  { %v6871_v42 = vpop.xlane.xlu0 %2505  ;;  %v2188_v7 = vsub.f32 %v8051_v22, %v6681_v46 }
 0x3ac   :  { %8045 = vst [vmem:[#allocation5_spill] sm:$0xff] %v6871_v42  ;;  %v1555_v42 = vmul.f32 1.442695, %v1541_v47 }
 0x3ae   :  { %2224 = vadd.xlane.f32.xlu1 %v2223_v28  ;;  %635 = vadd.xlane.f32.xlu0 %v634_v8  ;;  %v6884_v28 = vpop.xlane.xlu1 %2508  ;;  %v1876_v8 = vmul.f32 1.442695, %v1864_v37 }
 0x3af   :  { %v6881_v36 = vpop.xlane.xlu0 %2830  ;;  %8048 = vst [vmem:[#allocation70_spill] sm:$0xff] %v6884_v28 }
 0x3b0   :  { %8047 = vst [vmem:[#allocation6_spill] sm:$0xff] %v6881_v36  ;;  %5171 = vpow2.f32 %v1876_v8 }
 0x3b1   :  { %5173 = vpow2.f32 %v1555_v42 }
 0x3b2   :  { %936 = vadd.xlane.f32.xlu0 %v935_v53  ;;  %v8049_v53 = vld [vmem:[#allocation39_spill] sm:$0xff]  ;;  %v6894_v59 = vpop.xlane.xlu1 %2833 }
 0x3b3   :  { %v1863_v11 = vsub.f32 %v8049_v53, %v6671_v31  ;;  %8052 = vst [vmem:[#allocation39_spill] sm:$0xff] %v6894_v59  ;;  %v2199_v31 = vmul.f32 1.442695, %v2188_v7 }
 0x3b5   :  { %v1874_v20 = vmul.f32 1.442695, %v1863_v11 }
 0x3b6   :  { %v621_v37 = vpop.xlane.xlu1 %620 }
 0x3b7   :  { %5175 = vpow2.f32 %v1874_v20 }
 0x3b8   :  { %5177 = vpow2.f32 %v2201_v39  ;;  %v6910_v39 = vld [vmem:[%s7860_s1 + $0x30] sm:$0xff] }
 0x3b9   :  { %5179 = vpow2.f32 %v2199_v31 }
 0x3ba   :  { %5181 = vrcp.f32 %v621_v37 }
 0x3bd   :  { %v5172_v35 = vpop.eup %5171 }
 0x3be   :  { %v5174_v47 = vpop.eup %5173  ;;  %v6905_v46 = vmul.f32 %v6773_v33, %v5172_v35 }
 0x3bf   :  { %1613 = vrot.lane.b32.xlu1 %v8044_v26, %s5452_s4  ;;  %v6913_v20 = vmul.f32 %v6910_v39, %v5174_v47 }
 0x3c0   :  { %8055 = vst [vmem:[#allocation71_spill] sm:$0xff] %v6905_v46  ;;  %v1904_v7 = vsel %vm201_vm1, %v6905_v46, 0.0 }
 0x3c1   :  { %v1585_v31 = vsel %vm201_vm1, %v6913_v20, 0.0 }
 0x3c3   :  { %1611 = vrot.lane.b32.xlu1 %v8046_v34, %s5452_s4 }
 0x3c4   :  { %v5176_v0 = vpop.eup %5175 }
 0x3c5   :  { %v5178_v42 = vpop.eup %5177 }
 0x3c6   :  { %v6920_v35 = vmul.f32 %v6773_v33, %v5178_v42  ;;  %v5180_v37 = vpop.eup %5179  ;;  %v8061_v33 = vld [vmem:[#allocation17_spill] sm:$0xff] }
 0x3c7   :  { %v922_v50 = vpop.xlane.xlu1 %921 }
 0x3c8   :  { %1288 = vrot.lane.b32.xlu0 %v8044_v26, %s5451_s3  ;;  %8056 = vst [vmem:[#allocation72_spill] sm:$0xff] %v6920_v35  ;;  %v2229_v42 = vsel %vm201_vm1, %v6920_v35, 0.0 }
 0x3cb   :  { %v6888_v49 = vpop.xlane.xlu0 %1246  ;;  %v6902_v8 = vpop.xlane.xlu1 %1243 }
 0x3cf   :  { %v6896_v38 = vpop.xlane.xlu0 %1571  ;;  %v6930_v46 = vpop.xlane.xlu1 %1893 }
 0x3d3   :  { %v6898_v53 = vpop.xlane.xlu0 %1896 }
 0x3d4   :  { %8053 = vst [vmem:[#allocation40_spill] sm:$0xff] %v6898_v53  ;;  %v6925_v53 = vld [vmem:[%s7860_s1 + $0x18] sm:$0xff] }
 0x3d5   :  { %8057 = vst [vmem:[#allocation73_spill] sm:$0xff] %v6925_v53  ;;  %v6928_v47 = vmul.f32 %v6925_v53, %v5176_v0  ;;  %v6937_v59 = vmul.f32 %v6925_v53, %v5180_v37 }
 0x3d7   :  { %v6900_v11 = vpop.xlane.xlu0 %2221  ;;  %8058 = vst [vmem:[#allocation74_spill] sm:$0xff] %v6928_v47  ;;  %8059 = vst [vmem:[#allocation75_spill] sm:$0xff] %v6937_v59  ;;  %v2226_v0 = vsel %vm201_vm1, %v6937_v59, 0.0 }
 0x3d8   :  { %8054 = vst [vmem:[#allocation41_spill] sm:$0xff] %v6900_v11  ;;  %v1901_v11 = vsel %vm201_vm1, %v6928_v47, 0.0 }
 0x3e3   :  { %v618_v22 = vpop.xlane.xlu0 %617 }
 0x3e4   :  { %5183 = vrcp.f32 %v618_v22 }
 0x3e5   :  { %5185 = vrcp.f32 %v922_v50  ;;  %v6941_v50 = vpop.xlane.xlu1 %2218 }
 0x3e7   :  { %v919_v22 = vpop.xlane.xlu0 %918  ;;  %1905 = vadd.xlane.f32.xlu1 %v1904_v7  ;;  %1586 = vadd.xlane.f32.xlu0 %v1585_v31  ;;  %v5182_v31 = vpop.eup %5181 }
 0x3e8   :  { %5187 = vrcp.f32 %v919_v22  ;;  %v643_v37 = vmul.f32 %v5182_v31, %v6568_v1  ;;  %v8062_v1 = vld [vmem:[#allocation11_spill] sm:$0xff]  ;;  %v8069_v31 = vld [vmem:[#allocation4_spill] sm:$0xff] }
 0x3e9   :  { %v627_v35 = vpop.xlane.xlu1 %626 }
 0x3ea   :  { %5189 = vrcp.f32 %v627_v35  ;;  %v8068_v35 = vld [vmem:[#allocation13_spill] sm:$0xff] }
 0x3eb   :  { %v6939_v36 = vpop.xlane.xlu0 %1568  ;;  %2230 = vadd.xlane.f32.xlu1 %v2229_v42  ;;  %1902 = vadd.xlane.f32.xlu0 %v1901_v11  ;;  %v8060_v42 = vld [vmem:[#allocation15_spill] sm:$0xff] }
 0x3ef   :  { %v6945_v7 = vpop.xlane.xlu0 %1252  ;;  %2227 = vadd.xlane.f32.xlu0 %v2226_v0 }
 0x3f1   :  { %v5184_v22 = vpop.eup %5183 }
 0x3f2   :  { %v641_v47 = vmul.f32 %v5184_v22, %v6669_v30  ;;  %v5186_v53 = vpop.eup %5185  ;;  %v928_v22 = vpop.xlane.xlu1 %927 }
 0x3f3   :  { %v6949_v28 = vpop.xlane.xlu0 %1577  ;;  %v944_v0 = vmul.f32 %v5186_v53, %v6599_v21  ;;  %v8064_v21 = vld [vmem:[#allocation14_spill] sm:$0xff] }
 0x3f4   :  { %4697 = vmatprep.mubr.msk.f32.mxu1 %vm201_vm1, %v641_v47  ;;  %v8063_v47 = vld [vmem:[#allocation16_spill] sm:$0xff] }
 0x3f5   :  { %v5188_v11 = vpop.eup %5187  ;;  %4698 = vmatmul.mubr.msk.f32.vlgmr.msra.gmra.mxu1 %vm201_vm1, %v643_v37 }
 0x3f6   :  { %4738 = vmatpush3.msra.mxu1 %v8060_v42  ;;  %v942_v59 = vmul.f32 %v5188_v11, %v6676_v44  ;;  %v8065_v44 = vld [vmem:[#allocation18_spill] sm:$0xff] }
 0x3f7   :  { %4739 = vmatprep.subr.mxu1 %v8061_v33  ;;  %v624_v30 = vpop.xlane.xlu0 %623  ;;  %v5190_v37 = vpop.eup %5189 }
 0x3f8   :  { %5191 = vrcp.f32 %v624_v30  ;;  %4740 = vmatpush3.msra.mxu1 %v8061_v33  ;;  %4725 = vmatprep.mubr.msk.f32.mxu0 %vm201_vm1, %v942_v59  ;;  %v8066_v33 = vld [vmem:[#allocation3_spill] sm:$0xff]  ;;  %v8067_v59 = vld [vmem:[#allocation12_spill] sm:$0xff]  ;;  %v647_v30 = vmul.f32 %v5190_v37, %v6679_v3 }
 0x3f9   :  { %4741 = vmatprep.subr.mxu1 %v8062_v1  ;;  %4726 = vmatmul.mubr.msk.f32.vlgmr.msra.gmra.mxu0 %vm201_vm1, %v944_v0  ;;  %5193 = vrcp.f32 %v928_v22  ;;  %v6978_v0 = vpop.xlane.xlu1 %1249 }
 0x3fa   :  { %4742 = vmatpush3.msra.mxu1 %v8062_v1  ;;  %4766 = vmatpush3.msra.mxu0 %v8063_v47  ;;  %v1866_v1 = vsub.f32 %v6476_v57, %v6863_v13  ;;  %v2190_v57 = vsub.f32 %v6442_v4, %v6759_v19 }
 0x3fb   :  { %4743 = vmatprep.subr.mxu1 %v8064_v21  ;;  %4767 = vmatprep.subr.mxu0 %v8065_v44  ;;  %v925_v53 = vpop.xlane.xlu0 %924 }
 0x3fc   :  { %5195 = vrcp.f32 %v925_v53  ;;  %4744 = vmatpush3.msra.mxu1 %v8064_v21  ;;  %4768 = vmatpush3.msra.mxu0 %v8065_v44  ;;  %v1880_v3 = vmul.f32 1.442695, %v1866_v1  ;;  %v2203_v37 = vmul.f32 1.442695, %v2190_v57 }
 0x3fd   :  { %1609 = vrot.lane.b32.xlu1 %v8066_v33, %s5452_s4  ;;  %4769 = vmatprep.subr.mxu0 %v8067_v59 }
 0x3fe   :  { %4770 = vmatpush3.msra.mxu0 %v8067_v59  ;;  %v6992_v59 = vpop.xlane.xlu1 %1574  ;;  %5197 = vpow2.f32 %v1880_v3 }
 0x3ff   :  { %4771 = vmatprep.subr.mxu0 %v8068_v35 }
 0x400   :  { %4772 = vmatpush3.msra.mxu0 %v8068_v35 }
 0x401   :  { %1607 = vrot.lane.b32.xlu1 %v8069_v31, %s5452_s4 }
 0x405   :  { %v5192_v11 = vpop.eup %5191  ;;  %1286 = vrot.lane.b32.xlu0 %v8046_v34, %s5451_s3 }
 0x406   :  { %v645_v42 = vmul.f32 %v5192_v11, %v6733_v58  ;;  %v5194_v22 = vpop.eup %5193  ;;  %v8070_v58 = vld [vmem:[#allocation48_spill] sm:$0xff] }
 0x407   :  { %v1865_v44 = vsub.f32 %v8070_v58, %v6754_v32  ;;  %v948_v53 = vmul.f32 %v5194_v22, %v6691_v56 }
 0x408   :  { %4700 = vmatprep.mubr.msk.f32.mxu1 %vm201_vm1, %v645_v42 }
 0x409   :  { %v5196_v47 = vpop.eup %5195  ;;  %1284 = vrot.lane.b32.xlu0 %v8066_v33, %s5451_s3  ;;  %4701 = vmatmul.mubr.msk.f32.gmra.mxu1 %vm201_vm1, %v647_v30  ;;  %v1878_v13 = vmul.f32 1.442695, %v1865_v44 }
 0x40a   :  { %v946_v21 = vmul.f32 %v5196_v47, %v6740_v43  ;;  %v633_v43 = vpop.xlane.xlu1 %632 }
 0x40b   :  { %5199 = vpow2.f32 %v1878_v13  ;;  %v5198_v30 = vpop.eup %5197 }
 0x40c   :  { %4728 = vmatprep.mubr.msk.f32.mxu0 %vm201_vm1, %v946_v21  ;;  %5201 = vpow2.f32 %v2203_v37  ;;  %v7004_v19 = vmul.f32 %v6910_v39, %v5198_v30  ;;  %v7011_v21 = vld [vmem:[%s7860_s1 + $0x28] sm:$0xff] }
 0x40d   :  { %4729 = vmatmul.mubr.msk.f32.gmra.mxu0 %vm201_vm1, %v948_v53  ;;  %5203 = vrcp.f32 %v633_v43 }
 0x40e   :  { %v934_v56 = vpop.xlane.xlu1 %933  ;;  %8071 = vst [vmem:[#allocation15_spill] sm:$0xff] %v7004_v19  ;;  %v1910_v53 = vsel %vm201_vm1, %v7004_v19, 0.0 }
 0x40f   :  { %v6997_v35 = vpop.xlane.xlu0 %1258 }
 0x412   :  { %v7001_v22 = vpop.xlane.xlu1 %1255 }
 0x413   :  { %v6999_v32 = vpop.xlane.xlu0 %1583 }
 0x416   :  { %v7006_v47 = vpop.xlane.xlu1 %1580 }
 0x417   :  { %v630_v11 = vpop.xlane.xlu0 %629 }
 0x418   :  { %5205 = vrcp.f32 %v630_v11  ;;  %v5200_v4 = vpop.eup %5199 }
 0x419   :  { %5207 = vrcp.f32 %v934_v56  ;;  %v5202_v1 = vpop.eup %5201  ;;  %v7014_v58 = vmul.f32 %v7011_v21, %v5200_v4 }
 0x41a   :  { %v5204_v44 = vpop.eup %5203  ;;  %v7023_v56 = vmul.f32 %v7011_v21, %v5202_v1 }
 0x41b   :  { %v931_v42 = vpop.xlane.xlu0 %930  ;;  %8072 = vst [vmem:[#allocation17_spill] sm:$0xff] %v7014_v58  ;;  %v1907_v43 = vsel %vm201_vm1, %v7014_v58, 0.0  ;;  %v651_v37 = vmul.f32 %v5204_v44, %v6757_v15 }
 0x41c   :  { %5209 = vrcp.f32 %v931_v42  ;;  %8073 = vst [vmem:[#allocation11_spill] sm:$0xff] %v7023_v56 }
 0x41d   :  { %5211 = vrcp.f32 %v6902_v8 }
 0x425   :  { %v5206_v3 = vpop.eup %5205  ;;  %1911 = vadd.xlane.f32.xlu1 %v1910_v53 }
 0x426   :  { %v649_v57 = vmul.f32 %v5206_v3, %v6800_v61  ;;  %v5208_v11 = vpop.eup %5207  ;;  %v2232_v61 = vsel %vm201_vm1, %v7023_v56, 0.0 }
 0x427   :  { %v639_v13 = vpop.xlane.xlu1 %638  ;;  %v952_v53 = vmul.f32 %v5208_v11, %v6764_v24 }
 0x428   :  { %1908 = vadd.xlane.f32.xlu0 %v1907_v43  ;;  %4703 = vmatprep.mubr.msk.f32.mxu1 %vm201_vm1, %v649_v57  ;;  %5213 = vrcp.f32 %v639_v13  ;;  %v8076_v43 = vld [vmem:[#allocation10_spill] sm:$0xff] }
 0x429   :  { %v5210_v42 = vpop.eup %5209  ;;  %4704 = vmatmul.mubr.msk.f32.gmra.mxu1 %vm201_vm1, %v651_v37 }
 0x42a   :  { %v950_v30 = vmul.f32 %v5210_v42, %v6808_v14  ;;  %v8075_v14 = vld [vmem:[#allocation9_spill] sm:$0xff] }
 0x42b   :  { %v940_v4 = vpop.xlane.xlu1 %939 }
 0x42c   :  { %2233 = vadd.xlane.f32.xlu0 %v2232_v61  ;;  %4731 = vmatprep.mubr.msk.f32.mxu0 %vm201_vm1, %v950_v30  ;;  %v1867_v30 = vsub.f32 %v6541_v9, %v6869_v40  ;;  %v8077_v61 = vld [vmem:[#allocation24_spill] sm:$0xff]  ;;  %v8078_v40 = vld [vmem:[#allocation26_spill] sm:$0xff] }
 0x42d   :  { %4732 = vmatmul.mubr.msk.f32.gmra.mxu0 %vm201_vm1, %v952_v53  ;;  %v2510_v53 = vsub.f32 %v8077_v61, %v6572_v55  ;;  %v2835_v56 = vsub.f32 %v8078_v40, %v6574_v29 }
 0x42f   :  { %v7033_v15 = vpop.xlane.xlu0 %1264  ;;  %v7035_v1 = vpop.xlane.xlu1 %1261  ;;  %v2518_v9 = vmul.f32 1.442695, %v2510_v53 }
 0x433   :  { %v7037_v44 = vpop.xlane.xlu0 %1589  ;;  %v7039_v3 = vpop.xlane.xlu1 %1899 }
 0x434   :  { %8074 = vst [vmem:[#allocation16_spill] sm:$0xff] %v7039_v3 }
 0x436   :  { %1946 = vrot.lane.b32.xlu1 %v8075_v14, %s5461_s13 }
 0x437   :  { %v636_v24 = vpop.xlane.xlu0 %635  ;;  %v7044_v57 = vpop.xlane.xlu1 %2224 }
 0x438   :  { %5215 = vrcp.f32 %v636_v24 }
 0x439   :  { %5217 = vrcp.f32 %v6939_v36  ;;  %v5212_v36 = vpop.eup %5211 }
 0x43a   :  { %1944 = vrot.lane.b32.xlu1 %v8076_v43, %s5461_s13  ;;  %5219 = vrcp.f32 %v940_v4  ;;  %v5214_v42 = vpop.eup %5213  ;;  %v1267_v58 = vmul.f32 %v5212_v36, %v6611_v54 }
 0x43b   :  { %v937_v37 = vpop.xlane.xlu0 %936  ;;  %v1614_v11 = vpop.permute.xlu1 %1613 }
 0x43c   :  { %5221 = vrcp.f32 %v937_v37  ;;  %4773 = vmatprep.subr.mxu0 %v1614_v11 }
 0x43d   :  { %4774 = vmatpush3.msra.mxu0 %v1614_v11  ;;  %v655_v11 = vmul.f32 %v5214_v42, %v6819_v6 }
 0x43e   :  { %2269 = vrot.lane.b32.xlu1 %v8076_v43, %s5462_s14 }
 0x43f   :  { %v1289_v8 = vpop.permute.xlu0 %1288  ;;  %v1612_v13 = vpop.permute.xlu1 %1611 }
 0x440   :  { %4745 = vmatprep.subr.mxu1 %v1289_v8  ;;  %4775 = vmatprep.subr.mxu0 %v1612_v13 }
 0x441   :  { %4746 = vmatpush3.msra.mxu1 %v1289_v8  ;;  %4776 = vmatpush3.msra.mxu0 %v1612_v13  ;;  %v2191_v8 = vsub.f32 %v6494_v27, %v6865_v51  ;;  %v1882_v13 = vmul.f32 1.442695, %v1867_v30  ;;  %v2192_v27 = vsub.f32 %v6549_v62, %v6875_v45  ;;  %v2843_v51 = vmul.f32 1.442695, %v2835_v56  ;;  %v7078_v62 = vld [vmem:[%s7860_s1 + $0x38] sm:$0xff] }
 0x442   :  { %1282 = vrot.lane.b32.xlu0 %v8069_v31, %s5451_s3 }
 0x443   :  { %5223 = vpow2.f32 %v1882_v13  ;;  %v2207_v29 = vmul.f32 1.442695, %v2192_v27  ;;  %v8079_v13 = vld [vmem:[#allocation7_spill] sm:$0xff] }
 0x444   :  { %5225 = vpow2.f32 %v2518_v9 }
 0x445   :  { %v5216_v4 = vpop.eup %5215 }
 0x446   :  { %v653_v24 = vmul.f32 %v5216_v4, %v6852_v41  ;;  %v5218_v37 = vpop.eup %5217  ;;  %v2205_v41 = vmul.f32 1.442695, %v2191_v8 }
 0x447   :  { %v5220_v19 = vpop.eup %5219  ;;  %v1592_v54 = vmul.f32 %v5218_v37, %v6688_v2 }
 0x448   :  { %4706 = vmatprep.mubr.msk.f32.mxu1 %vm201_vm1, %v653_v24  ;;  %v956_v6 = vmul.f32 %v5220_v19, %v6824_v52  ;;  %5227 = vpow2.f32 %v2205_v41 }
 0x449   :  { %v5222_v3 = vpop.eup %5221  ;;  %4707 = vmatmul.mubr.msk.f32.gmra.mxu1 %vm201_vm1, %v655_v11  ;;  %5229 = vpow2.f32 %v2843_v51 }
 0x44a   :  { %4753 = vmatprep.mubr.msk.f32.mxu1 %vm201_vm1, %v1267_v58  ;;  %v954_v55 = vmul.f32 %v5222_v3, %v6859_v25  ;;  %5231 = vpow2.f32 %v2207_v29 }
 0x44b   :  { %5233 = vrcp.f32 %v6896_v38 }
 0x44c   :  { %4734 = vmatprep.mubr.msk.f32.mxu0 %vm201_vm1, %v954_v55  ;;  %5235 = vrcp.f32 %v6992_v59 }
 0x44d   :  { %4735 = vmatmul.mubr.msk.f32.gmra.mxu0 %vm201_vm1, %v956_v6  ;;  %5237 = vrcp.f32 %v6949_v28 }
 0x44e   :  { %4781 = vmatprep.mubr.msk.f32.mxu0 %vm201_vm1, %v1592_v54  ;;  %5239 = vrcp.f32 %v7006_v47  ;;  %v8080_v47 = vld [vmem:[#allocation8_spill] sm:$0xff]  ;;  %v8081_v54 = vld [vmem:[#allocation33_spill] sm:$0xff] }
 0x44f   :  { %5241 = vrcp.f32 %v6999_v32  ;;  %v2512_v51 = vsub.f32 %v8081_v54, %v6613_v10  ;;  %v8084_v10 = vld [vmem:[#allocation37_spill] sm:$0xff] }
 0x450   :  { %v5224_v52 = vpop.eup %5223 }
 0x451   :  { %v5226_v25 = vpop.eup %5225  ;;  %v7081_v45 = vmul.f32 %v7078_v62, %v5224_v52  ;;  %v8082_v52 = vld [vmem:[#allocation32_spill] sm:$0xff] }
 0x452   :  { %v7084_v19 = vmul.f32 %v6608_v60, %v5226_v25  ;;  %v2511_v25 = vsub.f32 %v8082_v52, %v6601_v23 }
 0x453   :  { %v1913_v56 = vsel %vm201_vm1, %v7081_v45, 0.0 }
 0x454   :  { %v2542_v42 = vsel %vm201_vm1, %v7084_v19, 0.0 }
 0x455   :  { %v5228_v2 = vpop.eup %5227 }
 0x456   :  { %v5230_v58 = vpop.eup %5229  ;;  %v7089_v3 = vmul.f32 %v6910_v39, %v5228_v2 }
 0x457   :  { %v5232_v36 = vpop.eup %5231  ;;  %v7094_v30 = vmul.f32 %v6608_v60, %v5230_v58  ;;  %v2522_v58 = vmul.f32 1.442695, %v2512_v51 }
 0x458   :  { %v2235_v4 = vsel %vm201_vm1, %v7089_v3, 0.0  ;;  %v7099_v61 = vmul.f32 %v7078_v62, %v5232_v36  ;;  %v5234_v9 = vpop.eup %5233 }
 0x459   :  { %v2867_v53 = vsel %vm201_vm1, %v7094_v30, 0.0  ;;  %v5236_v28 = vpop.eup %5235  ;;  %v1594_v55 = vmul.f32 %v5234_v9, %v6628_v12 }
 0x45a   :  { %v2238_v24 = vsel %vm201_vm1, %v7099_v61, 0.0  ;;  %v5238_v6 = vpop.eup %5237 }
 0x45b   :  { %v5240_v41 = vpop.eup %5239  ;;  %v1598_v27 = vmul.f32 %v5238_v6, %v6722_v17 }
 0x45c   :  { %v5242_v12 = vpop.eup %5241  ;;  %v1600_v29 = vmul.f32 %v5240_v41, %v6788_v18 }
 0x45d   :  { %v1602_v17 = vmul.f32 %v5242_v12, %v6791_v16 }
 0x461   :  { %1914 = vadd.xlane.f32.xlu0 %v1913_v56  ;;  %v8083_v56 = vld [vmem:[#allocation23_spill] sm:$0xff] }
 0x462   :  { %2543 = vadd.xlane.f32.xlu1 %v2542_v42  ;;  %v2837_v36 = vsub.f32 %v8084_v10, %v8083_v56  ;;  %v8090_v56 = vld [vmem:[#allocation62_spill] sm:$0xff] }
 0x463   :  { %v8091_v10 = vld [vmem:[#allocation42_spill] sm:$0xff] }
 0x464   :  { %v2847_v16 = vmul.f32 1.442695, %v2837_v36  ;;  %v2514_v36 = vsub.f32 %v8091_v10, %v8090_v56  ;;  %v8104_v56 = vld [vmem:[#allocation64_spill] sm:$0xff] }
 0x465   :  { %2236 = vadd.xlane.f32.xlu0 %v2235_v4  ;;  %v2520_v4 = vmul.f32 1.442695, %v2511_v25 }
 0x466   :  { %2868 = vadd.xlane.f32.xlu1 %v2867_v53  ;;  %v8085_v53 = vld [vmem:[#allocation22_spill] sm:$0xff] }
 0x469   :  { %2239 = vadd.xlane.f32.xlu0 %v2238_v24  ;;  %v8086_v24 = vld [vmem:[#allocation34_spill] sm:$0xff] }
 0x470   :  { %v1587_v60 = vpop.xlane.xlu0 %1586  ;;  %v7107_v37 = vpop.xlane.xlu1 %1905 }
 0x471   :  { %5243 = vrcp.f32 %v1587_v60  ;;  %v2836_v60 = vsub.f32 %v8086_v24, %v8085_v53  ;;  %v8093_v53 = vld [vmem:[#allocation65_spill] sm:$0xff] }
 0x472   :  { %5245 = vrcp.f32 %v7037_v44  ;;  %v1596_v44 = vmul.f32 %v5236_v28, %v6719_v5 }
 0x473   :  { %5247 = vrcp.f32 %v6941_v50 }
 0x474   :  { %v7111_v11 = vpop.xlane.xlu0 %1902  ;;  %v7113_v8 = vpop.xlane.xlu1 %2230  ;;  %5249 = vpow2.f32 %v2522_v58 }
 0x475   :  { %5251 = vpow2.f32 %v2520_v4 }
 0x476   :  { %5253 = vpow2.f32 %v2847_v16  ;;  %v8095_v16 = vld [vmem:[#allocation43_spill] sm:$0xff] }
 0x477   :  { %2267 = vrot.lane.b32.xlu1 %v8079_v13, %s5462_s14 }
 0x478   :  { %v7118_v38 = vpop.xlane.xlu0 %2227  ;;  %v1610_v59 = vpop.permute.xlu1 %1609 }
 0x479   :  { %4777 = vmatprep.subr.mxu0 %v1610_v59 }
 0x47a   :  { %4778 = vmatpush3.msra.mxu0 %v1610_v59  ;;  %v8087_v59 = vld [vmem:[#allocation58_spill] sm:$0xff] }
 0x47b   :  { %2265 = vrot.lane.b32.xlu1 %v8080_v47, %s5462_s14 }
 0x47c   :  { %v1287_v40 = vpop.permute.xlu0 %1286  ;;  %v1608_v32 = vpop.permute.xlu1 %1607 }
 0x47d   :  { %4747 = vmatprep.subr.mxu1 %v1287_v40  ;;  %4779 = vmatprep.subr.mxu0 %v1608_v32 }
 0x47e   :  { %4748 = vmatpush3.msra.mxu1 %v1287_v40  ;;  %4780 = vmatpush3.msra.mxu0 %v1608_v32  ;;  %v5244_v5 = vpop.eup %5243 }
 0x47f   :  { %2271 = vrot.lane.b32.xlu0 %v8075_v14, %s5462_s14  ;;  %4782 = vmatmul.mubr.msk.f32.vlgmr.msra.gmra.mxu0 %vm201_vm1, %v1594_v55  ;;  %v5246_v2 = vpop.eup %5245  ;;  %v1604_v18 = vmul.f32 %v5244_v5, %v6913_v20  ;;  %v2845_v20 = vmul.f32 1.442695, %v2836_v60 }
 0x480   :  { %v1285_v50 = vpop.permute.xlu0 %1284  ;;  %4784 = vmatprep.mubr.msk.f32.mxu0 %vm201_vm1, %v1596_v44  ;;  %v5248_v42 = vpop.eup %5247  ;;  %v1606_v23 = vmul.f32 %v5246_v2, %v6842_v48  ;;  %v5441_v48 = vld [vmem:[%s7860_s1 + $0x8] sm:$0xff] }
 0x481   :  { %4749 = vmatprep.subr.mxu1 %v1285_v50  ;;  %v2242_v9 = vmul.f32 %v5248_v42, %v8087_v59  ;;  %5255 = vpow2.f32 %v2845_v20  ;;  %v5250_v28 = vpop.eup %5249  ;;  %v8096_v20 = vld [vmem:[#allocation38_spill] sm:$0xff] }
 0x482   :  { %4750 = vmatpush3.msra.mxu1 %v1285_v50  ;;  %v5252_v40 = vpop.eup %5251  ;;  %v7153_v32 = vmul.f32 %v6702_v63, %v5250_v28  ;;  %5257 = vrcp.f32 %v6888_v49  ;;  %v8097_v28 = vld [vmem:[#allocation46_spill] sm:$0xff] }
 0x483   :  { %1942 = vrot.lane.b32.xlu0 %v8079_v13, %s5461_s13  ;;  %4785 = vmatmul.mubr.msk.f32.gmra.mxu0 %vm201_vm1, %v1598_v27  ;;  %v5254_v55 = vpop.eup %5253  ;;  %v7158_v6 = vmul.f32 %v5441_v48, %v5252_v40  ;;  %5259 = vrcp.f32 %v6978_v0  ;;  %v2839_v40 = vsub.f32 %v8097_v28, %v8096_v20 }
 0x484   :  { %4787 = vmatprep.mubr.msk.f32.mxu0 %vm201_vm1, %v1600_v29  ;;  %v2548_v41 = vsel %vm201_vm1, %v7153_v32, 0.0  ;;  %v7163_v50 = vmul.f32 %v6702_v63, %v5254_v55  ;;  %5261 = vrcp.f32 %v6945_v7  ;;  %v8098_v55 = vld [vmem:[#allocation66_spill] sm:$0xff] }
 0x485   :  { %v2545_v27 = vsel %vm201_vm1, %v7158_v6, 0.0  ;;  %5263 = vrcp.f32 %v7001_v22 }
 0x486   :  { %v2873_v54 = vsel %vm201_vm1, %v7163_v50, 0.0  ;;  %5265 = vrcp.f32 %v6997_v35 }
 0x487   :  { %4788 = vmatmul.mubr.msk.f32.gmra.mxu0 %vm201_vm1, %v1602_v17  ;;  %5267 = vrcp.f32 %v7035_v1  ;;  %v8088_v1 = vld [vmem:[#allocation56_spill] sm:$0xff]  ;;  %v8089_v17 = vld [vmem:[#allocation27_spill] sm:$0xff] }
 0x488   :  { %4790 = vmatprep.mubr.msk.f32.mxu0 %vm201_vm1, %v1604_v18  ;;  %5269 = vrcp.f32 %v7033_v15  ;;  %v8092_v18 = vld [vmem:[#allocation28_spill] sm:$0xff] }
 0x489   :  { %5271 = vrcp.f32 %v6930_v46 }
 0x48b   :  { %4791 = vmatmul.mubr.msk.f32.gmra.mxu0 %vm201_vm1, %v1606_v23  ;;  %v8094_v23 = vld [vmem:[#allocation29_spill] sm:$0xff] }
 0x48c   :  { %4837 = vmatprep.mubr.msk.f32.mxu0 %vm201_vm1, %v2242_v9  ;;  %v2513_v59 = vsub.f32 %v8095_v16, %v8094_v23  ;;  %v2526_v9 = vmul.f32 1.442695, %v2514_v36 }
 0x48e   :  { %v5256_v44 = vpop.eup %5255  ;;  %5273 = vpow2.f32 %v2526_v9 }
 0x48f   :  { %v7167_v12 = vmul.f32 %v5441_v48, %v5256_v44  ;;  %v5258_v7 = vpop.eup %5257 }
 0x490   :  { %v5260_v22 = vpop.eup %5259  ;;  %v1269_v25 = vmul.f32 %v5258_v7, %v8088_v1  ;;  %v8101_v7 = vld [vmem:[#allocation47_spill] sm:$0xff]  ;;  %v8103_v1 = vld [vmem:[#allocation57_spill] sm:$0xff] }
 0x491   :  { %v2870_v51 = vsel %vm201_vm1, %v7167_v12, 0.0  ;;  %v1271_v2 = vmul.f32 %v5260_v22, %v8089_v17  ;;  %v5262_v58 = vpop.eup %5261  ;;  %v2851_v22 = vmul.f32 1.442695, %v2839_v40 }
 0x492   :  { %v5264_v46 = vpop.eup %5263  ;;  %v1273_v42 = vmul.f32 %v5262_v58, %v8092_v18  ;;  %v8105_v18 = vld [vmem:[#allocation73_spill] sm:$0xff] }
 0x493   :  { %v5266_v4 = vpop.eup %5265  ;;  %v1275_v24 = vmul.f32 %v5264_v46, %v8093_v53 }
 0x494   :  { %v5268_v60 = vpop.eup %5267  ;;  %v1277_v48 = vmul.f32 %v5266_v4, %v8098_v55 }
 0x495   :  { %v5270_v44 = vpop.eup %5269 }
 0x49f   :  { %2549 = vadd.xlane.f32.xlu1 %v2548_v41  ;;  %v8099_v41 = vld [vmem:[#allocation30_spill] sm:$0xff] }
 0x4a2   :  { %2546 = vadd.xlane.f32.xlu0 %v2545_v27  ;;  %v1279_v27 = vmul.f32 %v5268_v60, %v8099_v41 }
 0x4a3   :  { %2874 = vadd.xlane.f32.xlu1 %v2873_v54  ;;  %v5272_v54 = vpop.eup %5271 }
 0x4a4   :  { %v5274_v46 = vpop.eup %5273 }
 0x4a5   :  { %v7224_v10 = vmul.f32 %v8104_v56, %v5274_v46 }
 0x4a6   :  { %2871 = vadd.xlane.f32.xlu0 %v2870_v51  ;;  %v2524_v51 = vmul.f32 1.442695, %v2513_v59 }
 0x4a7   :  { %v2554_v53 = vsel %vm201_vm1, %v7224_v10, 0.0 }
 0x4a8   :  { %5275 = vpow2.f32 %v2524_v51 }
 0x4a9   :  { %5277 = vpow2.f32 %v2851_v22 }
 0x4ae   :  { %v7179_v29 = vpop.xlane.xlu1 %1911 }
 0x4b1   :  { %v7177_v63 = vpop.xlane.xlu0 %1908 }
 0x4b2   :  { %v1947_v52 = vpop.permute.xlu1 %1946 }
 0x4b4   :  { %2263 = vrot.lane.b32.xlu1 %v8044_v26, %s5462_s14 }
 0x4b5   :  { %v7185_v5 = vpop.xlane.xlu0 %2233  ;;  %v4699_v49 = vpop.f32.mrf.mxu1 }
 0x4b6   :  { %3062 = vst.msk [vmem:[#allocation2 + $0x8] sm:$0xff] %vm3060_vm3, %v4699_v49  ;;  %v1945_v15 = vpop.permute.xlu1 %1944  ;;  %v8100_v49 = vld [vmem:[#allocation61_spill] sm:$0xff] }
 0x4b7   :  { %v746_v0 = vpop.f32.mrf.mxu1 }
 0x4b8   :  { %2261 = vrot.lane.b32.xlu1 %v8046_v34, %s5462_s14  ;;  %3061 = vst.msk [vmem:[#allocation2] sm:$0xff] %vm3060_vm3, %v746_v0  ;;  %v2838_v0 = vsub.f32 %v8101_v7, %v8100_v49  ;;  %v8106_v49 = vld [vmem:[#allocation5_spill] sm:$0xff]  ;;  %v8107_v7 = vld [vmem:[#allocation52_spill] sm:$0xff] }
 0x4b9   :  { %v1283_v35 = vpop.permute.xlu0 %1282 }
 0x4ba   :  { %4751 = vmatprep.subr.mxu1 %v1283_v35  ;;  %v2270_v9 = vpop.permute.xlu1 %2269 }
 0x4bb   :  { %4752 = vmatpush3.msra.mxu1 %v1283_v35 }
 0x4bc   :  { %1940 = vrot.lane.b32.xlu0 %v8080_v47, %s5461_s13  ;;  %4754 = vmatmul.mubr.msk.f32.vlgmr.msra.gmra.mxu1 %vm201_vm1, %v1269_v25  ;;  %v1917_v25 = vmul.f32 %v5272_v54, %v8103_v1 }
 0x4bd   :  { %4793 = vmatprep.subr.mxu1 %v1947_v52  ;;  %4756 = vmatprep.mubr.msk.f32.mxu1 %vm201_vm1, %v1271_v2  ;;  %v2849_v2 = vmul.f32 1.442695, %v2838_v0  ;;  %v2516_v0 = vsub.f32 %v8107_v7, %v8106_v49 }
 0x4be   :  { %4794 = vmatpush3.msra.mxu1 %v1947_v52  ;;  %v8102_v52 = vld [vmem:[#allocation31_spill] sm:$0xff] }
 0x4bf   :  { %4795 = vmatprep.subr.mxu1 %v1945_v15  ;;  %v1281_v35 = vmul.f32 %v5270_v44, %v8102_v52  ;;  %5279 = vpow2.f32 %v2849_v2  ;;  %v8108_v52 = vld [vmem:[#allocation63_spill] sm:$0xff] }
 0x4c0   :  { %4796 = vmatpush3.msra.mxu1 %v1945_v15  ;;  %1938 = vrot.lane.b32.xlu0 %v8044_v26, %s5461_s13  ;;  %v5276_v15 = vpop.eup %5275  ;;  %v8110_v2 = vld [vmem:[#allocation67_spill] sm:$0xff] }
 0x4c1   :  { %4757 = vmatmul.mubr.msk.f32.gmra.mxu1 %vm201_vm1, %v1273_v42  ;;  %v5278_v36 = vpop.eup %5277  ;;  %v7227_v42 = vmul.f32 %v8105_v18, %v5276_v15 }
 0x4c2   :  { %4759 = vmatprep.mubr.msk.f32.mxu1 %vm201_vm1, %v1275_v24  ;;  %v7232_v24 = vmul.f32 %v8104_v56, %v5278_v36 }
 0x4c3   :  { %v2551_v60 = vsel %vm201_vm1, %v7227_v42, 0.0 }
 0x4c4   :  { %v2879_v16 = vsel %vm201_vm1, %v7232_v24, 0.0 }
 0x4c5   :  { %4760 = vmatmul.mubr.msk.f32.gmra.mxu1 %vm201_vm1, %v1277_v48 }
 0x4c6   :  { %4762 = vmatprep.mubr.msk.f32.mxu1 %vm201_vm1, %v1279_v27 }
 0x4c9   :  { %4763 = vmatmul.mubr.msk.f32.gmra.mxu1 %vm201_vm1, %v1281_v35  ;;  %v4702_v17 = vpop.f32.mrf.mxu1  ;;  %v8109_v35 = vld [vmem:[#allocation50_spill] sm:$0xff] }
 0x4ca   :  { %3064 = vst.msk [vmem:[#allocation2 + $0x18] sm:$0xff] %vm3060_vm3, %v4702_v17  ;;  %4809 = vmatprep.mubr.msk.f32.mxu1 %vm201_vm1, %v1917_v25  ;;  %v2515_v1 = vsub.f32 %v8109_v35, %v8108_v52  ;;  %v2530_v25 = vmul.f32 1.442695, %v2516_v0  ;;  %v8112_v52 = vld [vmem:[#allocation70_spill] sm:$0xff] }
 0x4cb   :  { %v756_v58 = vpop.f32.mrf.mxu1  ;;  %v8113_v35 = vld [vmem:[#allocation54_spill] sm:$0xff] }
 0x4cc   :  { %3063 = vst.msk [vmem:[#allocation2 + $0x10] sm:$0xff] %vm3060_vm3, %v756_v58  ;;  %v5280_v4 = vpop.eup %5279  ;;  %v2528_v17 = vmul.f32 1.442695, %v2515_v1  ;;  %v8111_v58 = vld [vmem:[#allocation51_spill] sm:$0xff]  ;;  %5281 = vpow2.f32 %v2530_v25  ;;  %v2517_v1 = vsub.f32 %v8113_v35, %v8112_v52  ;;  %v8115_v25 = vld [vmem:[#allocation53_spill] sm:$0xff] }
 0x4cd   :  { %v7237_v23 = vmul.f32 %v8105_v18, %v5280_v4  ;;  %v2840_v46 = vsub.f32 %v8111_v58, %v8110_v2  ;;  %v8118_v52 = vld [vmem:[#allocation41_spill] sm:$0xff] }
 0x4ce   :  { %5283 = vpow2.f32 %v2528_v17  ;;  %v2532_v2 = vmul.f32 1.442695, %v2517_v1 }
 0x4cf   :  { %v2876_v59 = vsel %vm201_vm1, %v7237_v23, 0.0  ;;  %v2853_v15 = vmul.f32 1.442695, %v2840_v46  ;;  %v8116_v46 = vld [vmem:[#allocation39_spill] sm:$0xff] }
 0x4d1   :  { %5285 = vpow2.f32 %v2853_v15  ;;  %v8117_v15 = vld [vmem:[#allocation55_spill] sm:$0xff] }
 0x4d2   :  { %5287 = vpow2.f32 %v2532_v2 }
 0x4d9   :  { %v5282_v18 = vpop.eup %5281 }
 0x4db   :  { %v5284_v4 = vpop.eup %5283 }
 0x4dc   :  { %2555 = vadd.xlane.f32.xlu1 %v2554_v53  ;;  %v7272_v53 = vmul.f32 %v6910_v39, %v5282_v18 }
 0x4df   :  { %2552 = vadd.xlane.f32.xlu0 %v2551_v60  ;;  %v7275_v60 = vmul.f32 %v7011_v21, %v5284_v4 }
 0x4e0   :  { %2880 = vadd.xlane.f32.xlu1 %v2879_v16  ;;  %v5286_v16 = vpop.eup %5285 }
 0x4e1   :  { %v5288_v18 = vpop.eup %5287 }
 0x4e3   :  { %2877 = vadd.xlane.f32.xlu0 %v2876_v59  ;;  %v2560_v59 = vsel %vm201_vm1, %v7272_v53, 0.0 }
 0x4e9   :  { %v4705_v20 = vpop.f32.mrf.mxu1 }
 0x4ea   :  { %3066 = vst.msk [vmem:[#allocation2 + $0x28] sm:$0xff] %vm3060_vm3, %v4705_v20  ;;  %v7244_v28 = vpop.xlane.xlu0 %1914  ;;  %v7282_v20 = vmul.f32 %v7011_v21, %v5286_v16  ;;  %v7325_v16 = vmul.f32 %v7078_v62, %v5288_v18  ;;  %v8121_v18 = vld [vmem:[#allocation75_spill] sm:$0xff] }
 0x4eb   :  { %v7246_v40 = vpop.xlane.xlu1 %2543  ;;  %v766_v55 = vpop.f32.mrf.mxu1 }
 0x4ec   :  { %3065 = vst.msk [vmem:[#allocation2 + $0x20] sm:$0xff] %vm3060_vm3, %v766_v55  ;;  %v2882_v55 = vsel %vm201_vm1, %v7282_v20, 0.0 }
 0x4ee   :  { %v7249_v48 = vpop.xlane.xlu0 %2236 }
 0x4ef   :  { %v7251_v44 = vpop.xlane.xlu1 %2868 }
 0x4f1   :  { %2259 = vrot.lane.b32.xlu1 %v8066_v33, %s5462_s14 }
 0x4f2   :  { %v7255_v41 = vpop.xlane.xlu0 %2239 }
 0x4f3   :  { %v2268_v27 = vpop.permute.xlu1 %2267 }
 0x4f5   :  { %2257 = vrot.lane.b32.xlu1 %v8069_v31, %s5462_s14 }
 0x4f6   :  { %v2272_v54 = vpop.permute.xlu0 %2271 }
 0x4f7   :  { %4821 = vmatprep.subr.mxu0 %v2272_v54  ;;  %v2266_v22 = vpop.permute.xlu1 %2265 }
 0x4f8   :  { %4822 = vmatpush3.msra.mxu0 %v2272_v54 }
 0x4f9   :  { %1936 = vrot.lane.b32.xlu0 %v8046_v34, %s5461_s13  ;;  %4823 = vmatprep.subr.mxu0 %v2270_v9 }
 0x4fa   :  { %v1943_v51 = vpop.permute.xlu0 %1942  ;;  %4824 = vmatpush3.msra.mxu0 %v2270_v9  ;;  %v2557_v9 = vsel %vm201_vm1, %v7275_v60, 0.0 }
 0x4fb   :  { %4797 = vmatprep.subr.mxu1 %v1943_v51  ;;  %4825 = vmatprep.subr.mxu0 %v2268_v27 }
 0x4fc   :  { %4798 = vmatpush3.msra.mxu1 %v1943_v51  ;;  %4826 = vmatpush3.msra.mxu0 %v2268_v27 }
 0x4fd   :  { %1934 = vrot.lane.b32.xlu0 %v8066_v33, %s5461_s13  ;;  %4827 = vmatprep.subr.mxu0 %v2266_v22 }
 0x4fe   :  { %4828 = vmatpush3.msra.mxu0 %v2266_v22 }
 0x509   :  { %v4708_v56 = vpop.f32.mrf.mxu1 }
 0x50a   :  { %3068 = vst.msk [vmem:[#allocation2 + $0x38] sm:$0xff] %vm3060_vm3, %v4708_v56  ;;  %v2842_v56 = vsub.f32 %v8117_v15, %v8116_v46  ;;  %v8120_v15 = vld [vmem:[#allocation69_spill] sm:$0xff] }
 0x50b   :  { %v776_v36 = vpop.f32.mrf.mxu1 }
 0x50c   :  { %3067 = vst.msk [vmem:[#allocation2 + $0x30] sm:$0xff] %vm3060_vm3, %v776_v36  ;;  %v2857_v36 = vmul.f32 1.442695, %v2842_v56  ;;  %vm3347_vm3 = vcmask 523712  }
 0x519   :  { %2561 = vadd.xlane.f32.xlu1 %v2560_v59 }
 0x51c   :  { %2558 = vadd.xlane.f32.xlu0 %v2557_v9  ;;  %v2563_v9 = vsel %vm201_vm1, %v7325_v16, 0.0 }
 0x520   :  { %2883 = vadd.xlane.f32.xlu0 %v2882_v55 }
 0x528   :  { %v7286_v27 = vpop.xlane.xlu1 %2549 }
 0x52a   :  { %2596 = vrot.lane.b32.xlu1 %v8075_v14, %s5463_s18 }
 0x52b   :  { %v7290_v54 = vpop.xlane.xlu0 %2546 }
 0x52c   :  { %v7292_v51 = vpop.xlane.xlu1 %2874 }
 0x52e   :  { %2594 = vrot.lane.b32.xlu1 %v8076_v43, %s5463_s18 }
 0x52f   :  { %v7296_v21 = vpop.xlane.xlu0 %2871 }
 0x530   :  { %v2264_v49 = vpop.permute.xlu1 %2263 }
 0x531   :  { %4829 = vmatprep.subr.mxu0 %v2264_v49 }
 0x532   :  { %2919 = vrot.lane.b32.xlu1 %v8076_v43, %s5464_s19  ;;  %4830 = vmatpush3.msra.mxu0 %v2264_v49  ;;  %v8114_v43 = vld [vmem:[#allocation6_spill] sm:$0xff] }
 0x533   :  { %v1941_v7 = vpop.permute.xlu0 %1940  ;;  %v2841_v17 = vsub.f32 %v8115_v25, %v8114_v43 }
 0x534   :  { %v2262_v0 = vpop.permute.xlu1 %2261  ;;  %4799 = vmatprep.subr.mxu1 %v1941_v7 }
 0x535   :  { %4831 = vmatprep.subr.mxu0 %v2262_v0  ;;  %4800 = vmatpush3.msra.mxu1 %v1941_v7  ;;  %v2855_v58 = vmul.f32 1.442695, %v2841_v17 }
 0x536   :  { %2592 = vrot.lane.b32.xlu1 %v8079_v13, %s5463_s18  ;;  %4832 = vmatpush3.msra.mxu0 %v2262_v0 }
 0x537   :  { %1932 = vrot.lane.b32.xlu0 %v8069_v31, %s5461_s13  ;;  %v1939_v22 = vpop.permute.xlu0 %1938  ;;  %5289 = vpow2.f32 %v2855_v58 }
 0x538   :  { %4801 = vmatprep.subr.mxu1 %v1939_v22  ;;  %5291 = vpow2.f32 %v2857_v36 }
 0x539   :  { %4802 = vmatpush3.msra.mxu1 %v1939_v22  ;;  %5293 = vrcp.f32 %v8118_v52 }
 0x53a   :  { %2917 = vrot.lane.b32.xlu1 %v8079_v13, %s5464_s19  ;;  %v7320_v13 = vpop.f32.mrf.mxu0  ;;  %5295 = vrcp.f32 %v7044_v57 }
 0x53b   :  { %5297 = vrcp.f32 %v7118_v38 }
 0x53c   :  { %v1071_v4 = vpop.f32.mrf.mxu0  ;;  %5299 = vrcp.f32 %v7113_v8 }
 0x53d   :  { %5301 = vrcp.f32 %v7185_v5  ;;  %v8119_v5 = vld [vmem:[#allocation60_spill] sm:$0xff] }
 0x53e   :  { %2590 = vrot.lane.b32.xlu1 %v8080_v47, %s5463_s18  ;;  %5303 = vrcp.f32 %v7249_v48 }
 0x53f   :  { %5305 = vrcp.f32 %v7255_v41 }
 0x540   :  { %5307 = vrcp.f32 %v7251_v44 }
 0x542   :  { %2588 = vrot.lane.b32.xlu1 %v8044_v26, %s5463_s18 }
 0x544   :  { %v5290_v59 = vpop.eup %5289 }
 0x545   :  { %v7331_v55 = vmul.f32 %v6910_v39, %v5290_v59  ;;  %v5292_v49 = vpop.eup %5291 }
 0x546   :  { %2586 = vrot.lane.b32.xlu1 %v8046_v34, %s5463_s18  ;;  %v7336_v0 = vmul.f32 %v7078_v62, %v5292_v49  ;;  %v7352_v62 = vpop.f32.mrf.mxu0  ;;  %v5294_v57 = vpop.eup %5293 }
 0x547   :  { %v2885_v7 = vsel %vm201_vm1, %v7331_v55, 0.0  ;;  %v5296_v8 = vpop.eup %5295  ;;  %v2244_v58 = vmul.f32 %v5294_v57, %v8119_v5 }
 0x548   :  { %v2888_v22 = vsel %vm201_vm1, %v7336_v0, 0.0  ;;  %v1081_v38 = vpop.f32.mrf.mxu0  ;;  %v5298_v46 = vpop.eup %5297  ;;  %v2246_v41 = vmul.f32 %v5296_v8, %v8120_v15 }
 0x549   :  { %v5300_v56 = vpop.eup %5299 }
 0x54a   :  { %2584 = vrot.lane.b32.xlu1 %v8066_v33, %s5463_s18  ;;  %v7359_v48 = vpop.f32.mrf.mxu0  ;;  %v5302_v59 = vpop.eup %5301 }
 0x54c   :  { %v7366_v36 = vpop.f32.mrf.mxu0 }
 0x54e   :  { %2582 = vrot.lane.b32.xlu1 %v8069_v31, %s5463_s18 }
 0x552   :  { %3077 = vrot.lane.b32.xlu1 %v1071_v4, %s5465_s20  ;;  %v2248_v4 = vmul.f32 %v5298_v46, %v8121_v18 }
 0x556   :  { %2564 = vadd.xlane.f32.xlu0 %v2563_v9  ;;  %v8122_v9 = vld [vmem:[#allocation72_spill] sm:$0xff] }
 0x557   :  { %v2250_v49 = vmul.f32 %v5300_v56, %v8122_v9  ;;  %v8129_v9 = vld [vmem:[#allocation71_spill] sm:$0xff] }
 0x55a   :  { %2886 = vadd.xlane.f32.xlu0 %v2885_v7  ;;  %v5304_v7 = vpop.eup %5303 }
 0x55b   :  { %v2254_v57 = vmul.f32 %v5304_v7, %v7089_v3 }
 0x55e   :  { %2889 = vadd.xlane.f32.xlu0 %v2888_v22  ;;  %v7370_v22 = vpop.f32.mrf.mxu0 }
 0x565   :  { %v7342_v35 = vpop.xlane.xlu1 %2555 }
 0x568   :  { %v7346_v39 = vpop.xlane.xlu0 %2552 }
 0x569   :  { %v7348_v1 = vpop.xlane.xlu1 %2880 }
 0x56c   :  { %v7354_v43 = vpop.xlane.xlu0 %2877 }
 0x56d   :  { %v2260_v25 = vpop.permute.xlu1 %2259 }
 0x56e   :  { %4833 = vmatprep.subr.mxu0 %v2260_v25 }
 0x56f   :  { %4834 = vmatpush3.msra.mxu0 %v2260_v25  ;;  %v5306_v25 = vpop.eup %5305 }
 0x570   :  { %v1937_v17 = vpop.permute.xlu0 %1936  ;;  %v5308_v8 = vpop.eup %5307 }
 0x571   :  { %v2258_v2 = vpop.permute.xlu1 %2257  ;;  %4803 = vmatprep.subr.mxu1 %v1937_v17  ;;  %v2892_v3 = vmul.f32 %v5308_v8, %v7094_v30  ;;  %v8125_v30 = vld [vmem:[#allocation16_spill] sm:$0xff] }
 0x572   :  { %4835 = vmatprep.subr.mxu0 %v2258_v2  ;;  %4804 = vmatpush3.msra.mxu1 %v1937_v17  ;;  %v7378_v17 = vpop.f32.mrf.mxu0 }
 0x573   :  { %4836 = vmatpush3.msra.mxu0 %v2258_v2 }
 0x574   :  { %2921 = vrot.lane.b32.xlu0 %v8075_v14, %s5464_s19  ;;  %4838 = vmatmul.mubr.msk.f32.vlgmr.msra.gmra.mxu0 %vm201_vm1, %v2244_v58  ;;  %v1935_v44 = vpop.permute.xlu0 %1934  ;;  %v8123_v14 = vld [vmem:[#allocation11_spill] sm:$0xff]  ;;  %v2256_v58 = vmul.f32 %v5306_v25, %v7099_v61 }
 0x575   :  { %4840 = vmatprep.mubr.msk.f32.mxu0 %vm201_vm1, %v2246_v41  ;;  %4805 = vmatprep.subr.mxu1 %v1935_v44  ;;  %v2252_v52 = vmul.f32 %v5302_v59, %v8123_v14 }
 0x576   :  { %4806 = vmatpush3.msra.mxu1 %v1935_v44 }
 0x578   :  { %2915 = vrot.lane.b32.xlu0 %v8080_v47, %s5464_s19  ;;  %4841 = vmatmul.mubr.msk.f32.gmra.mxu0 %vm201_vm1, %v2248_v4  ;;  %v4783_v47 = vpop.f32.mrf.mxu0 }
 0x579   :  { %4843 = vmatprep.mubr.msk.f32.mxu0 %vm201_vm1, %v2250_v49 }
 0x57c   :  { %2913 = vrot.lane.b32.xlu0 %v8044_v26, %s5464_s19  ;;  %4844 = vmatmul.mubr.msk.f32.gmra.mxu0 %vm201_vm1, %v2252_v52  ;;  %v4755_v2 = vpop.f32.mrf.mxu1  ;;  %v1721_v26 = vpop.f32.mrf.mxu0  ;;  %v8130_v52 = vld [vmem:[#allocation17_spill] sm:$0xff] }
 0x57d   :  { %4846 = vmatprep.mubr.msk.f32.mxu0 %vm201_vm1, %v2254_v57  ;;  %v8131_v57 = vld [vmem:[#allocation15_spill] sm:$0xff] }
 0x57e   :  { %v1396_v5 = vpop.f32.mrf.mxu1 }
 0x57f   :  { %3118 = vrot.lane.b32.xlu1 %v1396_v5, %s5466_s21 }
 0x580   :  { %2911 = vrot.lane.b32.xlu0 %v8046_v34, %s5464_s19  ;;  %4847 = vmatmul.mubr.msk.f32.gmra.mxu0 %vm201_vm1, %v2256_v58  ;;  %v8124_v34 = vld [vmem:[#allocation40_spill] sm:$0xff] }
 0x581   :  { %4893 = vmatprep.mubr.msk.f32.mxu0 %vm201_vm1, %v2892_v3  ;;  %5309 = vrcp.f32 %v8124_v34 }
 0x582   :  { %5311 = vrcp.f32 %v8125_v30 }
 0x583   :  { %3159 = vrot.lane.b32.xlu1 %v1721_v26, %s5467_s22  ;;  %5313 = vrcp.f32 %v7111_v11  ;;  %v8126_v11 = vld [vmem:[#allocation59_spill] sm:$0xff] }
 0x584   :  { %2909 = vrot.lane.b32.xlu0 %v8066_v33, %s5464_s19  ;;  %5315 = vrcp.f32 %v7107_v37 }
 0x585   :  { %5317 = vrcp.f32 %v7177_v63  ;;  %v8127_v63 = vld [vmem:[#allocation68_spill] sm:$0xff] }
 0x586   :  { %5319 = vrcp.f32 %v7179_v29 }
 0x587   :  { %5321 = vrcp.f32 %v7244_v28 }
 0x588   :  { %2907 = vrot.lane.b32.xlu0 %v8069_v31, %s5464_s19  ;;  %5323 = vrcp.f32 %v7246_v40  ;;  %v8128_v40 = vld [vmem:[#allocation74_spill] sm:$0xff] }
 0x589   :  { %5325 = vrcp.f32 %v7290_v54 }
 0x58a   :  { %5327 = vrcp.f32 %v7286_v27 }
 0x58b   :  { %5329 = vrcp.f32 %v7346_v39 }
 0x58c   :  { %3079 = vrot.lane.b32.xlu0 %v7320_v13, %s5465_s20  ;;  %5331 = vrcp.f32 %v7342_v35 }
 0x58e   :  { %v5310_v15 = vpop.eup %5309 }
 0x58f   :  { %v1919_v56 = vmul.f32 %v5310_v15, %v8126_v11 }
 0x590   :  { %3120 = vrot.lane.b32.xlu0 %v4755_v2, %s5466_s21 }
 0x594   :  { %3161 = vrot.lane.b32.xlu0 %v4783_v47, %s5467_s22 }
 0x598   :  { %3081 = vrot.lane.b32.xlu0 %v1081_v38, %s5465_s20  ;;  %v5312_v38 = vpop.eup %5311 }
 0x599   :  { %v5314_v37 = vpop.eup %5313  ;;  %v1921_v18 = vmul.f32 %v5312_v38, %v8127_v63 }
 0x59a   :  { %v5316_v29 = vpop.eup %5315  ;;  %v1923_v4 = vmul.f32 %v5314_v37, %v8128_v40 }
 0x59b   :  { %v5318_v59 = vpop.eup %5317  ;;  %v1925_v49 = vmul.f32 %v5316_v29, %v8129_v9 }
 0x59c   :  { %v5320_v7 = vpop.eup %5319  ;;  %v1927_v25 = vmul.f32 %v5318_v59, %v8130_v52 }
 0x59d   :  { %v1929_v8 = vmul.f32 %v5320_v7, %v8131_v57  ;;  %v5322_v2 = vpop.eup %5321 }
 0x59e   :  { %v5324_v47 = vpop.eup %5323  ;;  %v1931_v58 = vmul.f32 %v5322_v2, %v7081_v45 }
 0x59f   :  { %v2567_v3 = vmul.f32 %v5324_v47, %v7084_v19  ;;  %v5326_v27 = vpop.eup %5325 }
 0x5a0   :  { %v5328_v19 = vpop.eup %5327  ;;  %v2569_v30 = vmul.f32 %v5326_v27, %v7158_v6 }
 0x5a1   :  { %v2571_v39 = vmul.f32 %v5328_v19, %v7153_v32 }
 0x5a2   :  { %v2562_v61 = vpop.xlane.xlu1 %2561 }
 0x5a5   :  { %v2559_v33 = vpop.xlane.xlu0 %2558 }
 0x5a6   :  { %v2597_v31 = vpop.permute.xlu1 %2596  ;;  %5333 = vrcp.f32 %v2559_v33 }
 0x5a7   :  { %5335 = vrcp.f32 %v2562_v61 }
 0x5a9   :  { %v7407_v13 = vpop.xlane.xlu0 %2883 }
 0x5aa   :  { %v2595_v46 = vpop.permute.xlu1 %2594 }
 0x5ad   :  { %v1933_v41 = vpop.permute.xlu0 %1932 }
 0x5ae   :  { %v7412_v44 = vpop.permute.xlu1 %2919  ;;  %4807 = vmatprep.subr.mxu1 %v1933_v41 }
 0x5af   :  { %4808 = vmatpush3.msra.mxu1 %v1933_v41 }
 0x5b0   :  { %4810 = vmatmul.mubr.msk.f32.vlgmr.msra.gmra.mxu1 %vm201_vm1, %v1919_v56  ;;  %4849 = vmatprep.subr.mxu1 %v2597_v31 }
 0x5b1   :  { %4812 = vmatprep.mubr.msk.f32.mxu1 %vm201_vm1, %v1921_v18  ;;  %4850 = vmatpush3.msra.mxu1 %v2597_v31  ;;  %v5330_v31 = vpop.eup %5329 }
 0x5b2   :  { %v2593_v28 = vpop.permute.xlu1 %2592  ;;  %4851 = vmatprep.subr.mxu1 %v2595_v46  ;;  %v5332_v35 = vpop.eup %5331  ;;  %v2573_v33 = vmul.f32 %v5330_v31, %v7227_v42 }
 0x5b3   :  { %4852 = vmatpush3.msra.mxu1 %v2595_v46  ;;  %v5334_v46 = vpop.eup %5333  ;;  %v2575_v15 = vmul.f32 %v5332_v35, %v7224_v10 }
 0x5b4   :  { %4813 = vmatmul.mubr.msk.f32.gmra.mxu1 %vm201_vm1, %v1923_v4  ;;  %4853 = vmatprep.subr.mxu1 %v2593_v28  ;;  %v5336_v6 = vpop.eup %5335  ;;  %v2577_v32 = vmul.f32 %v5334_v46, %v7275_v60 }
 0x5b5   :  { %4815 = vmatprep.mubr.msk.f32.mxu1 %vm201_vm1, %v1925_v49  ;;  %4854 = vmatpush3.msra.mxu1 %v2593_v28  ;;  %v2579_v38 = vmul.f32 %v5336_v6, %v7272_v53 }
 0x5b6   :  { %v7421_v14 = vpop.permute.xlu1 %2917 }
 0x5b8   :  { %4816 = vmatmul.mubr.msk.f32.gmra.mxu1 %vm201_vm1, %v1927_v25  ;;  %v4786_v25 = vpop.f32.mrf.mxu0 }
 0x5b9   :  { %4818 = vmatprep.mubr.msk.f32.mxu1 %vm201_vm1, %v1929_v8 }
 0x5ba   :  { %v2591_v5 = vpop.permute.xlu1 %2590  ;;  %v1731_v57 = vpop.f32.mrf.mxu0 }
 0x5bb   :  { %4855 = vmatprep.subr.mxu1 %v2591_v5 }
 0x5bc   :  { %4856 = vmatpush3.msra.mxu1 %v2591_v5  ;;  %v4758_v5 = vpop.f32.mrf.mxu1 }
 0x5bd   :  { %4819 = vmatmul.mubr.msk.f32.gmra.mxu1 %vm201_vm1, %v1931_v58 }
 0x5be   :  { %4865 = vmatprep.mubr.msk.f32.mxu1 %vm201_vm1, %v2567_v3  ;;  %v2589_v26 = vpop.permute.xlu1 %2588 }
 0x5bf   :  { %4857 = vmatprep.subr.mxu1 %v2589_v26 }
 0x5c0   :  { %4858 = vmatpush3.msra.mxu1 %v2589_v26 }
 0x5c2   :  { %v2587_v54 = vpop.permute.xlu1 %2586 }
 0x5c3   :  { %4859 = vmatprep.subr.mxu1 %v2587_v54 }
 0x5c4   :  { %4860 = vmatpush3.msra.mxu1 %v2587_v54 }
 0x5c6   :  { %v2585_v45 = vpop.permute.xlu1 %2584 }
 0x5c7   :  { %4861 = vmatprep.subr.mxu1 %v2585_v45 }
 0x5c8   :  { %4862 = vmatpush3.msra.mxu1 %v2585_v45 }
 0x5ca   :  { %v2583_v34 = vpop.permute.xlu1 %2582 }
 0x5cb   :  { %4863 = vmatprep.subr.mxu1 %v2583_v34 }
 0x5cc   :  { %4864 = vmatpush3.msra.mxu1 %v2583_v34 }
 0x5cd   :  { %4866 = vmatmul.mubr.msk.f32.vlgmr.msra.gmra.mxu1 %vm201_vm1, %v2569_v30 }
 0x5ce   :  { %4868 = vmatprep.mubr.msk.f32.mxu1 %vm201_vm1, %v2571_v39  ;;  %v3078_v61 = vpop.permute.xlu1 %3077 }
 0x5cf   :  { %3102 = vst.msk [vmem:[#allocation2] sm:$0xff] %vm3101_vm4, %v3078_v61 }
 0x5d1   :  { %4869 = vmatmul.mubr.msk.f32.gmra.mxu1 %vm201_vm1, %v2573_v33 }
 0x5d2   :  { %4871 = vmatprep.mubr.msk.f32.mxu1 %vm201_vm1, %v2575_v15 }
 0x5d5   :  { %4872 = vmatmul.mubr.msk.f32.gmra.mxu1 %vm201_vm1, %v2577_v32 }
 0x5d6   :  { %4874 = vmatprep.mubr.msk.f32.mxu1 %vm201_vm1, %v2579_v38 }
 0x5df   :  { %v2565_v41 = vpop.xlane.xlu0 %2564 }
 0x5e0   :  { %5337 = vrcp.f32 %v2565_v41 }
 0x5e1   :  { %5339 = vrcp.f32 %v7296_v21 }
 0x5e2   :  { %5341 = vrcp.f32 %v7292_v51 }
 0x5e3   :  { %v2887_v11 = vpop.xlane.xlu0 %2886  ;;  %5343 = vrcp.f32 %v7354_v43 }
 0x5e4   :  { %5345 = vrcp.f32 %v7348_v1 }
 0x5e5   :  { %5347 = vrcp.f32 %v7407_v13 }
 0x5e6   :  { %5349 = vrcp.f32 %v2887_v11 }
 0x5e7   :  { %v2890_v42 = vpop.xlane.xlu0 %2889 }
 0x5e8   :  { %5351 = vrcp.f32 %v2890_v42 }
 0x5eb   :  { %v2922_v56 = vpop.permute.xlu0 %2921 }
 0x5ec   :  { %4877 = vmatprep.subr.mxu0 %v2922_v56 }
 0x5ed   :  { %v5338_v10 = vpop.eup %5337  ;;  %4878 = vmatpush3.msra.mxu0 %v2922_v56 }
 0x5ee   :  { %4879 = vmatprep.subr.mxu0 %v7412_v44  ;;  %v2581_v37 = vmul.f32 %v5338_v10, %v7325_v16 }
 0x5ef   :  { %v2916_v63 = vpop.permute.xlu0 %2915  ;;  %4880 = vmatpush3.msra.mxu0 %v7412_v44  ;;  %v5340_v44 = vpop.eup %5339 }
 0x5f0   :  { %4875 = vmatmul.mubr.msk.f32.gmra.mxu1 %vm201_vm1, %v2581_v37  ;;  %4881 = vmatprep.subr.mxu0 %v7421_v14  ;;  %v5342_v18 = vpop.eup %5341  ;;  %v2894_v29 = vmul.f32 %v5340_v44, %v7167_v12  ;;  %v3426_v37 = vld [vmem:[%s7861_s6 + $0x38] sm:$0xff] }
 0x5f1   :  { %4882 = vmatpush3.msra.mxu0 %v7421_v14  ;;  %v3119_v53 = vpop.permute.xlu1 %3118  ;;  %v5344_v1 = vpop.eup %5343  ;;  %v2896_v28 = vmul.f32 %v5342_v18, %v7163_v50  ;;  %4905 = vmatprep.subr.mxu1 %v3426_v37 }
 0x5f2   :  { %4883 = vmatprep.subr.mxu0 %v2916_v63  ;;  %3143 = vst.msk [vmem:[#allocation2] sm:$0xff] %vm3142_vm8, %v3119_v53  ;;  %v5346_v40 = vpop.eup %5345  ;;  %v2898_v4 = vmul.f32 %v5344_v1, %v7237_v23  ;;  %4906 = vmatpush3.msra.mxu1 %v3426_v37  ;;  %v3424_v53 = vld [vmem:[%s7861_s6 + $0x28] sm:$0xff] }
 0x5f3   :  { %v2914_v60 = vpop.permute.xlu0 %2913  ;;  %4884 = vmatpush3.msra.mxu0 %v2916_v63  ;;  %v5348_v59 = vpop.eup %5347  ;;  %v2900_v9 = vmul.f32 %v5346_v40, %v7232_v24  ;;  %v3425_v63 = vld [vmem:[%s7861_s6 + $0x30] sm:$0xff] }
 0x5f4   :  { %4885 = vmatprep.subr.mxu0 %v2914_v60  ;;  %v5350_v49 = vpop.eup %5349  ;;  %v2902_v50 = vmul.f32 %v5348_v59, %v7282_v20  ;;  %v7479_v20 = vpop.f32.mrf.mxu0  ;;  %4907 = vmatprep.subr.mxu1 %v3425_v63 }
 0x5f5   :  { %4886 = vmatpush3.msra.mxu0 %v2914_v60  ;;  %v3160_v21 = vpop.permute.xlu1 %3159  ;;  %v5352_v7 = vpop.eup %5351  ;;  %v2904_v14 = vmul.f32 %v5350_v49, %v7331_v55  ;;  %4908 = vmatpush3.msra.mxu1 %v3425_v63  ;;  %v3423_v60 = vld [vmem:[%s7861_s6 + $0x20] sm:$0xff] }
 0x5f6   :  { %3184 = vst.msk [vmem:[#allocation2] sm:$0xff] %vm3183_vm9, %v3160_v21  ;;  %v2906_v24 = vmul.f32 %v5352_v7, %v7336_v0  ;;  %v7481_v8 = vpop.f32.mrf.mxu0  ;;  %v1406_v0 = vpop.f32.mrf.mxu1  ;;  %4909 = vmatprep.subr.mxu1 %v3424_v53  ;;  %v3422_v21 = vld [vmem:[%s7861_s6 + $0x18] sm:$0xff] }
 0x5f7   :  { %v2912_v16 = vpop.permute.xlu0 %2911  ;;  %4910 = vmatpush3.msra.mxu1 %v3424_v53 }
 0x5f8   :  { %4887 = vmatprep.subr.mxu0 %v2912_v16  ;;  %v7483_v55 = vpop.f32.mrf.mxu0  ;;  %v7489_v3 = vpop.f32.mrf.mxu1  ;;  %4911 = vmatprep.subr.mxu1 %v3423_v60 }
 0x5f9   :  { %4888 = vmatpush3.msra.mxu0 %v2912_v16  ;;  %4912 = vmatpush3.msra.mxu1 %v3423_v60 }
 0x5fa   :  { %v7485_v2 = vpop.f32.mrf.mxu0  ;;  %v7491_v26 = vpop.f32.mrf.mxu1  ;;  %4913 = vmatprep.subr.mxu1 %v3422_v21 }
 0x5fb   :  { %v2910_v51 = vpop.permute.xlu0 %2909  ;;  %4914 = vmatpush3.msra.mxu1 %v3422_v21 }
 0x5fc   :  { %4889 = vmatprep.subr.mxu0 %v2910_v51  ;;  %v7493_v54 = vpop.f32.mrf.mxu1 }
 0x5fd   :  { %4890 = vmatpush3.msra.mxu0 %v2910_v51  ;;  %v3419_v51 = vld [vmem:[%s7861_s6] sm:$0xff] }
 0x5fe   :  { %v7495_v45 = vpop.f32.mrf.mxu1 }
 0x5ff   :  { %v2908_v43 = vpop.permute.xlu0 %2907 }
 0x600   :  { %4891 = vmatprep.subr.mxu0 %v2908_v43 }
 0x601   :  { %4892 = vmatpush3.msra.mxu0 %v2908_v43 }
 0x602   :  { %4894 = vmatmul.mubr.msk.f32.vlgmr.msra.gmra.mxu0 %vm201_vm1, %v2894_v29 }
 0x603   :  { %v3080_v13 = vpop.permute.xlu0 %3079  ;;  %4896 = vmatprep.mubr.msk.f32.mxu0 %vm201_vm1, %v2896_v28 }
 0x604   :  { %3103 = vst.msk [vmem:[#allocation2 + $0x8] sm:$0xff] %vm3101_vm4, %v3080_v13 }
 0x606   :  { %4897 = vmatmul.mubr.msk.f32.gmra.mxu0 %vm201_vm1, %v2898_v4 }
 0x607   :  { %v3121_v12 = vpop.permute.xlu0 %3120  ;;  %4899 = vmatprep.mubr.msk.f32.mxu0 %vm201_vm1, %v2900_v9 }
 0x608   :  { %3144 = vst.msk [vmem:[#allocation2 + $0x8] sm:$0xff] %vm3142_vm8, %v3121_v12 }
 0x60a   :  { %4900 = vmatmul.mubr.msk.f32.gmra.mxu0 %vm201_vm1, %v2902_v50 }
 0x60b   :  { %v3162_v52 = vpop.permute.xlu0 %3161  ;;  %4902 = vmatprep.mubr.msk.f32.mxu0 %vm201_vm1, %v2904_v14 }
 0x60c   :  { %3185 = vst.msk [vmem:[#allocation2 + $0x8] sm:$0xff] %vm3183_vm9, %v3162_v52 }
 0x60e   :  { %4903 = vmatmul.mubr.msk.f32.gmra.mxu0 %vm201_vm1, %v2906_v24 }
 0x60f   :  { %v3082_v23 = vpop.permute.xlu0 %3081 }
 0x610   :  { %3104 = vst.msk [vmem:[#allocation2 + $0x10] sm:$0xff] %vm3101_vm4, %v3082_v23 }
 0x634   :  { %v4839_v47 = vpop.f32.mrf.mxu0 }
 0x636   :  { %v2371_v58 = vpop.f32.mrf.mxu0 }
 0x637   :  { %3241 = vrot.lane.b32.xlu0 %v2371_v58, %s5468_s0 }
 0x638   :  { %v4842_v15 = vpop.f32.mrf.mxu0 }
 0x63a   :  { %v2381_v32 = vpop.f32.mrf.mxu0 }
 0x63b   :  { %3122 = vrot.lane.b32.xlu0 %v1406_v0, %s5466_s21 }
 0x63c   :  { %v7518_v38 = vpop.f32.mrf.mxu0 }
 0x63e   :  { %v2391_v41 = vpop.f32.mrf.mxu0 }
 0x640   :  { %v7520_v11 = vpop.f32.mrf.mxu0 }
 0x642   :  { %v7522_v42 = vpop.f32.mrf.mxu0 }
 0x670   :  { %v4811_v27 = vpop.f32.mrf.mxu1 }
 0x672   :  { %v2046_v19 = vpop.f32.mrf.mxu1 }
 0x673   :  { %3200 = vrot.lane.b32.xlu1 %v2046_v19, %s5469_s23 }
 0x674   :  { %v4814_v34 = vpop.f32.mrf.mxu1 }
 0x676   :  { %v2056_v30 = vpop.f32.mrf.mxu1 }
 0x677   :  { %3202 = vrot.lane.b32.xlu1 %v4811_v27, %s5469_s23 }
 0x678   :  { %v7501_v31 = vpop.f32.mrf.mxu1 }
 0x67a   :  { %v7504_v39 = vpop.f32.mrf.mxu1 }
 0x67b   :  { %3083 = vrot.lane.b32.xlu1 %v7352_v62, %s5465_s20 }
 0x67d   :  { %v7507_v35 = vpop.f32.mrf.mxu1 }
 0x67f   :  { %3243 = vrot.lane.b32.xlu1 %v4839_v47, %s5468_s0  ;;  %v7509_v61 = vpop.f32.mrf.mxu1 }
 0x683   :  { %3124 = vrot.lane.b32.xlu1 %v4758_v5, %s5466_s21 }
 0x68d   :  { %v4867_v33 = vpop.f32.mrf.mxu1 }
 0x68e   :  { %3284 = vrot.lane.b32.xlu1 %v4867_v33, %s5470_s24 }
 0x68f   :  { %v2696_v46 = vpop.f32.mrf.mxu1 }
 0x690   :  { %3282 = vrot.lane.b32.xlu0 %v2696_v46, %s5470_s24 }
 0x691   :  { %v4870_v16 = vpop.f32.mrf.mxu1 }
 0x692   :  { %3165 = vrot.lane.b32.xlu1 %v4786_v25, %s5467_s22 }
 0x693   :  { %v2706_v44 = vpop.f32.mrf.mxu1 }
 0x694   :  { %3163 = vrot.lane.b32.xlu0 %v1731_v57, %s5467_s22 }
 0x6a9   :  { %v7515_v62 = vpop.permute.xlu0 %3241 }
 0x6ad   :  { %v3123_v6 = vpop.permute.xlu0 %3122 }
 0x6ae   :  { %3145 = vst.msk [vmem:[#allocation2 + $0x10] sm:$0xff] %vm3142_vm8, %v3123_v6 }
 0x6c2   :  { %v4895_v56 = vpop.f32.mrf.mxu0 }
 0x6c3   :  { %3325 = vrot.lane.b32.xlu1 %v4895_v56, %s5471_s25 }
 0x6c4   :  { %v3021_v10 = vpop.f32.mrf.mxu0 }
 0x6c5   :  { %3323 = vrot.lane.b32.xlu0 %v3021_v10, %s5471_s25 }
 0x6c6   :  { %v4898_v18 = vpop.f32.mrf.mxu0 }
 0x6c7   :  { %3206 = vrot.lane.b32.xlu1 %v4814_v34, %s5469_s23 }
 0x6c8   :  { %v3031_v43 = vpop.f32.mrf.mxu0 }
 0x6c9   :  { %3204 = vrot.lane.b32.xlu0 %v2056_v30, %s5469_s23 }
 0x6ca   :  { %v4901_v4 = vpop.f32.mrf.mxu0 }
 0x6cb   :  { %3087 = vrot.lane.b32.xlu1 %v7359_v48, %s5465_s20  ;;  %v3421_v48 = vld [vmem:[%s7861_s6 + $0x10] sm:$0xff] }
 0x6cc   :  { %4915 = vmatprep.subr.mxu1 %v3421_v48  ;;  %v3041_v59 = vpop.f32.mrf.mxu0 }
 0x6cd   :  { %3085 = vrot.lane.b32.xlu0 %v7366_v36, %s5465_s20  ;;  %v3420_v36 = vld [vmem:[%s7861_s6 + $0x8] sm:$0xff]  ;;  %4916 = vmatpush3.msra.mxu1 %v3421_v48 }
 0x6ce   :  { %4917 = vmatprep.subr.mxu1 %v3420_v36  ;;  %v4904_v50 = vpop.f32.mrf.mxu0 }
 0x6cf   :  { %3247 = vrot.lane.b32.xlu1 %v4842_v15, %s5468_s0  ;;  %4918 = vmatpush3.msra.mxu1 %v3420_v36 }
 0x6d0   :  { %4919 = vmatprep.subr.mxu1 %v3419_v51  ;;  %v3051_v52 = vpop.f32.mrf.mxu0 }
 0x6d1   :  { %3245 = vrot.lane.b32.xlu0 %v2381_v32, %s5468_s0  ;;  %4920 = vmatpush3.msra.mxu1 %v3419_v51 }
 0x6d3   :  { %3128 = vrot.lane.b32.xlu1 %v7489_v3, %s5466_s21 }
 0x6d5   :  { %3126 = vrot.lane.b32.xlu0 %v7491_v26, %s5466_s21 }
 0x6d7   :  { %3288 = vrot.lane.b32.xlu1 %v4870_v16, %s5470_s24 }
 0x6d9   :  { %3286 = vrot.lane.b32.xlu0 %v2706_v44, %s5470_s24 }
 0x6db   :  { %3169 = vrot.lane.b32.xlu1 %v7479_v20, %s5467_s22 }
 0x6dd   :  { %3167 = vrot.lane.b32.xlu0 %v7481_v8, %s5467_s22  ;;  %v7622_v8 = vld [vmem:[%s7862_s5] ss:$0 sm:$0xff] }
 0x6df   :  { %3329 = vrot.lane.b32.xlu1 %v4898_v18, %s5471_s25 }
 0x6e1   :  { %3327 = vrot.lane.b32.xlu0 %v3031_v43, %s5471_s25 }
 0x6e3   :  { %3210 = vrot.lane.b32.xlu1 %v7501_v31, %s5469_s23 }
 0x6e5   :  { %3208 = vrot.lane.b32.xlu0 %v7504_v39, %s5469_s23  ;;  %v3201_v29 = vpop.permute.xlu1 %3200 }
 0x6e6   :  { %3225 = vst.msk [vmem:[#allocation2] sm:$0xff] %vm3224_vm11, %v3201_v29 }
 0x6e7   :  { %3091 = vrot.lane.b32.xlu1 %v7370_v22, %s5465_s20  ;;  %3266 = vst.msk [vmem:[#allocation2] sm:$0xff] %vm3265_vm12, %v7515_v62  ;;  %v4873_v22 = vpop.f32.mrf.mxu1 }
 0x6e9   :  { %3089 = vrot.lane.b32.xlu0 %v7378_v17, %s5465_s20  ;;  %v3203_v1 = vpop.permute.xlu1 %3202  ;;  %v2716_v17 = vpop.f32.mrf.mxu1 }
 0x6ea   :  { %3226 = vst.msk [vmem:[#allocation2 + $0x8] sm:$0xff] %vm3224_vm11, %v3203_v1 }
 0x6eb   :  { %3251 = vrot.lane.b32.xlu1 %v7518_v38, %s5468_s0  ;;  %v4876_v9 = vpop.f32.mrf.mxu1 }
 0x6ed   :  { %3249 = vrot.lane.b32.xlu0 %v2391_v41, %s5468_s0  ;;  %v3084_v28 = vpop.permute.xlu1 %3083  ;;  %v2726_v12 = vpop.f32.mrf.mxu1 }
 0x6ee   :  { %3105 = vst.msk [vmem:[#allocation2 + $0x18] sm:$0xff] %vm3101_vm4, %v3084_v28 }
 0x6ef   :  { %3132 = vrot.lane.b32.xlu1 %v7493_v54, %s5466_s21 }
 0x6f1   :  { %3130 = vrot.lane.b32.xlu0 %v7495_v45, %s5466_s21  ;;  %v3244_v40 = vpop.permute.xlu1 %3243 }
 0x6f2   :  { %3267 = vst.msk [vmem:[#allocation2 + $0x8] sm:$0xff] %vm3265_vm12, %v3244_v40 }
 0x6f3   :  { %3292 = vrot.lane.b32.xlu1 %v4873_v22, %s5470_s24 }
 0x6f5   :  { %3290 = vrot.lane.b32.xlu0 %v2716_v17, %s5470_s24  ;;  %v3125_v13 = vpop.permute.xlu1 %3124 }
 0x6f6   :  { %3146 = vst.msk [vmem:[#allocation2 + $0x18] sm:$0xff] %vm3142_vm8, %v3125_v13 }
 0x6f7   :  { %3173 = vrot.lane.b32.xlu1 %v7483_v55, %s5467_s22 }
 0x6f9   :  { %3171 = vrot.lane.b32.xlu0 %v7485_v2, %s5467_s22 }
 0x6fb   :  { %3333 = vrot.lane.b32.xlu1 %v4901_v4, %s5471_s25 }
 0x6fd   :  { %3331 = vrot.lane.b32.xlu0 %v3041_v59, %s5471_s25 }
 0x6ff   :  { %3253 = vrot.lane.b32.xlu1 %v7522_v42, %s5468_s0 }
 0x700   :  { %v3285_v49 = vpop.permute.xlu1 %3284 }
 0x701   :  { %3308 = vst.msk [vmem:[#allocation2 + $0x8] sm:$0xff] %vm3306_vm13, %v3285_v49  ;;  %3212 = vrot.lane.b32.xlu0 %v7509_v61, %s5469_s23 }
 0x702   :  { %v3283_v7 = vpop.permute.xlu0 %3282 }
 0x703   :  { %3307 = vst.msk [vmem:[#allocation2] sm:$0xff] %vm3306_vm13, %v3283_v7  ;;  %3294 = vrot.lane.b32.xlu1 %v2726_v12, %s5470_s24 }
 0x704   :  { %v3166_v14 = vpop.permute.xlu1 %3165 }
 0x705   :  { %3187 = vst.msk [vmem:[#allocation2 + $0x18] sm:$0xff] %vm3183_vm9, %v3166_v14  ;;  %3214 = vrot.lane.b32.xlu0 %v7507_v35, %s5469_s23 }
 0x706   :  { %v3164_v24 = vpop.permute.xlu0 %3163 }
 0x707   :  { %3186 = vst.msk [vmem:[#allocation2 + $0x10] sm:$0xff] %vm3183_vm9, %v3164_v24  ;;  %3335 = vrot.lane.b32.xlu1 %v3051_v52, %s5471_s25 }
 0x709   :  { %3255 = vrot.lane.b32.xlu0 %v7520_v11, %s5468_s0 }
 0x70d   :  { %3296 = vrot.lane.b32.xlu0 %v4876_v9, %s5470_s24 }
 0x711   :  { %3337 = vrot.lane.b32.xlu0 %v4904_v50, %s5471_s25 }
 0x735   :  { %v3326_v23 = vpop.permute.xlu1 %3325 }
 0x736   :  { %3349 = vst.msk [vmem:[#allocation2 + $0x8] sm:$0xff] %vm3347_vm3, %v3326_v23 }
 0x737   :  { %v3324_v25 = vpop.permute.xlu0 %3323 }
 0x738   :  { %3348 = vst.msk [vmem:[#allocation2] sm:$0xff] %vm3347_vm3, %v3324_v25 }
 0x739   :  { %v3207_v57 = vpop.permute.xlu1 %3206 }
 0x73a   :  { %3228 = vst.msk [vmem:[#allocation2 + $0x18] sm:$0xff] %vm3224_vm11, %v3207_v57 }
 0x73b   :  { %v3205_v20 = vpop.permute.xlu0 %3204 }
 0x73c   :  { %3227 = vst.msk [vmem:[#allocation2 + $0x10] sm:$0xff] %vm3224_vm11, %v3205_v20 }
 0x73d   :  { %v3088_v55 = vpop.permute.xlu1 %3087  ;;  %v3357_v2 = vld [vmem:[#allocation2 + $0x8] sm:$0xff] }
 0x73e   :  { %3107 = vst.msk [vmem:[#allocation2 + $0x28] sm:$0xff] %vm3101_vm4, %v3088_v55  ;;  %v3372_v47 = vadd.f32 %v7622_v8, %v3357_v2 }
 0x73f   :  { %v3086_v5 = vpop.permute.xlu0 %3085  ;;  %v3356_v58 = vld [vmem:[#allocation2] sm:$0xff] }
 0x740   :  { %3106 = vst.msk [vmem:[#allocation2 + $0x20] sm:$0xff] %vm3101_vm4, %v3086_v5  ;;  %v3371_v0 = vadd.f32 %v7622_v8, %v3356_v58  ;;  %v3389_v3 = vmul.f32 1.442695, %v3372_v47  ;;  %vm3380_vm15 = vcmp.gt.f32.partialorder %v3372_v47, 0.0 }
 0x741   :  { %v3248_v26 = vpop.permute.xlu1 %3247 }
 0x742   :  { %3269 = vst.msk [vmem:[#allocation2 + $0x18] sm:$0xff] %vm3265_vm12, %v3248_v26  ;;  %v3387_v54 = vmul.f32 1.442695, %v3371_v0  ;;  %5353 = vpow2.f32 %v3389_v3  ;;  %vm3379_vm0 = vcmp.gt.f32.partialorder %v3371_v0, 0.0 }
 0x743   :  { %v3246_v45 = vpop.permute.xlu0 %3245 }
 0x744   :  { %3268 = vst.msk [vmem:[#allocation2 + $0x10] sm:$0xff] %vm3265_vm12, %v3246_v45  ;;  %5355 = vpow2.f32 %v3387_v54 }
 0x745   :  { %v3129_v27 = vpop.permute.xlu1 %3128 }
 0x746   :  { %3148 = vst.msk [vmem:[#allocation2 + $0x28] sm:$0xff] %vm3142_vm8, %v3129_v27 }
 0x747   :  { %v3127_v19 = vpop.permute.xlu0 %3126 }
 0x748   :  { %3147 = vst.msk [vmem:[#allocation2 + $0x20] sm:$0xff] %vm3142_vm8, %v3127_v19 }
 0x749   :  { %v3289_v34 = vpop.permute.xlu1 %3288 }
 0x74a   :  { %3310 = vst.msk [vmem:[#allocation2 + $0x18] sm:$0xff] %vm3306_vm13, %v3289_v34 }
 0x74b   :  { %v3287_v30 = vpop.permute.xlu0 %3286 }
 0x74c   :  { %3309 = vst.msk [vmem:[#allocation2 + $0x10] sm:$0xff] %vm3306_vm13, %v3287_v30 }
 0x74d   :  { %v3170_v31 = vpop.permute.xlu1 %3169 }
 0x74e   :  { %3189 = vst.msk [vmem:[#allocation2 + $0x28] sm:$0xff] %vm3183_vm9, %v3170_v31 }
 0x74f   :  { %v5354_v39 = vpop.eup %5353  ;;  %v3168_v35 = vpop.permute.xlu0 %3167 }
 0x750   :  { %3188 = vst.msk [vmem:[#allocation2 + $0x20] sm:$0xff] %vm3183_vm9, %v3168_v35  ;;  %v4341_v46 = vadd.f32 -1.0, %v5354_v39  ;;  %v3557_v35 = vld [vmem:[%s7863_s7 + $0x8] sm:$0xff] }
 0x751   :  { %v5356_v61 = vpop.eup %5355  ;;  %v3330_v33 = vpop.permute.xlu1 %3329  ;;  %4933 = vmatprep.subr.mxu0 %v3557_v35 }
 0x752   :  { %3351 = vst.msk [vmem:[#allocation2 + $0x18] sm:$0xff] %vm3347_vm3, %v3330_v33  ;;  %v4340_v62 = vadd.f32 -1.0, %v5356_v61  ;;  %v3412_v38 = vsel %vm3380_vm15, %v3372_v47, %v4341_v46  ;;  %v3556_v61 = vld [vmem:[%s7863_s7] sm:$0xff]  ;;  %4934 = vmatpush3.msra.mxu0 %v3557_v35 }
 0x753   :  { %v3328_v15 = vpop.permute.xlu0 %3327  ;;  %v3558_v33 = vld [vmem:[%s7864_s8] sm:$0xff]  ;;  %4935 = vmatprep.subr.mxu0 %v3556_v61 }
 0x754   :  { %3350 = vst.msk [vmem:[#allocation2 + $0x10] sm:$0xff] %vm3347_vm3, %v3328_v15  ;;  %v3411_v6 = vsel %vm3379_vm0, %v3371_v0, %v4340_v62  ;;  %4936 = vmatpush3.msra.mxu0 %v3556_v61 }
 0x755   :  { %4921 = vmatprep.mubr.msk.f32.mxu1 %vm201_vm1, %v3411_v6  ;;  %v3211_v32 = vpop.permute.xlu1 %3210 }
 0x756   :  { %3230 = vst.msk [vmem:[#allocation2 + $0x28] sm:$0xff] %vm3224_vm11, %v3211_v32  ;;  %4922 = vmatmul.mubr.msk.f32.vlgmr.msra.gmra.mxu1 %vm201_vm1, %v3412_v38 }
 0x757   :  { %v3209_v41 = vpop.permute.xlu0 %3208 }
 0x758   :  { %3229 = vst.msk [vmem:[#allocation2 + $0x20] sm:$0xff] %vm3224_vm11, %v3209_v41 }
 0x759   :  { %v3092_v11 = vpop.permute.xlu1 %3091  ;;  %v3359_v42 = vld [vmem:[#allocation2 + $0x18] sm:$0xff] }
 0x75a   :  { %3109 = vst.msk [vmem:[#allocation2 + $0x38] sm:$0xff] %vm3101_vm4, %v3092_v11  ;;  %v3374_v56 = vadd.f32 %v7622_v8, %v3359_v42 }
 0x75b   :  { %v3090_v10 = vpop.permute.xlu0 %3089  ;;  %v3358_v37 = vld [vmem:[#allocation2 + $0x10] sm:$0xff] }
 0x75c   :  { %3108 = vst.msk [vmem:[#allocation2 + $0x30] sm:$0xff] %vm3101_vm4, %v3090_v10  ;;  %v3373_v63 = vadd.f32 %v7622_v8, %v3358_v37  ;;  %v3393_v53 = vmul.f32 1.442695, %v3374_v56  ;;  %vm3382_vm0 = vcmp.gt.f32.partialorder %v3374_v56, 0.0 }
 0x75d   :  { %v3252_v60 = vpop.permute.xlu1 %3251 }
 0x75e   :  { %3271 = vst.msk [vmem:[#allocation2 + $0x28] sm:$0xff] %vm3265_vm12, %v3252_v60  ;;  %v3391_v21 = vmul.f32 1.442695, %v3373_v63  ;;  %5357 = vpow2.f32 %v3393_v53  ;;  %vm3381_vm15 = vcmp.gt.f32.partialorder %v3373_v63, 0.0 }
 0x75f   :  { %v3250_v48 = vpop.permute.xlu0 %3249 }
 0x760   :  { %3270 = vst.msk [vmem:[#allocation2 + $0x20] sm:$0xff] %vm3265_vm12, %v3250_v48  ;;  %5359 = vpow2.f32 %v3391_v21 }
 0x761   :  { %v3133_v36 = vpop.permute.xlu1 %3132 }
 0x762   :  { %3150 = vst.msk [vmem:[#allocation2 + $0x38] sm:$0xff] %vm3142_vm8, %v3133_v36 }
 0x763   :  { %v3131_v16 = vpop.permute.xlu0 %3130 }
 0x764   :  { %3149 = vst.msk [vmem:[#allocation2 + $0x30] sm:$0xff] %vm3142_vm8, %v3131_v16 }
 0x765   :  { %v3293_v51 = vpop.permute.xlu1 %3292 }
 0x766   :  { %3312 = vst.msk [vmem:[#allocation2 + $0x28] sm:$0xff] %vm3306_vm13, %v3293_v51 }
 0x767   :  { %v3291_v44 = vpop.permute.xlu0 %3290 }
 0x768   :  { %3311 = vst.msk [vmem:[#allocation2 + $0x20] sm:$0xff] %vm3306_vm13, %v3291_v44 }
 0x769   :  { %v3174_v18 = vpop.permute.xlu1 %3173 }
 0x76a   :  { %3191 = vst.msk [vmem:[#allocation2 + $0x38] sm:$0xff] %vm3183_vm9, %v3174_v18 }
 0x76b   :  { %v5358_v43 = vpop.eup %5357  ;;  %v3172_v29 = vpop.permute.xlu0 %3171 }
 0x76c   :  { %3190 = vst.msk [vmem:[#allocation2 + $0x30] sm:$0xff] %vm3183_vm9, %v3172_v29  ;;  %v4343_v22 = vadd.f32 -1.0, %v5358_v43 }
 0x76d   :  { %v5360_v1 = vpop.eup %5359  ;;  %v3334_v28 = vpop.permute.xlu1 %3333 }
 0x76e   :  { %3353 = vst.msk [vmem:[#allocation2 + $0x28] sm:$0xff] %vm3347_vm3, %v3334_v28  ;;  %v4342_v40 = vadd.f32 -1.0, %v5360_v1  ;;  %v3414_v59 = vsel %vm3382_vm0, %v3374_v56, %v4343_v22 }
 0x76f   :  { %v3332_v17 = vpop.permute.xlu0 %3331 }
 0x770   :  { %3352 = vst.msk [vmem:[#allocation2 + $0x20] sm:$0xff] %vm3347_vm3, %v3332_v17  ;;  %v3413_v13 = vsel %vm3381_vm15, %v3373_v63, %v4342_v40 }
 0x771   :  { %4924 = vmatprep.mubr.msk.f32.mxu1 %vm201_vm1, %v3413_v13  ;;  %v3254_v4 = vpop.permute.xlu1 %3253 }
 0x772   :  { %4925 = vmatmul.mubr.msk.f32.gmra.mxu1 %vm201_vm1, %v3414_v59 }
 0x773   :  { %v3213_v9 = vpop.permute.xlu0 %3212 }
 0x774   :  { %3231 = vst.msk [vmem:[#allocation2 + $0x30] sm:$0xff] %vm3224_vm11, %v3213_v9 }
 0x775   :  { %3272 = vst.msk [vmem:[#allocation2 + $0x30] sm:$0xff] %vm3265_vm12, %v3254_v4  ;;  %v3295_v49 = vpop.permute.xlu1 %3294  ;;  %v3361_v12 = vld [vmem:[#allocation2 + $0x28] sm:$0xff] }
 0x776   :  { %3313 = vst.msk [vmem:[#allocation2 + $0x30] sm:$0xff] %vm3306_vm13, %v3295_v49  ;;  %v3376_v50 = vadd.f32 %v7622_v8, %v3361_v12 }
 0x777   :  { %v3215_v7 = vpop.permute.xlu0 %3214  ;;  %v3360_v14 = vld [vmem:[#allocation2 + $0x20] sm:$0xff] }
 0x778   :  { %3232 = vst.msk [vmem:[#allocation2 + $0x38] sm:$0xff] %vm3224_vm11, %v3215_v7  ;;  %v3375_v52 = vadd.f32 %v7622_v8, %v3360_v14  ;;  %v3397_v24 = vmul.f32 1.442695, %v3376_v50  ;;  %vm3384_vm8 = vcmp.gt.f32.partialorder %v3376_v50, 0.0 }
 0x779   :  { %v3336_v23 = vpop.permute.xlu1 %3335 }
 0x77a   :  { %3354 = vst.msk [vmem:[#allocation2 + $0x30] sm:$0xff] %vm3347_vm3, %v3336_v23  ;;  %v3395_v25 = vmul.f32 1.442695, %v3375_v52  ;;  %5361 = vpow2.f32 %v3397_v24  ;;  %vm3383_vm4 = vcmp.gt.f32.partialorder %v3375_v52, 0.0 }
 0x77b   :  { %v3256_v57 = vpop.permute.xlu0 %3255 }
 0x77c   :  { %3273 = vst.msk [vmem:[#allocation2 + $0x38] sm:$0xff] %vm3265_vm12, %v3256_v57  ;;  %5363 = vpow2.f32 %v3395_v25  ;;  %vm3560_vm12 = vcmask 130048  }
 0x77f   :  { %v3297_v20 = vpop.permute.xlu0 %3296 }
 0x780   :  { %3314 = vst.msk [vmem:[#allocation2 + $0x38] sm:$0xff] %vm3306_vm13, %v3297_v20 }
 0x781   :  { %v3362_v55 = vld [vmem:[#allocation2 + $0x30] sm:$0xff] }
 0x782   :  { %v3377_v2 = vadd.f32 %v7622_v8, %v3362_v55 }
 0x783   :  { %v3338_v47 = vpop.permute.xlu0 %3337 }
 0x784   :  { %3355 = vst.msk [vmem:[#allocation2 + $0x38] sm:$0xff] %vm3347_vm3, %v3338_v47  ;;  %v3399_v5 = vmul.f32 1.442695, %v3377_v2  ;;  %vm3385_vm9 = vcmp.gt.f32.partialorder %v3377_v2, 0.0 }
 0x786   :  { %5365 = vpow2.f32 %v3399_v5 }
 0x787   :  { %v5362_v58 = vpop.eup %5361 }
 0x788   :  { %v4345_v3 = vadd.f32 -1.0, %v5362_v58 }
 0x789   :  { %v5364_v0 = vpop.eup %5363 }
 0x78a   :  { %v4344_v26 = vadd.f32 -1.0, %v5364_v0  ;;  %v3416_v19 = vsel %vm3384_vm8, %v3376_v50, %v4345_v3  ;;  %v8132_v50 = vld [vmem:[#allocation19_spill] sm:$0xff] }
 0x78b   :  { %v3363_v54 = vld [vmem:[#allocation2 + $0x38] sm:$0xff]  ;;  %v8133_v7 = vsub.s32 0, %v8132_v50 }
 0x78c   :  { %v3415_v45 = vsel %vm3383_vm4, %v3375_v52, %v4344_v26  ;;  %v3378_v27 = vadd.f32 %v7622_v8, %v3363_v54  ;;  %v3559_v8 = vld [vmem:[%s7864_s8 + $0x8] sm:$0xff] }
 0x78d   :  { %4927 = vmatprep.mubr.msk.f32.mxu1 %vm201_vm1, %v3415_v45  ;;  %4949 = vmatprep.subr.mxu1 %v3559_v8 }
 0x78e   :  { %4928 = vmatmul.mubr.msk.f32.gmra.mxu1 %vm201_vm1, %v3416_v19  ;;  %v3401_v34 = vmul.f32 1.442695, %v3378_v27  ;;  %vm3386_vm11 = vcmp.gt.f32.partialorder %v3378_v27, 0.0 }
 0x78f   :  { %4950 = vmatpush3.msra.mxu1 %v3559_v8 }
 0x790   :  { %5367 = vpow2.f32 %v3401_v34  ;;  %4951 = vmatprep.subr.mxu1 %v3558_v33 }
 0x791   :  { %4952 = vmatpush3.msra.mxu1 %v3558_v33 }
 0x793   :  { %v5366_v30 = vpop.eup %5365 }
 0x794   :  { %v4346_v31 = vadd.f32 -1.0, %v5366_v30 }
 0x796   :  { %v3417_v39 = vsel %vm3385_vm9, %v3377_v2, %v4346_v31 }
 0x797   :  { %4930 = vmatprep.mubr.msk.f32.mxu1 %vm201_vm1, %v3417_v39 }
 0x79d   :  { %v5368_v46 = vpop.eup %5367 }
 0x79e   :  { %v4347_v62 = vadd.f32 -1.0, %v5368_v46 }
 0x7a0   :  { %v3418_v15 = vsel %vm3386_vm11, %v3378_v27, %v4347_v62 }
 0x7a1   :  { %4931 = vmatmul.mubr.msk.f32.gmra.mxu1 %vm201_vm1, %v3418_v15 }
 0x816   :  { %v4923_v6 = vpop.f32.mrf.mxu1 }
 0x818   :  { %v3517_v32 = vpop.f32.mrf.mxu1 }
 0x819   :  { %4937 = vmatprep.mubr.msk.f32.mxu0 %vm3560_vm12, %v3517_v32  ;;  %4953 = vmatprep.mubr.msk.f32.mxu1 %vm3560_vm12, %v3517_v32 }
 0x81a   :  { %4938 = vmatmul.mubr.msk.f32.vlgmr.msra.gmra.mxu0 %vm3560_vm12, %v4923_v6  ;;  %4954 = vmatmul.mubr.msk.f32.vlgmr.msra.gmra.mxu1 %vm3560_vm12, %v4923_v6 }
 0x832   :  { %v4926_v38 = vpop.f32.mrf.mxu1 }
 0x834   :  { %v3527_v41 = vpop.f32.mrf.mxu1 }
 0x835   :  { %4940 = vmatprep.mubr.msk.f32.mxu0 %vm3560_vm12, %v3527_v41  ;;  %4956 = vmatprep.mubr.msk.f32.mxu1 %vm3560_vm12, %v3527_v41 }
 0x836   :  { %4941 = vmatmul.mubr.msk.f32.gmra.mxu0 %vm3560_vm12, %v4926_v38  ;;  %4957 = vmatmul.mubr.msk.f32.gmra.mxu1 %vm3560_vm12, %v4926_v38 }
 0x84e   :  { %v4929_v11 = vpop.f32.mrf.mxu1 }
 0x850   :  { %v3537_v42 = vpop.f32.mrf.mxu1 }
 0x851   :  { %4943 = vmatprep.mubr.msk.f32.mxu0 %vm3560_vm12, %v3537_v42  ;;  %4959 = vmatprep.mubr.msk.f32.mxu1 %vm3560_vm12, %v3537_v42 }
 0x852   :  { %4944 = vmatmul.mubr.msk.f32.gmra.mxu0 %vm3560_vm12, %v4929_v11  ;;  %4960 = vmatmul.mubr.msk.f32.gmra.mxu1 %vm3560_vm12, %v4929_v11 }
 0x861   :  { %v4932_v56 = vpop.f32.mrf.mxu1 }
 0x862   :  { %4965 = vmatprep.subr.mxu0 %v4932_v56  ;;  %4993 = vmatprep.subr.mxu1 %v4932_v56 }
 0x863   :  { %v3547_v10 = vpop.f32.mrf.mxu1  ;;  %4966 = vmatpush3.msra.mxu0 %v4932_v56  ;;  %5001 = vmatpush3.msra.mxu1 %v4932_v56 }
 0x864   :  { %4946 = vmatprep.mubr.msk.f32.mxu0 %vm3560_vm12, %v3547_v10  ;;  %4962 = vmatprep.mubr.msk.f32.mxu1 %vm3560_vm12, %v3547_v10 }
 0x865   :  { %4967 = vmatprep.subr.mxu0 %v3547_v10  ;;  %4994 = vmatprep.subr.mxu1 %v3547_v10 }
 0x866   :  { %4947 = vmatmul.mubr.msk.f32.gmra.mxu0 %vm3560_vm12, %v4932_v56  ;;  %4963 = vmatmul.mubr.msk.f32.gmra.mxu1 %vm3560_vm12, %v4932_v56 }
 0x867   :  { %4968 = vmatpush3.msra.mxu0 %v3547_v10  ;;  %5002 = vmatpush3.msra.mxu1 %v3547_v10 }
 0x868   :  { %4969 = vmatprep.subr.mxu0 %v4929_v11  ;;  %4995 = vmatprep.subr.mxu1 %v4929_v11 }
 0x869   :  { %4970 = vmatpush3.msra.mxu0 %v4929_v11  ;;  %5003 = vmatpush3.msra.mxu1 %v4929_v11 }
 0x86a   :  { %4971 = vmatprep.subr.mxu0 %v3537_v42  ;;  %4996 = vmatprep.subr.mxu1 %v3537_v42 }
 0x86b   :  { %4972 = vmatpush3.msra.mxu0 %v3537_v42  ;;  %5004 = vmatpush3.msra.mxu1 %v3537_v42 }
 0x86c   :  { %4973 = vmatprep.subr.mxu0 %v4926_v38  ;;  %4997 = vmatprep.subr.mxu1 %v4926_v38 }
 0x86d   :  { %4974 = vmatpush3.msra.mxu0 %v4926_v38  ;;  %5005 = vmatpush3.msra.mxu1 %v4926_v38 }
 0x86e   :  { %4975 = vmatprep.subr.mxu0 %v3527_v41  ;;  %4998 = vmatprep.subr.mxu1 %v3527_v41 }
 0x86f   :  { %4976 = vmatpush3.msra.mxu0 %v3527_v41  ;;  %5006 = vmatpush3.msra.mxu1 %v3527_v41 }
 0x870   :  { %4977 = vmatprep.subr.mxu0 %v4923_v6  ;;  %4999 = vmatprep.subr.mxu1 %v4923_v6 }
 0x871   :  { %4978 = vmatpush3.msra.mxu0 %v4923_v6  ;;  %5007 = vmatpush3.msra.mxu1 %v4923_v6 }
 0x872   :  { %4979 = vmatprep.subr.mxu0 %v3517_v32  ;;  %5000 = vmatprep.subr.mxu1 %v3517_v32 }
 0x873   :  { %4980 = vmatpush3.msra.mxu0 %v3517_v32  ;;  %5008 = vmatpush3.msra.mxu1 %v3517_v32 }
 0x8da   :  { %v4955_v37 = vpop.f32.mrf.mxu1  ;;  %v4939_v51 = vpop.f32.mrf.mxu0 }
 0x8db   :  { %3834 = vperm.xlu0 %5095, %v4955_v37  }
 0x8dc   :  { %v3756_v63 = vpop.f32.mrf.mxu1  ;;  %v3651_v44 = vpop.f32.mrf.mxu0 }
 0x8dd   :  { %3829 = vperm.xlu1 %5096, %v3756_v63  }
 0x8f6   :  { %v4958_v53 = vpop.f32.mrf.mxu1  ;;  %v4942_v18 = vpop.f32.mrf.mxu0 }
 0x8f7   :  { %3844 = vperm.xlu1 %5096, %v4958_v53  }
 0x8f8   :  { %v3766_v60 = vpop.f32.mrf.mxu1  ;;  %v3661_v43 = vpop.f32.mrf.mxu0 }
 0x8fb   :  { %3839 = vperm.xlu1 %5096, %v3766_v60  }
 0x912   :  { %v4961_v21 = vpop.f32.mrf.mxu1  ;;  %v4945_v29 = vpop.f32.mrf.mxu0 }
 0x913   :  { %3854 = vperm.xlu0 %5095, %v4961_v21  }
 0x914   :  { %v3776_v48 = vpop.f32.mrf.mxu1  ;;  %v3671_v1 = vpop.f32.mrf.mxu0 }
 0x917   :  { %3849 = vperm.xlu0 %5095, %v3776_v48   ;;  %v8140_v48 = vld [vmem:[#allocation44_spill] sm:$0xff] }
 0x918   :  { %vm8141_vm4 = vcmp.gt.f32.partialorder %v8140_v48, 0.0 }
 0x926   :  { %v4964_v36 = vpop.f32.mrf.mxu1  ;;  %v4948_v28 = vpop.f32.mrf.mxu0 }
 0x928   :  { %v3786_v16 = vpop.f32.mrf.mxu1  ;;  %v3681_v22 = vpop.f32.mrf.mxu0 }
 0x929   :  { %3859 = vperm.xlu1 %5096, %v3786_v16  }
 0x92d   :  { %3864 = vperm.xlu1 %5096, %v4964_v36  }
 0x935   :  { %3795 = vxpose.xlu0.b32.start [1/8] (short) (narrow) %v3651_v44, 8  ;;  %v8142_v44 = vld [vmem:[#allocation45_spill] sm:$0xff] }
 0x939   :  { %3796 = vxpose.xlu0.b32.cont [2/8] (short) (narrow) %v4939_v51, 8 }
 0x93d   :  { %3797 = vxpose.xlu0.b32.cont [3/8] (short) (narrow) %v3661_v43, 8 }
 0x941   :  { %3798 = vxpose.xlu0.b32.cont [4/8] (short) (narrow) %v4942_v18, 8 }
 0x945   :  { %3799 = vxpose.xlu0.b32.cont [5/8] (short) (narrow) %v3671_v1, 8 }
 0x949   :  { %3800 = vxpose.xlu0.b32.cont [6/8] (short) (narrow) %v4945_v29, 8 }
 0x94d   :  { %3801 = vxpose.xlu0.b32.cont [7/8] (short) (narrow) %v3681_v22, 8 }
 0x951   :  { %3802 = vxpose.xlu0.b32.end [8/8] (short) (narrow) %v4948_v28, 8 }
 0x956   :  { %v3835_v17 = vpop.permute.xlu0 %3834 }
 0x958   :  { %v3830_v40 = vpop.permute.xlu1 %3829 }
 0x972   :  { %v3845_v13 = vpop.permute.xlu1 %3844 }
 0x976   :  { %v3840_v59 = vpop.permute.xlu1 %3839 }
 0x98e   :  { %v3855_v4 = vpop.permute.xlu0 %3854 }
 0x992   :  { %v3850_v9 = vpop.permute.xlu0 %3849 }
 0x9a4   :  { %v3860_v49 = vpop.permute.xlu1 %3859 }
 0x9a8   :  { %v3865_v52 = vpop.permute.xlu1 %3864 }
 0x9b1   :  { %v3811_v12 = vpop.trf.xlu0 }
 0x9b2   :  { %v3870_v14 = vrot.slane %v3811_v12, %v8133_v7 }
 0x9b4   :  { %v3878_v24 = vadd.f32 %v3870_v14, %v3865_v52  ;;  %v3872_v23 = vadd.f32 %v3870_v14, %v3835_v17  ;;  %v3871_v25 = vadd.f32 %v3870_v14, %v3830_v40  ;;  %v3874_v57 = vadd.f32 %v3870_v14, %v3845_v13 }
 0x9b5   :  { %v3873_v0 = vadd.f32 %v3870_v14, %v3840_v59  ;;  %v3875_v8 = vadd.f32 %v3870_v14, %v3850_v9  ;;  %v3877_v6 = vadd.f32 %v3870_v14, %v3860_v49  ;;  %v3876_v56 = vadd.f32 %v3870_v14, %v3855_v4 }
 0x9b6   :  { %vm3886_vm13 = vcmp.gt.f32.partialorder %v3878_v24, 0.0  ;;  %v3894_v20 = vmul.f32 0.2, %v3878_v24  ;;  %vm3880_vm3 = vcmp.gt.f32.partialorder %v3872_v23, 0.0  ;;  %v3888_v55 = vmul.f32 0.2, %v3872_v23 }
 0x9b7   :  { %vm3879_vm15 = vcmp.gt.f32.partialorder %v3871_v25, 0.0  ;;  %v3887_v2 = vmul.f32 0.2, %v3871_v25  ;;  %v3890_v58 = vmul.f32 0.2, %v3874_v57  ;;  %vm3882_vm0 = vcmp.gt.f32.partialorder %v3874_v57, 0.0 }
 0x9b8   :  { %v3902_v47 = vsel %vm3886_vm13, %v3878_v24, %v3894_v20  ;;  %v3896_v5 = vsel %vm3880_vm3, %v3872_v23, %v3888_v55  ;;  %v3889_v35 = vmul.f32 0.2, %v3873_v0  ;;  %v3891_v15 = vmul.f32 0.2, %v3875_v8  ;;  %v5442_v24 = vld [vmem:[%s7860_s1 + $0x8] sm:$0xff]  ;;  %v5443_v20 = vld [vmem:[%s7860_s1] sm:$0xff] }
 0x9b9   :  { %v7707_v26 = vsel %vm551_vm10, %v3902_v47, -1e+30  ;;  %v3904_v45 = vsel %vm545_vm2, %v3896_v5, -1e+30  ;;  %v3895_v27 = vsel %vm3879_vm15, %v3871_v25, %v3887_v2  ;;  %v3898_v39 = vsel %vm3882_vm0, %v3874_v57, %v3890_v58 }
 0x9ba   :  { %v3932_v19 = vsel %vm201_vm1, %v7707_v26, -inf  ;;  %v3914_v34 = vsel %vm201_vm1, %v3904_v45, -inf  ;;  %v3903_v31 = vsel %vm544_vm5, %v3895_v27, -1e+30  ;;  %vm3881_vm10 = vcmp.gt.f32.partialorder %v3873_v0, 0.0  ;;  %v5444_v27 = vld [vmem:[%s7860_s1 + $0x18] sm:$0xff] }
 0x9bb   :  { %3933 = vmax.xlane.f32.xlu0 %v3932_v19  ;;  %3915 = vmax.xlane.f32.xlu1 %v3914_v34  ;;  %v3911_v61 = vsel %vm201_vm1, %v3903_v31, -inf  ;;  %v3906_v46 = vsel %vm547_vm7, %v3898_v39, -1e+30  ;;  %v3897_v62 = vsel %vm3881_vm10, %v3873_v0, %v3889_v35  ;;  %vm3883_vm2 = vcmp.gt.f32.partialorder %v3875_v8, 0.0  ;;  %v5445_v35 = vld [vmem:[%s7860_s1 + $0x10] sm:$0xff] }
 0x9bc   :  { %v3920_v32 = vsel %vm201_vm1, %v3906_v46, -inf  ;;  %v3905_v41 = vsel %vm546_vm14, %v3897_v62, -1e+30  ;;  %v3899_v11 = vsel %vm3883_vm2, %v3875_v8, %v3891_v15  ;;  %v3893_v42 = vmul.f32 0.2, %v3877_v6 }
 0x9bd   :  { %vm3885_vm5 = vcmp.gt.f32.partialorder %v3877_v6, 0.0  ;;  %v3917_v10 = vsel %vm201_vm1, %v3905_v41, -inf  ;;  %v3907_v63 = vsel %vm548_vm6, %v3899_v11, -1e+30  ;;  %v3892_v60 = vmul.f32 0.2, %v3876_v56 }
 0x9be   :  { %v3901_v53 = vsel %vm3885_vm5, %v3877_v6, %v3893_v42  ;;  %vm3884_vm7 = vcmp.gt.f32.partialorder %v3876_v56, 0.0  ;;  %v3923_v21 = vsel %vm201_vm1, %v3907_v63, -inf  ;;  %vm8143_vm14 = vcmp.gt.f32.partialorder %v8142_v44, 0.0  ;;  %v5448_v42 = vld [vmem:[%s7860_s1 + $0x30] sm:$0xff] }
 0x9bf   :  { %3912 = vmax.xlane.f32.xlu1 %v3911_v61  ;;  %v3909_v36 = vsel %vm8141_vm4, %v3901_v53, -1e+30  ;;  %v3900_v16 = vsel %vm3884_vm7, %v3876_v56, %v3892_v60 }
 0x9c0   :  { %v3929_v51 = vsel %vm201_vm1, %v3909_v36, -inf  ;;  %v3908_v18 = vsel %vm8143_vm14, %v3900_v16, -1e+30 }
 0x9c1   :  { %v3926_v43 = vsel %vm201_vm1, %v3908_v18, -inf }
 0x9c3   :  { %3921 = vmax.xlane.f32.xlu1 %v3920_v32  ;;  %v5447_v32 = vld [vmem:[%s7860_s1 + $0x20] sm:$0xff] }
 0x9c7   :  { %3918 = vmax.xlane.f32.xlu1 %v3917_v10 }
 0x9cb   :  { %3924 = vmax.xlane.f32.xlu1 %v3923_v21 }
 0x9cf   :  { %3930 = vmax.xlane.f32.xlu1 %v3929_v51 }
 0x9d3   :  { %3927 = vmax.xlane.f32.xlu1 %v3926_v43 }
 0xa44   :  { %v3916_v29 = vpop.xlane.xlu1 %3915  ;;  %v3934_v54 = vpop.xlane.xlu0 %3933 }
 0xa45   :  { %v3936_v1 = vsub.f32 %v3904_v45, %v3916_v29  ;;  %v3942_v34 = vsub.f32 %v7707_v26, %v3934_v54  ;;  %v5446_v26 = vld [vmem:[%s7860_s1 + $0x28] sm:$0xff] }
 0xa47   :  { %v3945_v28 = vmul.f32 1.442695, %v3936_v1  ;;  %v3957_v61 = vmul.f32 1.442695, %v3942_v34 }
 0xa48   :  { %v3913_v22 = vpop.xlane.xlu1 %3912 }
 0xa49   :  { %v3935_v40 = vsub.f32 %v3903_v31, %v3913_v22  ;;  %5369 = vpow2.f32 %v3945_v28 }
 0xa4b   :  { %v3943_v17 = vmul.f32 1.442695, %v3935_v40 }
 0xa4c   :  { %v3922_v13 = vpop.xlane.xlu1 %3921 }
 0xa4d   :  { %5371 = vpow2.f32 %v3943_v17  ;;  %v3938_v4 = vsub.f32 %v3906_v46, %v3922_v13 }
 0xa4f   :  { %v3949_v59 = vmul.f32 1.442695, %v3938_v4 }
 0xa50   :  { %v3919_v9 = vpop.xlane.xlu1 %3918 }
 0xa51   :  { %5373 = vpow2.f32 %v3949_v59  ;;  %v3937_v49 = vsub.f32 %v3905_v41, %v3919_v9 }
 0xa53   :  { %v3947_v12 = vmul.f32 1.442695, %v3937_v49 }
 0xa54   :  { %v3925_v50 = vpop.xlane.xlu1 %3924 }
 0xa55   :  { %5375 = vpow2.f32 %v3947_v12  ;;  %v3939_v14 = vsub.f32 %v3907_v63, %v3925_v50  ;;  %v5449_v63 = vld [vmem:[%s7860_s1 + $0x38] sm:$0xff] }
 0xa56   :  { %v5370_v7 = vpop.eup %5369 }
 0xa57   :  { %v3960_v23 = vmul.f32 %v5442_v24, %v5370_v7  ;;  %v3951_v2 = vmul.f32 1.442695, %v3939_v14  ;;  %v4372_v24 = vld [vmem:[%s7865_s9] ss:$0 sm:$0xff] }
 0xa58   :  { %v3931_v52 = vpop.xlane.xlu1 %3930 }
 0xa59   :  { %v3970_v57 = vsel %vm201_vm1, %v3960_v23, 0.0  ;;  %v3941_v5 = vsub.f32 %v3909_v36, %v3931_v52  ;;  %5377 = vpow2.f32 %v3951_v2 }
 0xa5a   :  { %v5372_v25 = vpop.eup %5371  ;;  %3971 = vadd.xlane.f32.xlu1 %v3970_v57 }
 0xa5b   :  { %v3959_v55 = vmul.f32 %v5443_v20, %v5372_v25  ;;  %v3955_v30 = vmul.f32 1.442695, %v3941_v5 }
 0xa5c   :  { %v3928_v47 = vpop.xlane.xlu1 %3927 }
 0xa5d   :  { %v3940_v58 = vsub.f32 %v3908_v18, %v3928_v47  ;;  %v3967_v0 = vsel %vm201_vm1, %v3959_v55, 0.0 }
 0xa5e   :  { %v5374_v3 = vpop.eup %5373  ;;  %3968 = vadd.xlane.f32.xlu1 %v3967_v0 }
 0xa5f   :  { %v3953_v45 = vmul.f32 1.442695, %v3940_v58  ;;  %v3962_v19 = vmul.f32 %v5444_v27, %v5374_v3 }
 0xa61   :  { %5379 = vpow2.f32 %v3953_v45  ;;  %v3976_v31 = vsel %vm201_vm1, %v3962_v19, 0.0 }
 0xa62   :  { %v5376_v39 = vpop.eup %5375  ;;  %3977 = vadd.xlane.f32.xlu1 %v3976_v31  ;;  %5381 = vpow2.f32 %v3955_v30 }
 0xa63   :  { %v3961_v8 = vmul.f32 %v5445_v35, %v5376_v39  ;;  %5383 = vpow2.f32 %v3957_v61 }
 0xa65   :  { %v3973_v33 = vsel %vm201_vm1, %v3961_v8, 0.0 }
 0xa66   :  { %3974 = vadd.xlane.f32.xlu1 %v3973_v33  ;;  %v5378_v46 = vpop.eup %5377 }
 0xa67   :  { %v3963_v38 = vmul.f32 %v5447_v32, %v5378_v46 }
 0xa69   :  { %v3979_v11 = vsel %vm201_vm1, %v3963_v38, 0.0 }
 0xa6e   :  { %v5380_v62 = vpop.eup %5379 }
 0xa6f   :  { %v3964_v15 = vmul.f32 %v5446_v26, %v5380_v62  ;;  %v5382_v41 = vpop.eup %5381 }
 0xa70   :  { %v3965_v56 = vmul.f32 %v5448_v42, %v5382_v41  ;;  %v5384_v10 = vpop.eup %5383 }
 0xa71   :  { %v3982_v6 = vsel %vm201_vm1, %v3964_v15, 0.0  ;;  %v3966_v53 = vmul.f32 %v5449_v63, %v5384_v10 }
 0xa72   :  { %3983 = vadd.xlane.f32.xlu1 %v3982_v6  ;;  %v3985_v37 = vsel %vm201_vm1, %v3965_v56, 0.0 }
 0xa73   :  { %v3988_v60 = vsel %vm201_vm1, %v3966_v53, 0.0 }
 0xa76   :  { %3980 = vadd.xlane.f32.xlu1 %v3979_v11 }
 0xa7a   :  { %3986 = vadd.xlane.f32.xlu1 %v3985_v37 }
 0xa7e   :  { %3989 = vadd.xlane.f32.xlu1 %v3988_v60 }
 0xae3   :  { %v3972_v21 = vpop.xlane.xlu1 %3971 }
 0xae4   :  { %5385 = vrcp.f32 %v3972_v21 }
 0xae7   :  { %v3969_v48 = vpop.xlane.xlu1 %3968 }
 0xae8   :  { %5387 = vrcp.f32 %v3969_v48 }
 0xaeb   :  { %v3978_v36 = vpop.xlane.xlu1 %3977 }
 0xaec   :  { %5389 = vrcp.f32 %v3978_v36 }
 0xaef   :  { %v3975_v16 = vpop.xlane.xlu1 %3974 }
 0xaf0   :  { %5391 = vrcp.f32 %v3975_v16 }
 0xaf1   :  { %v5386_v51 = vpop.eup %5385 }
 0xaf2   :  { %v3994_v43 = vmul.f32 %v5386_v51, %v3960_v23 }
 0xaf5   :  { %v5388_v44 = vpop.eup %5387 }
 0xaf6   :  { %v3992_v18 = vmul.f32 %v5388_v44, %v3959_v55 }
 0xaf8   :  { %4981 = vmatprep.mubr.msk.f32.mxu0 %vm201_vm1, %v3992_v18 }
 0xaf9   :  { %4982 = vmatmul.mubr.msk.f32.vlgmr.msra.gmra.mxu0 %vm201_vm1, %v3994_v43  ;;  %v5390_v1 = vpop.eup %5389 }
 0xafa   :  { %v3998_v17 = vmul.f32 %v5390_v1, %v3962_v19 }
 0xafb   :  { %v3984_v29 = vpop.xlane.xlu1 %3983 }
 0xafc   :  { %5393 = vrcp.f32 %v3984_v29 }
 0xafd   :  { %v5392_v28 = vpop.eup %5391 }
 0xafe   :  { %v3996_v40 = vmul.f32 %v5392_v28, %v3961_v8 }
 0xaff   :  { %v3981_v22 = vpop.xlane.xlu1 %3980 }
 0xb00   :  { %5395 = vrcp.f32 %v3981_v22  ;;  %4984 = vmatprep.mubr.msk.f32.mxu0 %vm201_vm1, %v3996_v40 }
 0xb01   :  { %4985 = vmatmul.mubr.msk.f32.gmra.mxu0 %vm201_vm1, %v3998_v17 }
 0xb03   :  { %v3987_v13 = vpop.xlane.xlu1 %3986 }
 0xb04   :  { %5397 = vrcp.f32 %v3987_v13 }
 0xb07   :  { %v3990_v4 = vpop.xlane.xlu1 %3989 }
 0xb08   :  { %5399 = vrcp.f32 %v3990_v4 }
 0xb09   :  { %v5394_v59 = vpop.eup %5393 }
 0xb0a   :  { %v4002_v12 = vmul.f32 %v5394_v59, %v3964_v15 }
 0xb0d   :  { %v5396_v9 = vpop.eup %5395 }
 0xb0e   :  { %v4000_v49 = vmul.f32 %v5396_v9, %v3963_v38 }
 0xb10   :  { %4987 = vmatprep.mubr.msk.f32.mxu0 %vm201_vm1, %v4000_v49 }
 0xb11   :  { %v5398_v50 = vpop.eup %5397  ;;  %4988 = vmatmul.mubr.msk.f32.gmra.mxu0 %vm201_vm1, %v4002_v12 }
 0xb12   :  { %v4004_v7 = vmul.f32 %v5398_v50, %v3965_v56 }
 0xb14   :  { %4990 = vmatprep.mubr.msk.f32.mxu1 %vm201_vm1, %v4004_v7 }
 0xb15   :  { %v5400_v14 = vpop.eup %5399 }
 0xb16   :  { %v4006_v52 = vmul.f32 %v5400_v14, %v3966_v53 }
 0xb18   :  { %4991 = vmatmul.mubr.msk.f32.vlgmr.msra.gmra.mxu1 %vm201_vm1, %v4006_v52 }
 0xbb9   :  { %v4983_v23 = vpop.f32.mrf.mxu0 }
 0xbba   :  { %v4110_v25 = vadd.f32 %v4983_v23, %v4372_v24 }
 0xbbb   :  { %v4104_v57 = vpop.f32.mrf.mxu0 }
 0xbbc   :  { %v4105_v20 = vadd.f32 %v4372_v24, %v4104_v57  ;;  %v4146_v55 = vsel %vm3560_vm12, %v4110_v25, -inf }
 0xbbd   :  { %4147 = vmax.xlane.f32.xlu1 %v4146_v55 }
 0xbbe   :  { %v4143_v2 = vsel %vm3560_vm12, %v4105_v20, -inf }
 0xbc1   :  { %4144 = vmax.xlane.f32.xlu1 %v4143_v2  ;;  %v4986_v47 = vpop.f32.mrf.mxu0 }
 0xbc2   :  { %v4120_v5 = vadd.f32 %v4986_v47, %v4372_v24 }
 0xbc3   :  { %v4114_v58 = vpop.f32.mrf.mxu0 }
 0xbc4   :  { %v4115_v0 = vadd.f32 %v4372_v24, %v4114_v58  ;;  %v4152_v3 = vsel %vm3560_vm12, %v4120_v5, -inf }
 0xbc5   :  { %4153 = vmax.xlane.f32.xlu0 %v4152_v3 }
 0xbc6   :  { %v4149_v54 = vsel %vm3560_vm12, %v4115_v0, -inf }
 0xbc7   :  { %4150 = vmax.xlane.f32.xlu1 %v4149_v54 }
 0xbd1   :  { %v4989_v45 = vpop.f32.mrf.mxu0 }
 0xbd2   :  { %v4130_v27 = vadd.f32 %v4989_v45, %v4372_v24 }
 0xbd3   :  { %v4124_v19 = vpop.f32.mrf.mxu0 }
 0xbd4   :  { %v4125_v34 = vadd.f32 %v4372_v24, %v4124_v19  ;;  %v4158_v30 = vsel %vm3560_vm12, %v4130_v27, -inf }
 0xbd5   :  { %4159 = vmax.xlane.f32.xlu0 %v4158_v30 }
 0xbd6   :  { %v4155_v31 = vsel %vm3560_vm12, %v4125_v34, -inf }
 0xbd7   :  { %4156 = vmax.xlane.f32.xlu1 %v4155_v31 }
 0xbd8   :  { %v4992_v39 = vpop.f32.mrf.mxu1 }
 0xbd9   :  { %v4140_v35 = vadd.f32 %v4992_v39, %v4372_v24 }
 0xbda   :  { %v4134_v8 = vpop.f32.mrf.mxu1 }
 0xbdb   :  { %v4135_v61 = vadd.f32 %v4372_v24, %v4134_v8  ;;  %v4164_v33 = vsel %vm3560_vm12, %v4140_v35, -inf }
 0xbdc   :  { %4165 = vmax.xlane.f32.xlu0 %v4164_v33 }
 0xbdd   :  { %v4161_v46 = vsel %vm3560_vm12, %v4135_v61, -inf }
 0xbde   :  { %4162 = vmax.xlane.f32.xlu1 %v4161_v46 }
 0xc46   :  { %v4148_v62 = vpop.xlane.xlu1 %4147 }
 0xc47   :  { %v7784_v26 = vsub.f32 %v4110_v25, %v4148_v62 }
 0xc49   :  { %v4177_v15 = vmul.f32 1.442695, %v7784_v26 }
 0xc4a   :  { %v4145_v6 = vpop.xlane.xlu1 %4144 }
 0xc4b   :  { %5401 = vpow2.f32 %v4177_v15  ;;  %v7787_v32 = vsub.f32 %v4105_v20, %v4145_v6 }
 0xc4d   :  { %v4175_v38 = vmul.f32 1.442695, %v7787_v32 }
 0xc4e   :  { %v4154_v41 = vpop.xlane.xlu0 %4153 }
 0xc4f   :  { %5403 = vpow2.f32 %v4175_v38  ;;  %v7790_v11 = vsub.f32 %v4120_v5, %v4154_v41 }
 0xc50   :  { %v4151_v42 = vpop.xlane.xlu1 %4150 }
 0xc51   :  { %v4181_v56 = vmul.f32 1.442695, %v7790_v11  ;;  %v7793_v10 = vsub.f32 %v4115_v0, %v4151_v42 }
 0xc53   :  { %5405 = vpow2.f32 %v4181_v56  ;;  %v4179_v37 = vmul.f32 1.442695, %v7793_v10 }
 0xc55   :  { %5407 = vpow2.f32 %v4179_v37 }
 0xc58   :  { %v5402_v63 = vpop.eup %5401 }
 0xc59   :  { %v4194_v53 = vsel %vm3560_vm12, %v5402_v63, 0.0 }
 0xc5a   :  { %4195 = vadd.xlane.f32.xlu0 %v4194_v53 }
 0xc5c   :  { %v5404_v60 = vpop.eup %5403 }
 0xc5d   :  { %v4191_v48 = vsel %vm3560_vm12, %v5404_v60, 0.0 }
 0xc5e   :  { %v4160_v21 = vpop.xlane.xlu0 %4159  ;;  %4192 = vadd.xlane.f32.xlu1 %v4191_v48 }
 0xc5f   :  { %v7798_v36 = vsub.f32 %v4130_v27, %v4160_v21 }
 0xc60   :  { %v4157_v16 = vpop.xlane.xlu1 %4156  ;;  %v5406_v51 = vpop.eup %5405 }
 0xc61   :  { %v4185_v44 = vmul.f32 1.442695, %v7798_v36  ;;  %v7801_v18 = vsub.f32 %v4125_v34, %v4157_v16  ;;  %v4200_v43 = vsel %vm3560_vm12, %v5406_v51, 0.0 }
 0xc62   :  { %v5408_v29 = vpop.eup %5407  ;;  %4201 = vadd.xlane.f32.xlu0 %v4200_v43 }
 0xc63   :  { %5409 = vpow2.f32 %v4185_v44  ;;  %v4183_v1 = vmul.f32 1.442695, %v7801_v18  ;;  %v4197_v28 = vsel %vm3560_vm12, %v5408_v29, 0.0 }
 0xc64   :  { %4198 = vadd.xlane.f32.xlu1 %v4197_v28 }
 0xc65   :  { %5411 = vpow2.f32 %v4183_v1  ;;  %v4166_v22 = vpop.xlane.xlu0 %4165 }
 0xc66   :  { %v7806_v40 = vsub.f32 %v4140_v35, %v4166_v22 }
 0xc67   :  { %v4163_v17 = vpop.xlane.xlu1 %4162 }
 0xc68   :  { %v4189_v13 = vmul.f32 1.442695, %v7806_v40  ;;  %v7809_v4 = vsub.f32 %v4135_v61, %v4163_v17 }
 0xc6a   :  { %5413 = vpow2.f32 %v4189_v13  ;;  %v4187_v59 = vmul.f32 1.442695, %v7809_v4 }
 0xc6c   :  { %5415 = vpow2.f32 %v4187_v59 }
 0xc70   :  { %v5410_v9 = vpop.eup %5409 }
 0xc71   :  { %v4206_v49 = vsel %vm3560_vm12, %v5410_v9, 0.0 }
 0xc72   :  { %v5412_v12 = vpop.eup %5411  ;;  %4207 = vadd.xlane.f32.xlu0 %v4206_v49 }
 0xc73   :  { %v4203_v50 = vsel %vm3560_vm12, %v5412_v12, 0.0 }
 0xc74   :  { %4204 = vadd.xlane.f32.xlu1 %v4203_v50 }
 0xc77   :  { %v5414_v7 = vpop.eup %5413 }
 0xc78   :  { %v4212_v14 = vsel %vm3560_vm12, %v5414_v7, 0.0 }
 0xc79   :  { %v5416_v52 = vpop.eup %5415  ;;  %4213 = vadd.xlane.f32.xlu0 %v4212_v14 }
 0xc7a   :  { %v4209_v24 = vsel %vm3560_vm12, %v5416_v52, 0.0 }
 0xc7b   :  { %4210 = vadd.xlane.f32.xlu1 %v4209_v24 }
 0xce3   :  { %v4196_v23 = vpop.xlane.xlu0 %4195 }
 0xce4   :  { %5417 = vlog2.f32 %v4196_v23 }
 0xce7   :  { %v4193_v25 = vpop.xlane.xlu1 %4192 }
 0xce8   :  { %5419 = vlog2.f32 %v4193_v25 }
 0xceb   :  { %v4202_v57 = vpop.xlane.xlu0 %4201 }
 0xcec   :  { %5421 = vlog2.f32 %v4202_v57 }
 0xced   :  { %v4199_v20 = vpop.xlane.xlu1 %4198 }
 0xcee   :  { %5423 = vlog2.f32 %v4199_v20 }
 0xcf1   :  { %v5418_v55 = vpop.eup %5417 }
 0xcf2   :  { %v4218_v2 = vmul.f32 0.6931472, %v5418_v55 }
 0xcf4   :  { %v4232_v47 = vsub.f32 %v7784_v26, %v4218_v2 }
 0xcf5   :  { %v5420_v5 = vpop.eup %5419 }
 0xcf6   :  { %4240 = vst.msk [vmem:[%s7866_s10 + $0x8] sm:$0xff] %vm3560_vm12, %v4232_v47  ;;  %v4216_v58 = vmul.f32 0.6931472, %v5420_v5 }
 0xcf8   :  { %v4231_v0 = vsub.f32 %v7787_v32, %v4216_v58 }
 0xcf9   :  { %v5422_v3 = vpop.eup %5421 }
 0xcfa   :  { %4239 = vst.msk [vmem:[%s7866_s10] sm:$0xff] %vm3560_vm12, %v4231_v0  ;;  %v4222_v54 = vmul.f32 0.6931472, %v5422_v3 }
 0xcfb   :  { %v4208_v45 = vpop.xlane.xlu0 %4207  ;;  %v5424_v27 = vpop.eup %5423 }
 0xcfc   :  { %5425 = vlog2.f32 %v4208_v45  ;;  %v4234_v19 = vsub.f32 %v7790_v11, %v4222_v54  ;;  %v4220_v34 = vmul.f32 0.6931472, %v5424_v27 }
 0xcfd   :  { %v4205_v30 = vpop.xlane.xlu1 %4204 }
 0xcfe   :  { %5427 = vlog2.f32 %v4205_v30  ;;  %4242 = vst.msk [vmem:[%s7866_s10 + $0x18] sm:$0xff] %vm3560_vm12, %v4234_v19  ;;  %v4233_v31 = vsub.f32 %v7793_v10, %v4220_v34 }
 0xd00   :  { %4241 = vst.msk [vmem:[%s7866_s10 + $0x10] sm:$0xff] %vm3560_vm12, %v4233_v31 }
 0xd02   :  { %v4214_v39 = vpop.xlane.xlu0 %4213 }
 0xd03   :  { %5429 = vlog2.f32 %v4214_v39 }
 0xd04   :  { %v4211_v35 = vpop.xlane.xlu1 %4210 }
 0xd05   :  { %5431 = vlog2.f32 %v4211_v35 }
 0xd09   :  { %v5426_v8 = vpop.eup %5425 }
 0xd0a   :  { %v4226_v61 = vmul.f32 0.6931472, %v5426_v8 }
 0xd0b   :  { %v5428_v33 = vpop.eup %5427 }
 0xd0c   :  { %v4236_v46 = vsub.f32 %v7798_v36, %v4226_v61  ;;  %v4224_v62 = vmul.f32 0.6931472, %v5428_v33 }
 0xd0e   :  { %4244 = vst.msk [vmem:[%s7866_s10 + $0x28] sm:$0xff] %vm3560_vm12, %v4236_v46  ;;  %v4235_v26 = vsub.f32 %v7801_v18, %v4224_v62 }
 0xd10   :  { %v5430_v15 = vpop.eup %5429  ;;  %4243 = vst.msk [vmem:[%s7866_s10 + $0x20] sm:$0xff] %vm3560_vm12, %v4235_v26 }
 0xd11   :  { %v4230_v6 = vmul.f32 0.6931472, %v5430_v15 }
 0xd12   :  { %v5432_v32 = vpop.eup %5431 }
 0xd13   :  { %v4238_v38 = vsub.f32 %v7806_v40, %v4230_v6  ;;  %v4228_v41 = vmul.f32 0.6931472, %v5432_v32 }
 0xd15   :  { %4246 = vst.msk [vmem:[%s7866_s10 + $0x38] sm:$0xff] %vm3560_vm12, %v4238_v38  ;;  %v4237_v11 = vsub.f32 %v7809_v4, %v4228_v41 }
 0xd17   :  { %4245 = vst.msk [vmem:[%s7866_s10 + $0x30] sm:$0xff] %vm3560_vm12, %v4237_v11 }

</bundles_post_ra>
